<compile_context>
chip_gen: v6e
topology: v6e:2x2x1
jax: 0.10.0
libtpu: 0.0.40
codegen_flags: <defaults>
</compile_context>

<pallas_src>
import jax
import jax.numpy as jnp
from jax.experimental import pallas as pl
from jax.experimental.pallas import tpu as pltpu

# ---- scaled-down bert-base config (small, lane-aligned shapes) ---------------
B = 2            # batch
S = 8            # sequence length
H = 128          # hidden size (BERT_HIDDEN_SIZE scaled down for the demo)
NH = 2           # attention heads
HD = H // NH     # head dim
FF = 4 * H       # FFN intermediate size
L = 2            # number of encoder layers
V = 128          # vocab size (padded to 128 so the one-hot gather matmul is lane-dense)
N_SENTIMENT_CLASSES = 5
LN_EPS = 1e-12
LANE = 128       # lane-dense padding width for tiny head outputs

N_ENC_REFS = 21  # number of refs consumed by the fused encoder body


def _layernorm(x, g, b):
    x = x.astype(jnp.float32)
    mu = jnp.mean(x, axis=-1, keepdims=True)
    var = jnp.mean(jnp.square(x - mu), axis=-1, keepdims=True)
    return (x - mu) * jax.lax.rsqrt(var + LN_EPS) * g + b


# ---------------------------- fused encoder body ------------------------------
# Consumes the first N_ENC_REFS refs and returns the (n, H) float32 pooler output.
#   ids, mask, word_emb, pos_emb, type_emb, emb_ln_g, emb_ln_b,
#   wqkv[L], bqkv[L], wo[L*NH], bo[L], ln1g[L], ln1b[L],
#   w1[L], b1[L], w2[L], b2[L], ln2g[L], ln2b[L], pool_w, pool_b

def _encoder(ids_ref, mask_ref, wemb_ref, pemb_ref, temb_ref, embg_ref, embb_ref,
             wqkv_ref, bqkv_ref, wo_ref, bo_ref, ln1g_ref, ln1b_ref,
             w1_ref, b1_ref, w2_ref, b2_ref, ln2g_ref, ln2b_ref,
             poolw_ref, poolb_ref):
    mask = mask_ref[...].astype(jnp.float32)                 # (n, S)
    n = mask.shape[0]
    m = n * S

    # --- in-kernel embedding lookup: one-hot(ids) @ word_emb on the MXU -------
    ids = ids_ref[...]                                       # (n*S, 1) int32
    iota = jax.lax.broadcasted_iota(jnp.int32, (m, V), 1)
    onehot = (ids == iota).astype(jnp.bfloat16)              # (n*S, V)
    tok = jnp.dot(onehot, wemb_ref[...],
                  preferred_element_type=jnp.float32)        # (n*S, H)
    xe = tok.reshape(n, S, H) + pemb_ref[...] + temb_ref[...]

    # --- additive key-padding bias, broadcast ONCE and reused L*NH times ------
    bias = jnp.broadcast_to(((1.0 - mask) * -10000.0)[:, None, :], (n, S, S))

    x = _layernorm(xe, embg_ref[...], embb_ref[...]).reshape(m, H)

    for l in range(L):                                       # static unroll; weights in VMEM
        # fused QKV projection: one (m, H) @ (H, 3H) matmul (1/sqrt(HD) folded in Wq/bq)
        qkv = jnp.dot(x.astype(jnp.bfloat16), wqkv_ref[l],
                      preferred_element_type=jnp.float32) + bqkv_ref[l]   # (m, 3H)

        # multi-head attention; heads merged by summing per-head output projections
        # (no 64-lane concatenate / relayout).
        attn = jnp.zeros((m, H), jnp.float32)
        for h in range(NH):                                  # static unroll, NH=2
            qh = qkv[:, h * HD:(h + 1) * HD].reshape(n, S, HD).astype(jnp.bfloat16)
            kh = qkv[:, H + h * HD:H + (h + 1) * HD].reshape(n, S, HD).astype(jnp.bfloat16)
            vh = qkv[:, 2 * H + h * HD:2 * H + (h + 1) * HD].reshape(n, S, HD).astype(jnp.bfloat16)
            s = jnp.einsum('bqd,bkd->bqk', qh, kh,
                           preferred_element_type=jnp.float32) + bias      # (n, S, S)
            s = s - jnp.max(s, axis=-1, keepdims=True)
            p = jnp.exp(s)
            p = p * pl.reciprocal(jnp.sum(p, axis=-1, keepdims=True), approx=True)
            # TODO(synk): attention-prob dropout omitted (identity at inference).
            ctx = jnp.einsum('bqk,bkd->bqd', p.astype(jnp.bfloat16), vh,
                             preferred_element_type=jnp.float32)           # (n, S, HD)
            attn = attn + jnp.dot(ctx.reshape(m, HD).astype(jnp.bfloat16),
                                  wo_ref[l * NH + h],
                                  preferred_element_type=jnp.float32)
        attn = attn + bo_ref[l]
        # TODO(synk): hidden dropout omitted (identity at inference).
        h1 = _layernorm(x + attn, ln1g_ref[l], ln1b_ref[l])

        # feed-forward + residual + LayerNorm
        ff = jnp.dot(h1.astype(jnp.bfloat16), w1_ref[l],
                     preferred_element_type=jnp.float32) + b1_ref[l]
        # TODO(synk): reference BERT uses exact erf GELU; tanh approximation used here.
        ff = jax.nn.gelu(ff, approximate=True)
        ff = jnp.dot(ff.astype(jnp.bfloat16), w2_ref[l],
                     preferred_element_type=jnp.float32) + b2_ref[l]
        x = _layernorm(h1 + ff, ln2g_ref[l], ln2b_ref[l])

    # CLS pooler: dense + tanh on the first token
    cls = x.reshape(n, S, H)[:, 0, :]                        # (n, H)
    pooled = jnp.tanh(jnp.dot(cls.astype(jnp.bfloat16), poolw_ref[...],
                              preferred_element_type=jnp.float32) + poolb_ref[...])
    return pooled


# ---------------------------- kernel bodies -----------------------------------

def _forward_kernel(*refs):
    out_ref = refs[N_ENC_REFS]
    out_ref[...] = _encoder(*refs[:N_ENC_REFS]).astype(out_ref.dtype)   # (n, H) lane-dense


def _sentiment_kernel(*refs):
    sw_ref, sb_ref, out_ref = refs[N_ENC_REFS], refs[N_ENC_REFS + 1], refs[N_ENC_REFS + 2]
    pooled = _encoder(*refs[:N_ENC_REFS])
    # TODO(synk): classifier dropout omitted (identity at inference).
    logits = jnp.dot(pooled.astype(jnp.bfloat16), sw_ref[...],
                     preferred_element_type=jnp.float32) + sb_ref[...]
    out_ref[...] = logits.astype(out_ref.dtype)              # (n, 128) lane-dense (5 real)


def _paraphrase_kernel(*refs):
    w1_ref = refs[N_ENC_REFS]
    w2_ref = refs[N_ENC_REFS + 1]
    b_ref = refs[N_ENC_REFS + 2]
    out_ref = refs[N_ENC_REFS + 3]
    pooled = _encoder(*refs[:N_ENC_REFS])                    # (2B, H), both sentences
    nb = pooled.shape[0] // 2
    p1 = pooled[:nb].astype(jnp.bfloat16)
    p2 = pooled[nb:].astype(jnp.bfloat16)
    # Linear(2H -> 1) on concat(p1, p2) == p1 @ W[:H] + p2 @ W[H:] + b
    out = (jnp.dot(p1, w1_ref[...], preferred_element_type=jnp.float32)
           + jnp.dot(p2, w2_ref[...], preferred_element_type=jnp.float32)
           + b_ref[...])
    out_ref[...] = out.astype(out_ref.dtype)                 # (B, 128) lane-dense (1 real)


def _similarity_kernel(*refs):
    out_ref = refs[N_ENC_REFS]
    pooled = _encoder(*refs[:N_ENC_REFS])                    # (2B, H) float32
    nb = pooled.shape[0] // 2
    p1 = pooled[:nb]
    p2 = pooled[nb:]
    num = jnp.sum(p1 * p2, axis=-1, keepdims=True)
    n1 = jnp.sum(p1 * p1, axis=-1, keepdims=True)
    n2 = jnp.sum(p2 * p2, axis=-1, keepdims=True)
    cos = num * jax.lax.rsqrt(jnp.maximum(n1 * n2, 1e-16))
    # lane-dense store: broadcast the scalar across all 128 lanes, wrapper slices col 0.
    out_ref[...] = jnp.broadcast_to(cos, (nb, LANE)).astype(out_ref.dtype)


# ---------------------------- call-site helpers --------------------------------

_COMPILER_PARAMS = pltpu.CompilerParams(vmem_limit_bytes=32 * 1024 * 1024)


def _cost_estimate(n, head_flops=0):
    m = n * S
    flops = 2 * m * V * H                                            # embedding gather matmul
    flops += L * (2 * m * H * 3 * H                                  # fused QKV
                  + NH * 4 * n * S * S * HD                          # scores + context
                  + 2 * m * H * H                                    # output projection
                  + 2 * 2 * m * H * FF)                              # FFN
    flops += 2 * n * H * H + head_flops                              # pooler + task head
    transcendentals = L * (NH * n * S * S + m * FF) + n * H
    bytes_accessed = (2 * (V * H + L * (3 * H * H + H * H + 2 * H * FF) + H * H)
                      + 4 * (2 * m + m * H + n * LANE))
    return pl.CostEstimate(flops=int(flops), transcendentals=int(transcendentals),
                           bytes_accessed=int(bytes_accessed))


def _enc_inputs(params, input_ids, attention_mask):
    ids = input_ids.reshape(-1, 1).astype(jnp.int32)                 # (n*S, 1) for in-kernel gather
    mask = attention_mask.astype(jnp.float32)                        # (n, S)
    return (ids, mask,
            params['word_emb'], params['pos_emb'], params['type_emb'],
            params['emb_ln_g'], params['emb_ln_b'],
            params['wqkv'], params['bqkv'], params['wo'], params['bo'],
            params['ln1g'], params['ln1b'],
            params['w1'], params['b1'], params['w2'], params['b2'],
            params['ln2g'], params['ln2b'],
            params['pool_w'], params['pool_b'])


# ---------------------------- wrappers (JAX glue) ------------------------------

@jax.jit
def bert_forward(params, input_ids, attention_mask):
    """MultitaskBERT.forward -> BERT pooler_output, shape (N, H). Single kernel launch."""
    n = input_ids.shape[0]
    return pl.pallas_call(
        _forward_kernel,
        out_shape=jax.ShapeDtypeStruct((n, H), jnp.float32),
        compiler_params=_COMPILER_PARAMS,
        cost_estimate=_cost_estimate(n),
    )(*_enc_inputs(params, input_ids, attention_mask))


@jax.jit
def predict_sentiment(params, input_ids, attention_mask):
    n = input_ids.shape[0]
    out = pl.pallas_call(
        _sentiment_kernel,
        out_shape=jax.ShapeDtypeStruct((n, LANE), jnp.float32),
        compiler_params=_COMPILER_PARAMS,
        cost_estimate=_cost_estimate(n, head_flops=2 * n * H * LANE),
    )(*_enc_inputs(params, input_ids, attention_mask),
      params['sent_w'], params['sent_b'])
    return out[:, :N_SENTIMENT_CLASSES]


@jax.jit
def predict_paraphrase(params, ids1, m1, ids2, m2):
    # Batch the two sentences together -> one encoder run at 2B rows, one kernel launch.
    ids = jnp.concatenate([ids1, ids2], axis=0)
    mask = jnp.concatenate([m1, m2], axis=0)
    nb = ids1.shape[0]
    out = pl.pallas_call(
        _paraphrase_kernel,
        out_shape=jax.ShapeDtypeStruct((nb, LANE), jnp.float32),
        compiler_params=_COMPILER_PARAMS,
        cost_estimate=_cost_estimate(2 * nb, head_flops=4 * nb * H * LANE),
    )(*_enc_inputs(params, ids, mask),
      params['para_w1'], params['para_w2'], params['para_b'])
    return out[:, :1]


@jax.jit
def predict_similarity(params, ids1, m1, ids2, m2):
    ids = jnp.concatenate([ids1, ids2], axis=0)
    mask = jnp.concatenate([m1, m2], axis=0)
    nb = ids1.shape[0]
    out = pl.pallas_call(
        _similarity_kernel,
        out_shape=jax.ShapeDtypeStruct((nb, LANE), jnp.float32),   # lane-dense store
        compiler_params=_COMPILER_PARAMS,
        cost_estimate=_cost_estimate(2 * nb),
    )(*_enc_inputs(params, ids, mask))
    return out[:, 0]                                               # (B,), like torch


# ---------------------------- parameter init -----------------------------------

def init_params(key):
    keys = iter(jax.random.split(key, 96))

    def w(shape, scale=0.02):
        return scale * jax.random.normal(next(keys), shape, dtype=jnp.float32)

    attn_scale = HD ** -0.5   # folded into the Q projection weights AND bias

    wqkv, bqkv, bo = [], [], []
    wo_heads = []
    ln1g, ln1b, w1, b1, w2, b2, ln2g, ln2b = ([] for _ in range(8))
    for _ in range(L):
        wq = w((H, H)) * attn_scale
        wqkv.append(jnp.concatenate([wq, w((H, H)), w((H, H))], axis=1))       # (H, 3H)
        bq = jnp.zeros((1, H), jnp.float32) * attn_scale                        # scaled like wq
        bqkv.append(jnp.concatenate([bq, jnp.zeros((1, H)), jnp.zeros((1, H))], axis=1))
        wo_full = w((H, H))
        for h in range(NH):
            wo_heads.append(wo_full[h * HD:(h + 1) * HD, :])                    # (HD, H) per head
        bo.append(jnp.zeros((1, H), jnp.float32))
        ln1g.append(jnp.ones((1, H), jnp.float32))
        ln1b.append(jnp.zeros((1, H), jnp.float32))
        w1.append(w((H, FF)))
        b1.append(jnp.zeros((1, FF), jnp.float32))
        w2.append(w((FF, H)))
        b2.append(jnp.zeros((1, H), jnp.float32))
        ln2g.append(jnp.ones((1, H), jnp.float32))
        ln2b.append(jnp.zeros((1, H), jnp.float32))

    def stack_bf16(xs):
        return jnp.stack(xs).astype(jnp.bfloat16)

    def stack_f32(xs):
        return jnp.stack(xs)

    # Task-head weights, zero-padded to 128 output lanes for lane-dense matmuls/stores.
    sent_w = jnp.zeros((H, LANE), jnp.float32).at[:, :N_SENTIMENT_CLASSES].set(
        w((H, N_SENTIMENT_CLASSES)))
    para_w = w((2 * H, 1))
    para_w1 = jnp.zeros((H, LANE), jnp.float32).at[:, :1].set(para_w[:H])
    para_w2 = jnp.zeros((H, LANE), jnp.float32).at[:, :1].set(para_w[H:])

    return dict(
        word_emb=w((V, H)).astype(jnp.bfloat16),     # bf16: selected exactly by one-hot matmul
        pos_emb=w((S, H)),
        type_emb=w((1, H)),                          # token_type 0 only
        emb_ln_g=jnp.ones((1, H), jnp.float32),
        emb_ln_b=jnp.zeros((1, H), jnp.float32),
        # stacked per-layer weights: matmul weights bf16, biases/LN params f32
        wqkv=stack_bf16(wqkv), bqkv=stack_f32(bqkv),
        wo=stack_bf16(wo_heads),                     # (L*NH, HD, H) per-head output proj
        bo=stack_f32(bo),
        ln1g=stack_f32(ln1g), ln1b=stack_f32(ln1b),
        w1=stack_bf16(w1), b1=stack_f32(b1),
        w2=stack_bf16(w2), b2=stack_f32(b2),
        ln2g=stack_f32(ln2g), ln2b=stack_f32(ln2b),
        pool_w=w((H, H)).astype(jnp.bfloat16),
        pool_b=jnp.zeros((1, H), jnp.float32),
        sent_w=sent_w.astype(jnp.bfloat16),
        sent_b=jnp.zeros((1, LANE), jnp.float32),
        para_w1=para_w1.astype(jnp.bfloat16),
        para_w2=para_w2.astype(jnp.bfloat16),
        para_b=jnp.zeros((1, LANE), jnp.float32),
    )


# ---------------------------- main ----------------------------------------------

if __name__ == "__main__":
    key = jax.random.PRNGKey(0)
    pkey, k1, k2 = jax.random.split(key, 3)
    params = init_params(pkey)

    ids1 = jax.random.randint(k1, (B, S), 0, V)
    ids2 = jax.random.randint(k2, (B, S), 0, V)
    mask1 = jnp.ones((B, S), jnp.float32).at[1, 6:].set(0.0)   # pad tail of row 1
    mask2 = jnp.ones((B, S), jnp.float32).at[0, 5:].set(0.0)   # pad tail of row 0

    pooler = bert_forward(params, ids1, mask1)                  # forward()
    sent = predict_sentiment(params, ids1, mask1)
    para = predict_paraphrase(params, ids1, mask1, ids2, mask2)
    sim = predict_similarity(params, ids1, mask1, ids2, mask2)

    for t in (pooler, sent, para, sim):
        jax.block_until_ready(t)

    assert pooler.shape == (B, H)
    assert sent.shape == (B, N_SENTIMENT_CLASSES)
    assert para.shape == (B, 1)
    assert sim.shape == (B,)
    assert all(bool(jnp.all(jnp.isfinite(t))) for t in (pooler, sent, para, sim))
    assert bool(jnp.all(jnp.abs(sim) <= 1.0 + 1e-3))            # cosine range sanity

    print("KERNEL_OK")
</pallas_src>

<mosaic_0001>
module attributes {stable_mosaic.version = 11 : i64} {
  func.func @_forward_kernel(%arg0: memref<16x1xi32, #tpu.memory_space<vmem>>, %arg1: memref<2x8xf32, #tpu.memory_space<vmem>>, %arg2: memref<128x128xbf16, #tpu.memory_space<vmem>>, %arg3: memref<8x128xf32, #tpu.memory_space<vmem>>, %arg4: memref<1x128xf32, #tpu.memory_space<vmem>>, %arg5: memref<1x128xf32, #tpu.memory_space<vmem>>, %arg6: memref<1x128xf32, #tpu.memory_space<vmem>>, %arg7: memref<2x128x384xbf16, #tpu.memory_space<vmem>>, %arg8: memref<2x1x384xf32, #tpu.memory_space<vmem>>, %arg9: memref<4x64x128xbf16, #tpu.memory_space<vmem>>, %arg10: memref<2x1x128xf32, #tpu.memory_space<vmem>>, %arg11: memref<2x1x128xf32, #tpu.memory_space<vmem>>, %arg12: memref<2x1x128xf32, #tpu.memory_space<vmem>>, %arg13: memref<2x128x512xbf16, #tpu.memory_space<vmem>>, %arg14: memref<2x1x512xf32, #tpu.memory_space<vmem>>, %arg15: memref<2x512x128xbf16, #tpu.memory_space<vmem>>, %arg16: memref<2x1x128xf32, #tpu.memory_space<vmem>>, %arg17: memref<2x1x128xf32, #tpu.memory_space<vmem>>, %arg18: memref<2x1x128xf32, #tpu.memory_space<vmem>>, %arg19: memref<128x128xbf16, #tpu.memory_space<vmem>>, %arg20: memref<1x128xf32, #tpu.memory_space<vmem>>, %arg21: memref<2x128xf32, #tpu.memory_space<vmem>>) attributes {dimension_semantics = [], scalar_prefetch = 0 : i64, scratch_operands = 0 : i64, tpu.core_type = #tpu.core_type<tc>} {
    %c0 = arith.constant 0 : index
    %c0_0 = arith.constant 0 : index
    %0 = vector.load %arg1[%c0, %c0_0] : memref<2x8xf32, #tpu.memory_space<vmem>>, vector<2x8xf32>
    %c0_1 = arith.constant 0 : index
    %c0_2 = arith.constant 0 : index
    %1 = vector.load %arg0[%c0_1, %c0_2] : memref<16x1xi32, #tpu.memory_space<vmem>>, vector<16x1xi32>
    %2 = tpu.iota {dimensions = array<i32: 1>} : vector<16x128xi32>
    %3 = vector.broadcast %1 : vector<16x1xi32> to vector<16x128xi32>
    %4 = arith.cmpi eq, %3, %2 : vector<16x128xi32>
    %5 = arith.extui %4 : vector<16x128xi1> to vector<16x128xi32>
    %6 = arith.sitofp %5 : vector<16x128xi32> to vector<16x128xf32>
    %7 = arith.truncf %6 : vector<16x128xf32> to vector<16x128xbf16>
    %c0_3 = arith.constant 0 : index
    %c0_4 = arith.constant 0 : index
    %8 = vector.load %arg2[%c0_3, %c0_4] : memref<128x128xbf16, #tpu.memory_space<vmem>>, vector<128x128xbf16>
    %cst = arith.constant dense<0.000000e+00> : vector<16x128xf32>
    %9 = tpu.matmul %7, %8, %cst {dimension_numbers = #tpu.dot_dimension_numbers<[1], [0], [0], [1], [0, 0, 1, 1], [], []>} : vector<16x128xbf16>, vector<128x128xbf16>, vector<16x128xf32> -> vector<16x128xf32>
    %10 = vector.shape_cast %9 : vector<16x128xf32> to vector<2x8x128xf32>
    %c0_5 = arith.constant 0 : index
    %c0_6 = arith.constant 0 : index
    %11 = vector.load %arg3[%c0_5, %c0_6] : memref<8x128xf32, #tpu.memory_space<vmem>>, vector<8x128xf32>
    %12 = vector.shape_cast %11 : vector<8x128xf32> to vector<1x8x128xf32>
    %13 = vector.broadcast %12 : vector<1x8x128xf32> to vector<2x8x128xf32>
    %14 = arith.addf %10, %13 : vector<2x8x128xf32>
    %c0_7 = arith.constant 0 : index
    %c0_8 = arith.constant 0 : index
    %15 = vector.load %arg4[%c0_7, %c0_8] : memref<1x128xf32, #tpu.memory_space<vmem>>, vector<1x128xf32>
    %16 = vector.shape_cast %15 : vector<1x128xf32> to vector<1x1x128xf32>
    %17 = vector.broadcast %16 : vector<1x1x128xf32> to vector<2x8x128xf32>
    %18 = arith.addf %14, %17 : vector<2x8x128xf32>
    %cst_9 = arith.constant 1.000000e+00 : f32
    %19 = vector.broadcast %cst_9 : f32 to vector<2x8xf32>
    %20 = arith.subf %19, %0 : vector<2x8xf32>
    %cst_10 = arith.constant -1.000000e+04 : f32
    %21 = vector.broadcast %cst_10 : f32 to vector<2x8xf32>
    %22 = arith.mulf %20, %21 : vector<2x8xf32>
    %23 = vector.shape_cast %22 : vector<2x8xf32> to vector<2x1x8xf32>
    %24 = vector.shape_cast %23 : vector<2x1x8xf32> to vector<2x1x8xf32>
    %25 = vector.broadcast %24 : vector<2x1x8xf32> to vector<2x8x8xf32>
    %c0_11 = arith.constant 0 : index
    %c0_12 = arith.constant 0 : index
    %26 = vector.load %arg5[%c0_11, %c0_12] : memref<1x128xf32, #tpu.memory_space<vmem>>, vector<1x128xf32>
    %c0_13 = arith.constant 0 : index
    %c0_14 = arith.constant 0 : index
    %27 = vector.load %arg6[%c0_13, %c0_14] : memref<1x128xf32, #tpu.memory_space<vmem>>, vector<1x128xf32>
    %cst_15 = arith.constant dense<0.000000e+00> : vector<2x8xf32>
    %28 = vector.multi_reduction <add>, %18, %cst_15 [2] : vector<2x8x128xf32> to vector<2x8xf32>
    %29 = vector.shape_cast %28 : vector<2x8xf32> to vector<2x8x1xf32>
    %cst_16 = arith.constant 1.280000e+02 : f32
    %30 = vector.broadcast %cst_16 : f32 to vector<2x8x1xf32>
    %31 = arith.divf %29, %30 : vector<2x8x1xf32>
    %32 = vector.broadcast %31 : vector<2x8x1xf32> to vector<2x8x128xf32>
    %33 = arith.subf %18, %32 : vector<2x8x128xf32>
    %34 = arith.mulf %33, %33 : vector<2x8x128xf32>
    %cst_17 = arith.constant dense<0.000000e+00> : vector<2x8xf32>
    %35 = vector.multi_reduction <add>, %34, %cst_17 [2] : vector<2x8x128xf32> to vector<2x8xf32>
    %36 = vector.shape_cast %35 : vector<2x8xf32> to vector<2x8x1xf32>
    %cst_18 = arith.constant 1.280000e+02 : f32
    %37 = vector.broadcast %cst_18 : f32 to vector<2x8x1xf32>
    %38 = arith.divf %36, %37 : vector<2x8x1xf32>
    %39 = vector.broadcast %31 : vector<2x8x1xf32> to vector<2x8x128xf32>
    %40 = arith.subf %18, %39 : vector<2x8x128xf32>
    %cst_19 = arith.constant 9.99999996E-13 : f32
    %41 = vector.broadcast %cst_19 : f32 to vector<2x8x1xf32>
    %42 = arith.addf %38, %41 : vector<2x8x1xf32>
    %43 = math.rsqrt %42 : vector<2x8x1xf32>
    %44 = vector.broadcast %43 : vector<2x8x1xf32> to vector<2x8x128xf32>
    %45 = arith.mulf %40, %44 : vector<2x8x128xf32>
    %46 = vector.shape_cast %26 : vector<1x128xf32> to vector<1x1x128xf32>
    %47 = vector.broadcast %46 : vector<1x1x128xf32> to vector<2x8x128xf32>
    %48 = arith.mulf %45, %47 : vector<2x8x128xf32>
    %49 = vector.shape_cast %27 : vector<1x128xf32> to vector<1x1x128xf32>
    %50 = vector.broadcast %49 : vector<1x1x128xf32> to vector<2x8x128xf32>
    %51 = arith.addf %48, %50 : vector<2x8x128xf32>
    %52 = vector.shape_cast %51 : vector<2x8x128xf32> to vector<16x128xf32>
    %53 = arith.truncf %52 : vector<16x128xf32> to vector<16x128xbf16>
    %c0_20 = arith.constant 0 : index
    %c0_21 = arith.constant 0 : index
    %c0_22 = arith.constant 0 : index
    %54 = vector.load %arg7[%c0_20, %c0_21, %c0_22] : memref<2x128x384xbf16, #tpu.memory_space<vmem>>, vector<1x128x384xbf16>
    %55 = vector.shape_cast %54 : vector<1x128x384xbf16> to vector<128x384xbf16>
    %cst_23 = arith.constant dense<0.000000e+00> : vector<16x384xf32>
    %56 = tpu.matmul %53, %55, %cst_23 {dimension_numbers = #tpu.dot_dimension_numbers<[1], [0], [0], [1], [0, 0, 1, 1], [], []>} : vector<16x128xbf16>, vector<128x384xbf16>, vector<16x384xf32> -> vector<16x384xf32>
    %c0_24 = arith.constant 0 : index
    %c0_25 = arith.constant 0 : index
    %c0_26 = arith.constant 0 : index
    %57 = vector.load %arg8[%c0_24, %c0_25, %c0_26] : memref<2x1x384xf32, #tpu.memory_space<vmem>>, vector<1x1x384xf32>
    %58 = vector.shape_cast %57 : vector<1x1x384xf32> to vector<1x384xf32>
    %59 = vector.broadcast %58 : vector<1x384xf32> to vector<16x384xf32>
    %60 = arith.addf %56, %59 : vector<16x384xf32>
    %cst_27 = arith.constant 0.000000e+00 : f32
    %61 = vector.broadcast %cst_27 : f32 to vector<16x128xf32>
    %62 = vector.extract_strided_slice %60 {offsets = [0, 0], sizes = [16, 64], strides = [1, 1]} : vector<16x384xf32> to vector<16x64xf32>
    %63 = vector.shape_cast %62 : vector<16x64xf32> to vector<2x8x64xf32>
    %64 = arith.truncf %63 : vector<2x8x64xf32> to vector<2x8x64xbf16>
    %65 = vector.extract_strided_slice %60 {offsets = [0, 128], sizes = [16, 64], strides = [1, 1]} : vector<16x384xf32> to vector<16x64xf32>
    %66 = vector.shape_cast %65 : vector<16x64xf32> to vector<2x8x64xf32>
    %67 = arith.truncf %66 : vector<2x8x64xf32> to vector<2x8x64xbf16>
    %68 = vector.extract_strided_slice %60 {offsets = [0, 256], sizes = [16, 64], strides = [1, 1]} : vector<16x384xf32> to vector<16x64xf32>
    %69 = vector.shape_cast %68 : vector<16x64xf32> to vector<2x8x64xf32>
    %70 = arith.truncf %69 : vector<2x8x64xf32> to vector<2x8x64xbf16>
    "tpu.trace_start"() <{level = 10 : i32, message = "bqd,bkd->bqk"}> : () -> ()
    %cst_28 = arith.constant dense<0.000000e+00> : vector<2x8x8xf32>
    %71 = tpu.matmul %64, %67, %cst_28 {dimension_numbers = #tpu.dot_dimension_numbers<[2], [2], [1], [1], [0, 0, 0, 1, 1, 1], [0], [0]>} : vector<2x8x64xbf16>, vector<2x8x64xbf16>, vector<2x8x8xf32> -> vector<2x8x8xf32>
    "tpu.trace_stop"() : () -> ()
    %72 = arith.addf %71, %25 : vector<2x8x8xf32>
    %cst_29 = arith.constant dense<0xFF800000> : vector<2x8xf32>
    %73 = vector.multi_reduction <maximumf>, %72, %cst_29 [2] : vector<2x8x8xf32> to vector<2x8xf32>
    %74 = vector.shape_cast %73 : vector<2x8xf32> to vector<2x8x1xf32>
    %75 = vector.broadcast %74 : vector<2x8x1xf32> to vector<2x8x8xf32>
    %76 = arith.subf %72, %75 : vector<2x8x8xf32>
    %77 = math.exp %76 : vector<2x8x8xf32>
    %cst_30 = arith.constant dense<0.000000e+00> : vector<2x8xf32>
    %78 = vector.multi_reduction <add>, %77, %cst_30 [2] : vector<2x8x8xf32> to vector<2x8xf32>
    %79 = vector.shape_cast %78 : vector<2x8xf32> to vector<2x8x1xf32>
    %80 = tpu.reciprocal %79 {approx = true} : vector<2x8x1xf32> -> vector<2x8x1xf32>
    %81 = vector.broadcast %80 : vector<2x8x1xf32> to vector<2x8x8xf32>
    %82 = arith.mulf %77, %81 : vector<2x8x8xf32>
    %83 = arith.truncf %82 : vector<2x8x8xf32> to vector<2x8x8xbf16>
    "tpu.trace_start"() <{level = 10 : i32, message = "bqk,bkd->bqd"}> : () -> ()
    %cst_31 = arith.constant dense<0.000000e+00> : vector<2x8x64xf32>
    %84 = tpu.matmul %83, %70, %cst_31 {dimension_numbers = #tpu.dot_dimension_numbers<[2], [1], [1], [2], [0, 0, 0, 1, 1, 2], [0], [0]>} : vector<2x8x8xbf16>, vector<2x8x64xbf16>, vector<2x8x64xf32> -> vector<2x8x64xf32>
    "tpu.trace_stop"() : () -> ()
    %85 = vector.shape_cast %84 : vector<2x8x64xf32> to vector<16x64xf32>
    %86 = arith.truncf %85 : vector<16x64xf32> to vector<16x64xbf16>
    %c0_32 = arith.constant 0 : index
    %c0_33 = arith.constant 0 : index
    %c0_34 = arith.constant 0 : index
    %87 = vector.load %arg9[%c0_32, %c0_33, %c0_34] : memref<4x64x128xbf16, #tpu.memory_space<vmem>>, vector<1x64x128xbf16>
    %88 = vector.shape_cast %87 : vector<1x64x128xbf16> to vector<64x128xbf16>
    %cst_35 = arith.constant dense<0.000000e+00> : vector<16x128xf32>
    %89 = tpu.matmul %86, %88, %cst_35 {dimension_numbers = #tpu.dot_dimension_numbers<[1], [0], [0], [1], [0, 0, 1, 1], [], []>} : vector<16x64xbf16>, vector<64x128xbf16>, vector<16x128xf32> -> vector<16x128xf32>
    %90 = arith.addf %61, %89 : vector<16x128xf32>
    %91 = vector.extract_strided_slice %60 {offsets = [0, 64], sizes = [16, 64], strides = [1, 1]} : vector<16x384xf32> to vector<16x64xf32>
    %92 = vector.shape_cast %91 : vector<16x64xf32> to vector<2x8x64xf32>
    %93 = arith.truncf %92 : vector<2x8x64xf32> to vector<2x8x64xbf16>
    %94 = vector.extract_strided_slice %60 {offsets = [0, 192], sizes = [16, 64], strides = [1, 1]} : vector<16x384xf32> to vector<16x64xf32>
    %95 = vector.shape_cast %94 : vector<16x64xf32> to vector<2x8x64xf32>
    %96 = arith.truncf %95 : vector<2x8x64xf32> to vector<2x8x64xbf16>
    %97 = vector.extract_strided_slice %60 {offsets = [0, 320], sizes = [16, 64], strides = [1, 1]} : vector<16x384xf32> to vector<16x64xf32>
    %98 = vector.shape_cast %97 : vector<16x64xf32> to vector<2x8x64xf32>
    %99 = arith.truncf %98 : vector<2x8x64xf32> to vector<2x8x64xbf16>
    "tpu.trace_start"() <{level = 10 : i32, message = "bqd,bkd->bqk"}> : () -> ()
    %cst_36 = arith.constant dense<0.000000e+00> : vector<2x8x8xf32>
    %100 = tpu.matmul %93, %96, %cst_36 {dimension_numbers = #tpu.dot_dimension_numbers<[2], [2], [1], [1], [0, 0, 0, 1, 1, 1], [0], [0]>} : vector<2x8x64xbf16>, vector<2x8x64xbf16>, vector<2x8x8xf32> -> vector<2x8x8xf32>
    "tpu.trace_stop"() : () -> ()
    %101 = arith.addf %100, %25 : vector<2x8x8xf32>
    %cst_37 = arith.constant dense<0xFF800000> : vector<2x8xf32>
    %102 = vector.multi_reduction <maximumf>, %101, %cst_37 [2] : vector<2x8x8xf32> to vector<2x8xf32>
    %103 = vector.shape_cast %102 : vector<2x8xf32> to vector<2x8x1xf32>
    %104 = vector.broadcast %103 : vector<2x8x1xf32> to vector<2x8x8xf32>
    %105 = arith.subf %101, %104 : vector<2x8x8xf32>
    %106 = math.exp %105 : vector<2x8x8xf32>
    %cst_38 = arith.constant dense<0.000000e+00> : vector<2x8xf32>
    %107 = vector.multi_reduction <add>, %106, %cst_38 [2] : vector<2x8x8xf32> to vector<2x8xf32>
    %108 = vector.shape_cast %107 : vector<2x8xf32> to vector<2x8x1xf32>
    %109 = tpu.reciprocal %108 {approx = true} : vector<2x8x1xf32> -> vector<2x8x1xf32>
    %110 = vector.broadcast %109 : vector<2x8x1xf32> to vector<2x8x8xf32>
    %111 = arith.mulf %106, %110 : vector<2x8x8xf32>
    %112 = arith.truncf %111 : vector<2x8x8xf32> to vector<2x8x8xbf16>
    "tpu.trace_start"() <{level = 10 : i32, message = "bqk,bkd->bqd"}> : () -> ()
    %cst_39 = arith.constant dense<0.000000e+00> : vector<2x8x64xf32>
    %113 = tpu.matmul %112, %99, %cst_39 {dimension_numbers = #tpu.dot_dimension_numbers<[2], [1], [1], [2], [0, 0, 0, 1, 1, 2], [0], [0]>} : vector<2x8x8xbf16>, vector<2x8x64xbf16>, vector<2x8x64xf32> -> vector<2x8x64xf32>
    "tpu.trace_stop"() : () -> ()
    %114 = vector.shape_cast %113 : vector<2x8x64xf32> to vector<16x64xf32>
    %115 = arith.truncf %114 : vector<16x64xf32> to vector<16x64xbf16>
    %c1 = arith.constant 1 : index
    %c0_40 = arith.constant 0 : index
    %c0_41 = arith.constant 0 : index
    %116 = vector.load %arg9[%c1, %c0_40, %c0_41] : memref<4x64x128xbf16, #tpu.memory_space<vmem>>, vector<1x64x128xbf16>
    %117 = vector.shape_cast %116 : vector<1x64x128xbf16> to vector<64x128xbf16>
    %cst_42 = arith.constant dense<0.000000e+00> : vector<16x128xf32>
    %118 = tpu.matmul %115, %117, %cst_42 {dimension_numbers = #tpu.dot_dimension_numbers<[1], [0], [0], [1], [0, 0, 1, 1], [], []>} : vector<16x64xbf16>, vector<64x128xbf16>, vector<16x128xf32> -> vector<16x128xf32>
    %119 = arith.addf %90, %118 : vector<16x128xf32>
    %c0_43 = arith.constant 0 : index
    %c0_44 = arith.constant 0 : index
    %c0_45 = arith.constant 0 : index
    %120 = vector.load %arg10[%c0_43, %c0_44, %c0_45] : memref<2x1x128xf32, #tpu.memory_space<vmem>>, vector<1x1x128xf32>
    %121 = vector.shape_cast %120 : vector<1x1x128xf32> to vector<1x128xf32>
    %122 = vector.broadcast %121 : vector<1x128xf32> to vector<16x128xf32>
    %123 = arith.addf %119, %122 : vector<16x128xf32>
    %124 = arith.addf %52, %123 : vector<16x128xf32>
    %c0_46 = arith.constant 0 : index
    %c0_47 = arith.constant 0 : index
    %c0_48 = arith.constant 0 : index
    %125 = vector.load %arg11[%c0_46, %c0_47, %c0_48] : memref<2x1x128xf32, #tpu.memory_space<vmem>>, vector<1x1x128xf32>
    %126 = vector.shape_cast %125 : vector<1x1x128xf32> to vector<1x128xf32>
    %c0_49 = arith.constant 0 : index
    %c0_50 = arith.constant 0 : index
    %c0_51 = arith.constant 0 : index
    %127 = vector.load %arg12[%c0_49, %c0_50, %c0_51] : memref<2x1x128xf32, #tpu.memory_space<vmem>>, vector<1x1x128xf32>
    %128 = vector.shape_cast %127 : vector<1x1x128xf32> to vector<1x128xf32>
    %cst_52 = arith.constant dense<0.000000e+00> : vector<16xf32>
    %129 = vector.multi_reduction <add>, %124, %cst_52 [1] : vector<16x128xf32> to vector<16xf32>
    %130 = vector.shape_cast %129 : vector<16xf32> to vector<16x1xf32>
    %cst_53 = arith.constant 1.280000e+02 : f32
    %131 = vector.broadcast %cst_53 : f32 to vector<16x1xf32>
    %132 = arith.divf %130, %131 : vector<16x1xf32>
    %133 = vector.broadcast %132 : vector<16x1xf32> to vector<16x128xf32>
    %134 = arith.subf %124, %133 : vector<16x128xf32>
    %135 = arith.mulf %134, %134 : vector<16x128xf32>
    %cst_54 = arith.constant dense<0.000000e+00> : vector<16xf32>
    %136 = vector.multi_reduction <add>, %135, %cst_54 [1] : vector<16x128xf32> to vector<16xf32>
    %137 = vector.shape_cast %136 : vector<16xf32> to vector<16x1xf32>
    %cst_55 = arith.constant 1.280000e+02 : f32
    %138 = vector.broadcast %cst_55 : f32 to vector<16x1xf32>
    %139 = arith.divf %137, %138 : vector<16x1xf32>
    %140 = vector.broadcast %132 : vector<16x1xf32> to vector<16x128xf32>
    %141 = arith.subf %124, %140 : vector<16x128xf32>
    %cst_56 = arith.constant 9.99999996E-13 : f32
    %142 = vector.broadcast %cst_56 : f32 to vector<16x1xf32>
    %143 = arith.addf %139, %142 : vector<16x1xf32>
    %144 = math.rsqrt %143 : vector<16x1xf32>
    %145 = vector.broadcast %144 : vector<16x1xf32> to vector<16x128xf32>
    %146 = arith.mulf %141, %145 : vector<16x128xf32>
    %147 = vector.broadcast %126 : vector<1x128xf32> to vector<16x128xf32>
    %148 = arith.mulf %146, %147 : vector<16x128xf32>
    %149 = vector.broadcast %128 : vector<1x128xf32> to vector<16x128xf32>
    %150 = arith.addf %148, %149 : vector<16x128xf32>
    %151 = arith.truncf %150 : vector<16x128xf32> to vector<16x128xbf16>
    %c0_57 = arith.constant 0 : index
    %c0_58 = arith.constant 0 : index
    %c0_59 = arith.constant 0 : index
    %152 = vector.load %arg13[%c0_57, %c0_58, %c0_59] : memref<2x128x512xbf16, #tpu.memory_space<vmem>>, vector<1x128x512xbf16>
    %153 = vector.shape_cast %152 : vector<1x128x512xbf16> to vector<128x512xbf16>
    %cst_60 = arith.constant dense<0.000000e+00> : vector<16x512xf32>
    %154 = tpu.matmul %151, %153, %cst_60 {dimension_numbers = #tpu.dot_dimension_numbers<[1], [0], [0], [1], [0, 0, 1, 1], [], []>} : vector<16x128xbf16>, vector<128x512xbf16>, vector<16x512xf32> -> vector<16x512xf32>
    %c0_61 = arith.constant 0 : index
    %c0_62 = arith.constant 0 : index
    %c0_63 = arith.constant 0 : index
    %155 = vector.load %arg14[%c0_61, %c0_62, %c0_63] : memref<2x1x512xf32, #tpu.memory_space<vmem>>, vector<1x1x512xf32>
    %156 = vector.shape_cast %155 : vector<1x1x512xf32> to vector<1x512xf32>
    %157 = vector.broadcast %156 : vector<1x512xf32> to vector<16x512xf32>
    %158 = arith.addf %154, %157 : vector<16x512xf32>
    %159 = arith.mulf %158, %158 : vector<16x512xf32>
    %160 = arith.mulf %158, %159 : vector<16x512xf32>
    %cst_64 = arith.constant 4.471500e-02 : f32
    %161 = vector.broadcast %cst_64 : f32 to vector<16x512xf32>
    %162 = arith.mulf %161, %160 : vector<16x512xf32>
    %163 = arith.addf %158, %162 : vector<16x512xf32>
    %cst_65 = arith.constant 0.797884583 : f32
    %164 = vector.broadcast %cst_65 : f32 to vector<16x512xf32>
    %165 = arith.mulf %164, %163 : vector<16x512xf32>
    %166 = math.tanh %165 : vector<16x512xf32>
    %cst_66 = arith.constant 1.000000e+00 : f32
    %167 = vector.broadcast %cst_66 : f32 to vector<16x512xf32>
    %168 = arith.addf %167, %166 : vector<16x512xf32>
    %cst_67 = arith.constant 5.000000e-01 : f32
    %169 = vector.broadcast %cst_67 : f32 to vector<16x512xf32>
    %170 = arith.mulf %169, %168 : vector<16x512xf32>
    %171 = arith.mulf %158, %170 : vector<16x512xf32>
    %172 = arith.truncf %171 : vector<16x512xf32> to vector<16x512xbf16>
    %c0_68 = arith.constant 0 : index
    %c0_69 = arith.constant 0 : index
    %c0_70 = arith.constant 0 : index
    %173 = vector.load %arg15[%c0_68, %c0_69, %c0_70] : memref<2x512x128xbf16, #tpu.memory_space<vmem>>, vector<1x512x128xbf16>
    %174 = vector.shape_cast %173 : vector<1x512x128xbf16> to vector<512x128xbf16>
    %cst_71 = arith.constant dense<0.000000e+00> : vector<16x128xf32>
    %175 = tpu.matmul %172, %174, %cst_71 {dimension_numbers = #tpu.dot_dimension_numbers<[1], [0], [0], [1], [0, 0, 1, 1], [], []>} : vector<16x512xbf16>, vector<512x128xbf16>, vector<16x128xf32> -> vector<16x128xf32>
    %c0_72 = arith.constant 0 : index
    %c0_73 = arith.constant 0 : index
    %c0_74 = arith.constant 0 : index
    %176 = vector.load %arg16[%c0_72, %c0_73, %c0_74] : memref<2x1x128xf32, #tpu.memory_space<vmem>>, vector<1x1x128xf32>
    %177 = vector.shape_cast %176 : vector<1x1x128xf32> to vector<1x128xf32>
    %178 = vector.broadcast %177 : vector<1x128xf32> to vector<16x128xf32>
    %179 = arith.addf %175, %178 : vector<16x128xf32>
    %180 = arith.addf %150, %179 : vector<16x128xf32>
    %c0_75 = arith.constant 0 : index
    %c0_76 = arith.constant 0 : index
    %c0_77 = arith.constant 0 : index
    %181 = vector.load %arg17[%c0_75, %c0_76, %c0_77] : memref<2x1x128xf32, #tpu.memory_space<vmem>>, vector<1x1x128xf32>
    %182 = vector.shape_cast %181 : vector<1x1x128xf32> to vector<1x128xf32>
    %c0_78 = arith.constant 0 : index
    %c0_79 = arith.constant 0 : index
    %c0_80 = arith.constant 0 : index
    %183 = vector.load %arg18[%c0_78, %c0_79, %c0_80] : memref<2x1x128xf32, #tpu.memory_space<vmem>>, vector<1x1x128xf32>
    %184 = vector.shape_cast %183 : vector<1x1x128xf32> to vector<1x128xf32>
    %cst_81 = arith.constant dense<0.000000e+00> : vector<16xf32>
    %185 = vector.multi_reduction <add>, %180, %cst_81 [1] : vector<16x128xf32> to vector<16xf32>
    %186 = vector.shape_cast %185 : vector<16xf32> to vector<16x1xf32>
    %cst_82 = arith.constant 1.280000e+02 : f32
    %187 = vector.broadcast %cst_82 : f32 to vector<16x1xf32>
    %188 = arith.divf %186, %187 : vector<16x1xf32>
    %189 = vector.broadcast %188 : vector<16x1xf32> to vector<16x128xf32>
    %190 = arith.subf %180, %189 : vector<16x128xf32>
    %191 = arith.mulf %190, %190 : vector<16x128xf32>
    %cst_83 = arith.constant dense<0.000000e+00> : vector<16xf32>
    %192 = vector.multi_reduction <add>, %191, %cst_83 [1] : vector<16x128xf32> to vector<16xf32>
    %193 = vector.shape_cast %192 : vector<16xf32> to vector<16x1xf32>
    %cst_84 = arith.constant 1.280000e+02 : f32
    %194 = vector.broadcast %cst_84 : f32 to vector<16x1xf32>
    %195 = arith.divf %193, %194 : vector<16x1xf32>
    %196 = vector.broadcast %188 : vector<16x1xf32> to vector<16x128xf32>
    %197 = arith.subf %180, %196 : vector<16x128xf32>
    %cst_85 = arith.constant 9.99999996E-13 : f32
    %198 = vector.broadcast %cst_85 : f32 to vector<16x1xf32>
    %199 = arith.addf %195, %198 : vector<16x1xf32>
    %200 = math.rsqrt %199 : vector<16x1xf32>
    %201 = vector.broadcast %200 : vector<16x1xf32> to vector<16x128xf32>
    %202 = arith.mulf %197, %201 : vector<16x128xf32>
    %203 = vector.broadcast %182 : vector<1x128xf32> to vector<16x128xf32>
    %204 = arith.mulf %202, %203 : vector<16x128xf32>
    %205 = vector.broadcast %184 : vector<1x128xf32> to vector<16x128xf32>
    %206 = arith.addf %204, %205 : vector<16x128xf32>
    %207 = arith.truncf %206 : vector<16x128xf32> to vector<16x128xbf16>
    %c1_86 = arith.constant 1 : index
    %c0_87 = arith.constant 0 : index
    %c0_88 = arith.constant 0 : index
    %208 = vector.load %arg7[%c1_86, %c0_87, %c0_88] : memref<2x128x384xbf16, #tpu.memory_space<vmem>>, vector<1x128x384xbf16>
    %209 = vector.shape_cast %208 : vector<1x128x384xbf16> to vector<128x384xbf16>
    %cst_89 = arith.constant dense<0.000000e+00> : vector<16x384xf32>
    %210 = tpu.matmul %207, %209, %cst_89 {dimension_numbers = #tpu.dot_dimension_numbers<[1], [0], [0], [1], [0, 0, 1, 1], [], []>} : vector<16x128xbf16>, vector<128x384xbf16>, vector<16x384xf32> -> vector<16x384xf32>
    %c1_90 = arith.constant 1 : index
    %c0_91 = arith.constant 0 : index
    %c0_92 = arith.constant 0 : index
    %211 = vector.load %arg8[%c1_90, %c0_91, %c0_92] : memref<2x1x384xf32, #tpu.memory_space<vmem>>, vector<1x1x384xf32>
    %212 = vector.shape_cast %211 : vector<1x1x384xf32> to vector<1x384xf32>
    %213 = vector.broadcast %212 : vector<1x384xf32> to vector<16x384xf32>
    %214 = arith.addf %210, %213 : vector<16x384xf32>
    %cst_93 = arith.constant 0.000000e+00 : f32
    %215 = vector.broadcast %cst_93 : f32 to vector<16x128xf32>
    %216 = vector.extract_strided_slice %214 {offsets = [0, 0], sizes = [16, 64], strides = [1, 1]} : vector<16x384xf32> to vector<16x64xf32>
    %217 = vector.shape_cast %216 : vector<16x64xf32> to vector<2x8x64xf32>
    %218 = arith.truncf %217 : vector<2x8x64xf32> to vector<2x8x64xbf16>
    %219 = vector.extract_strided_slice %214 {offsets = [0, 128], sizes = [16, 64], strides = [1, 1]} : vector<16x384xf32> to vector<16x64xf32>
    %220 = vector.shape_cast %219 : vector<16x64xf32> to vector<2x8x64xf32>
    %221 = arith.truncf %220 : vector<2x8x64xf32> to vector<2x8x64xbf16>
    %222 = vector.extract_strided_slice %214 {offsets = [0, 256], sizes = [16, 64], strides = [1, 1]} : vector<16x384xf32> to vector<16x64xf32>
    %223 = vector.shape_cast %222 : vector<16x64xf32> to vector<2x8x64xf32>
    %224 = arith.truncf %223 : vector<2x8x64xf32> to vector<2x8x64xbf16>
    "tpu.trace_start"() <{level = 10 : i32, message = "bqd,bkd->bqk"}> : () -> ()
    %cst_94 = arith.constant dense<0.000000e+00> : vector<2x8x8xf32>
    %225 = tpu.matmul %218, %221, %cst_94 {dimension_numbers = #tpu.dot_dimension_numbers<[2], [2], [1], [1], [0, 0, 0, 1, 1, 1], [0], [0]>} : vector<2x8x64xbf16>, vector<2x8x64xbf16>, vector<2x8x8xf32> -> vector<2x8x8xf32>
    "tpu.trace_stop"() : () -> ()
    %226 = arith.addf %225, %25 : vector<2x8x8xf32>
    %cst_95 = arith.constant dense<0xFF800000> : vector<2x8xf32>
    %227 = vector.multi_reduction <maximumf>, %226, %cst_95 [2] : vector<2x8x8xf32> to vector<2x8xf32>
    %228 = vector.shape_cast %227 : vector<2x8xf32> to vector<2x8x1xf32>
    %229 = vector.broadcast %228 : vector<2x8x1xf32> to vector<2x8x8xf32>
    %230 = arith.subf %226, %229 : vector<2x8x8xf32>
    %231 = math.exp %230 : vector<2x8x8xf32>
    %cst_96 = arith.constant dense<0.000000e+00> : vector<2x8xf32>
    %232 = vector.multi_reduction <add>, %231, %cst_96 [2] : vector<2x8x8xf32> to vector<2x8xf32>
    %233 = vector.shape_cast %232 : vector<2x8xf32> to vector<2x8x1xf32>
    %234 = tpu.reciprocal %233 {approx = true} : vector<2x8x1xf32> -> vector<2x8x1xf32>
    %235 = vector.broadcast %234 : vector<2x8x1xf32> to vector<2x8x8xf32>
    %236 = arith.mulf %231, %235 : vector<2x8x8xf32>
    %237 = arith.truncf %236 : vector<2x8x8xf32> to vector<2x8x8xbf16>
    "tpu.trace_start"() <{level = 10 : i32, message = "bqk,bkd->bqd"}> : () -> ()
    %cst_97 = arith.constant dense<0.000000e+00> : vector<2x8x64xf32>
    %238 = tpu.matmul %237, %224, %cst_97 {dimension_numbers = #tpu.dot_dimension_numbers<[2], [1], [1], [2], [0, 0, 0, 1, 1, 2], [0], [0]>} : vector<2x8x8xbf16>, vector<2x8x64xbf16>, vector<2x8x64xf32> -> vector<2x8x64xf32>
    "tpu.trace_stop"() : () -> ()
    %239 = vector.shape_cast %238 : vector<2x8x64xf32> to vector<16x64xf32>
    %240 = arith.truncf %239 : vector<16x64xf32> to vector<16x64xbf16>
    %c2 = arith.constant 2 : index
    %c0_98 = arith.constant 0 : index
    %c0_99 = arith.constant 0 : index
    %241 = vector.load %arg9[%c2, %c0_98, %c0_99] : memref<4x64x128xbf16, #tpu.memory_space<vmem>>, vector<1x64x128xbf16>
    %242 = vector.shape_cast %241 : vector<1x64x128xbf16> to vector<64x128xbf16>
    %cst_100 = arith.constant dense<0.000000e+00> : vector<16x128xf32>
    %243 = tpu.matmul %240, %242, %cst_100 {dimension_numbers = #tpu.dot_dimension_numbers<[1], [0], [0], [1], [0, 0, 1, 1], [], []>} : vector<16x64xbf16>, vector<64x128xbf16>, vector<16x128xf32> -> vector<16x128xf32>
    %244 = arith.addf %215, %243 : vector<16x128xf32>
    %245 = vector.extract_strided_slice %214 {offsets = [0, 64], sizes = [16, 64], strides = [1, 1]} : vector<16x384xf32> to vector<16x64xf32>
    %246 = vector.shape_cast %245 : vector<16x64xf32> to vector<2x8x64xf32>
    %247 = arith.truncf %246 : vector<2x8x64xf32> to vector<2x8x64xbf16>
    %248 = vector.extract_strided_slice %214 {offsets = [0, 192], sizes = [16, 64], strides = [1, 1]} : vector<16x384xf32> to vector<16x64xf32>
    %249 = vector.shape_cast %248 : vector<16x64xf32> to vector<2x8x64xf32>
    %250 = arith.truncf %249 : vector<2x8x64xf32> to vector<2x8x64xbf16>
    %251 = vector.extract_strided_slice %214 {offsets = [0, 320], sizes = [16, 64], strides = [1, 1]} : vector<16x384xf32> to vector<16x64xf32>
    %252 = vector.shape_cast %251 : vector<16x64xf32> to vector<2x8x64xf32>
    %253 = arith.truncf %252 : vector<2x8x64xf32> to vector<2x8x64xbf16>
    "tpu.trace_start"() <{level = 10 : i32, message = "bqd,bkd->bqk"}> : () -> ()
    %cst_101 = arith.constant dense<0.000000e+00> : vector<2x8x8xf32>
    %254 = tpu.matmul %247, %250, %cst_101 {dimension_numbers = #tpu.dot_dimension_numbers<[2], [2], [1], [1], [0, 0, 0, 1, 1, 1], [0], [0]>} : vector<2x8x64xbf16>, vector<2x8x64xbf16>, vector<2x8x8xf32> -> vector<2x8x8xf32>
    "tpu.trace_stop"() : () -> ()
    %255 = arith.addf %254, %25 : vector<2x8x8xf32>
    %cst_102 = arith.constant dense<0xFF800000> : vector<2x8xf32>
    %256 = vector.multi_reduction <maximumf>, %255, %cst_102 [2] : vector<2x8x8xf32> to vector<2x8xf32>
    %257 = vector.shape_cast %256 : vector<2x8xf32> to vector<2x8x1xf32>
    %258 = vector.broadcast %257 : vector<2x8x1xf32> to vector<2x8x8xf32>
    %259 = arith.subf %255, %258 : vector<2x8x8xf32>
    %260 = math.exp %259 : vector<2x8x8xf32>
    %cst_103 = arith.constant dense<0.000000e+00> : vector<2x8xf32>
    %261 = vector.multi_reduction <add>, %260, %cst_103 [2] : vector<2x8x8xf32> to vector<2x8xf32>
    %262 = vector.shape_cast %261 : vector<2x8xf32> to vector<2x8x1xf32>
    %263 = tpu.reciprocal %262 {approx = true} : vector<2x8x1xf32> -> vector<2x8x1xf32>
    %264 = vector.broadcast %263 : vector<2x8x1xf32> to vector<2x8x8xf32>
    %265 = arith.mulf %260, %264 : vector<2x8x8xf32>
    %266 = arith.truncf %265 : vector<2x8x8xf32> to vector<2x8x8xbf16>
    "tpu.trace_start"() <{level = 10 : i32, message = "bqk,bkd->bqd"}> : () -> ()
    %cst_104 = arith.constant dense<0.000000e+00> : vector<2x8x64xf32>
    %267 = tpu.matmul %266, %253, %cst_104 {dimension_numbers = #tpu.dot_dimension_numbers<[2], [1], [1], [2], [0, 0, 0, 1, 1, 2], [0], [0]>} : vector<2x8x8xbf16>, vector<2x8x64xbf16>, vector<2x8x64xf32> -> vector<2x8x64xf32>
    "tpu.trace_stop"() : () -> ()
    %268 = vector.shape_cast %267 : vector<2x8x64xf32> to vector<16x64xf32>
    %269 = arith.truncf %268 : vector<16x64xf32> to vector<16x64xbf16>
    %c3 = arith.constant 3 : index
    %c0_105 = arith.constant 0 : index
    %c0_106 = arith.constant 0 : index
    %270 = vector.load %arg9[%c3, %c0_105, %c0_106] : memref<4x64x128xbf16, #tpu.memory_space<vmem>>, vector<1x64x128xbf16>
    %271 = vector.shape_cast %270 : vector<1x64x128xbf16> to vector<64x128xbf16>
    %cst_107 = arith.constant dense<0.000000e+00> : vector<16x128xf32>
    %272 = tpu.matmul %269, %271, %cst_107 {dimension_numbers = #tpu.dot_dimension_numbers<[1], [0], [0], [1], [0, 0, 1, 1], [], []>} : vector<16x64xbf16>, vector<64x128xbf16>, vector<16x128xf32> -> vector<16x128xf32>
    %273 = arith.addf %244, %272 : vector<16x128xf32>
    %c1_108 = arith.constant 1 : index
    %c0_109 = arith.constant 0 : index
    %c0_110 = arith.constant 0 : index
    %274 = vector.load %arg10[%c1_108, %c0_109, %c0_110] : memref<2x1x128xf32, #tpu.memory_space<vmem>>, vector<1x1x128xf32>
    %275 = vector.shape_cast %274 : vector<1x1x128xf32> to vector<1x128xf32>
    %276 = vector.broadcast %275 : vector<1x128xf32> to vector<16x128xf32>
    %277 = arith.addf %273, %276 : vector<16x128xf32>
    %278 = arith.addf %206, %277 : vector<16x128xf32>
    %c1_111 = arith.constant 1 : index
    %c0_112 = arith.constant 0 : index
    %c0_113 = arith.constant 0 : index
    %279 = vector.load %arg11[%c1_111, %c0_112, %c0_113] : memref<2x1x128xf32, #tpu.memory_space<vmem>>, vector<1x1x128xf32>
    %280 = vector.shape_cast %279 : vector<1x1x128xf32> to vector<1x128xf32>
    %c1_114 = arith.constant 1 : index
    %c0_115 = arith.constant 0 : index
    %c0_116 = arith.constant 0 : index
    %281 = vector.load %arg12[%c1_114, %c0_115, %c0_116] : memref<2x1x128xf32, #tpu.memory_space<vmem>>, vector<1x1x128xf32>
    %282 = vector.shape_cast %281 : vector<1x1x128xf32> to vector<1x128xf32>
    %cst_117 = arith.constant dense<0.000000e+00> : vector<16xf32>
    %283 = vector.multi_reduction <add>, %278, %cst_117 [1] : vector<16x128xf32> to vector<16xf32>
    %284 = vector.shape_cast %283 : vector<16xf32> to vector<16x1xf32>
    %cst_118 = arith.constant 1.280000e+02 : f32
    %285 = vector.broadcast %cst_118 : f32 to vector<16x1xf32>
    %286 = arith.divf %284, %285 : vector<16x1xf32>
    %287 = vector.broadcast %286 : vector<16x1xf32> to vector<16x128xf32>
    %288 = arith.subf %278, %287 : vector<16x128xf32>
    %289 = arith.mulf %288, %288 : vector<16x128xf32>
    %cst_119 = arith.constant dense<0.000000e+00> : vector<16xf32>
    %290 = vector.multi_reduction <add>, %289, %cst_119 [1] : vector<16x128xf32> to vector<16xf32>
    %291 = vector.shape_cast %290 : vector<16xf32> to vector<16x1xf32>
    %cst_120 = arith.constant 1.280000e+02 : f32
    %292 = vector.broadcast %cst_120 : f32 to vector<16x1xf32>
    %293 = arith.divf %291, %292 : vector<16x1xf32>
    %294 = vector.broadcast %286 : vector<16x1xf32> to vector<16x128xf32>
    %295 = arith.subf %278, %294 : vector<16x128xf32>
    %cst_121 = arith.constant 9.99999996E-13 : f32
    %296 = vector.broadcast %cst_121 : f32 to vector<16x1xf32>
    %297 = arith.addf %293, %296 : vector<16x1xf32>
    %298 = math.rsqrt %297 : vector<16x1xf32>
    %299 = vector.broadcast %298 : vector<16x1xf32> to vector<16x128xf32>
    %300 = arith.mulf %295, %299 : vector<16x128xf32>
    %301 = vector.broadcast %280 : vector<1x128xf32> to vector<16x128xf32>
    %302 = arith.mulf %300, %301 : vector<16x128xf32>
    %303 = vector.broadcast %282 : vector<1x128xf32> to vector<16x128xf32>
    %304 = arith.addf %302, %303 : vector<16x128xf32>
    %305 = arith.truncf %304 : vector<16x128xf32> to vector<16x128xbf16>
    %c1_122 = arith.constant 1 : index
    %c0_123 = arith.constant 0 : index
    %c0_124 = arith.constant 0 : index
    %306 = vector.load %arg13[%c1_122, %c0_123, %c0_124] : memref<2x128x512xbf16, #tpu.memory_space<vmem>>, vector<1x128x512xbf16>
    %307 = vector.shape_cast %306 : vector<1x128x512xbf16> to vector<128x512xbf16>
    %cst_125 = arith.constant dense<0.000000e+00> : vector<16x512xf32>
    %308 = tpu.matmul %305, %307, %cst_125 {dimension_numbers = #tpu.dot_dimension_numbers<[1], [0], [0], [1], [0, 0, 1, 1], [], []>} : vector<16x128xbf16>, vector<128x512xbf16>, vector<16x512xf32> -> vector<16x512xf32>
    %c1_126 = arith.constant 1 : index
    %c0_127 = arith.constant 0 : index
    %c0_128 = arith.constant 0 : index
    %309 = vector.load %arg14[%c1_126, %c0_127, %c0_128] : memref<2x1x512xf32, #tpu.memory_space<vmem>>, vector<1x1x512xf32>
    %310 = vector.shape_cast %309 : vector<1x1x512xf32> to vector<1x512xf32>
    %311 = vector.broadcast %310 : vector<1x512xf32> to vector<16x512xf32>
    %312 = arith.addf %308, %311 : vector<16x512xf32>
    %313 = arith.mulf %312, %312 : vector<16x512xf32>
    %314 = arith.mulf %312, %313 : vector<16x512xf32>
    %cst_129 = arith.constant 4.471500e-02 : f32
    %315 = vector.broadcast %cst_129 : f32 to vector<16x512xf32>
    %316 = arith.mulf %315, %314 : vector<16x512xf32>
    %317 = arith.addf %312, %316 : vector<16x512xf32>
    %cst_130 = arith.constant 0.797884583 : f32
    %318 = vector.broadcast %cst_130 : f32 to vector<16x512xf32>
    %319 = arith.mulf %318, %317 : vector<16x512xf32>
    %320 = math.tanh %319 : vector<16x512xf32>
    %cst_131 = arith.constant 1.000000e+00 : f32
    %321 = vector.broadcast %cst_131 : f32 to vector<16x512xf32>
    %322 = arith.addf %321, %320 : vector<16x512xf32>
    %cst_132 = arith.constant 5.000000e-01 : f32
    %323 = vector.broadcast %cst_132 : f32 to vector<16x512xf32>
    %324 = arith.mulf %323, %322 : vector<16x512xf32>
    %325 = arith.mulf %312, %324 : vector<16x512xf32>
    %326 = arith.truncf %325 : vector<16x512xf32> to vector<16x512xbf16>
    %c1_133 = arith.constant 1 : index
    %c0_134 = arith.constant 0 : index
    %c0_135 = arith.constant 0 : index
    %327 = vector.load %arg15[%c1_133, %c0_134, %c0_135] : memref<2x512x128xbf16, #tpu.memory_space<vmem>>, vector<1x512x128xbf16>
    %328 = vector.shape_cast %327 : vector<1x512x128xbf16> to vector<512x128xbf16>
    %cst_136 = arith.constant dense<0.000000e+00> : vector<16x128xf32>
    %329 = tpu.matmul %326, %328, %cst_136 {dimension_numbers = #tpu.dot_dimension_numbers<[1], [0], [0], [1], [0, 0, 1, 1], [], []>} : vector<16x512xbf16>, vector<512x128xbf16>, vector<16x128xf32> -> vector<16x128xf32>
    %c1_137 = arith.constant 1 : index
    %c0_138 = arith.constant 0 : index
    %c0_139 = arith.constant 0 : index
    %330 = vector.load %arg16[%c1_137, %c0_138, %c0_139] : memref<2x1x128xf32, #tpu.memory_space<vmem>>, vector<1x1x128xf32>
    %331 = vector.shape_cast %330 : vector<1x1x128xf32> to vector<1x128xf32>
    %332 = vector.broadcast %331 : vector<1x128xf32> to vector<16x128xf32>
    %333 = arith.addf %329, %332 : vector<16x128xf32>
    %334 = arith.addf %304, %333 : vector<16x128xf32>
    %c1_140 = arith.constant 1 : index
    %c0_141 = arith.constant 0 : index
    %c0_142 = arith.constant 0 : index
    %335 = vector.load %arg17[%c1_140, %c0_141, %c0_142] : memref<2x1x128xf32, #tpu.memory_space<vmem>>, vector<1x1x128xf32>
    %336 = vector.shape_cast %335 : vector<1x1x128xf32> to vector<1x128xf32>
    %c1_143 = arith.constant 1 : index
    %c0_144 = arith.constant 0 : index
    %c0_145 = arith.constant 0 : index
    %337 = vector.load %arg18[%c1_143, %c0_144, %c0_145] : memref<2x1x128xf32, #tpu.memory_space<vmem>>, vector<1x1x128xf32>
    %338 = vector.shape_cast %337 : vector<1x1x128xf32> to vector<1x128xf32>
    %cst_146 = arith.constant dense<0.000000e+00> : vector<16xf32>
    %339 = vector.multi_reduction <add>, %334, %cst_146 [1] : vector<16x128xf32> to vector<16xf32>
    %340 = vector.shape_cast %339 : vector<16xf32> to vector<16x1xf32>
    %cst_147 = arith.constant 1.280000e+02 : f32
    %341 = vector.broadcast %cst_147 : f32 to vector<16x1xf32>
    %342 = arith.divf %340, %341 : vector<16x1xf32>
    %343 = vector.broadcast %342 : vector<16x1xf32> to vector<16x128xf32>
    %344 = arith.subf %334, %343 : vector<16x128xf32>
    %345 = arith.mulf %344, %344 : vector<16x128xf32>
    %cst_148 = arith.constant dense<0.000000e+00> : vector<16xf32>
    %346 = vector.multi_reduction <add>, %345, %cst_148 [1] : vector<16x128xf32> to vector<16xf32>
    %347 = vector.shape_cast %346 : vector<16xf32> to vector<16x1xf32>
    %cst_149 = arith.constant 1.280000e+02 : f32
    %348 = vector.broadcast %cst_149 : f32 to vector<16x1xf32>
    %349 = arith.divf %347, %348 : vector<16x1xf32>
    %350 = vector.broadcast %342 : vector<16x1xf32> to vector<16x128xf32>
    %351 = arith.subf %334, %350 : vector<16x128xf32>
    %cst_150 = arith.constant 9.99999996E-13 : f32
    %352 = vector.broadcast %cst_150 : f32 to vector<16x1xf32>
    %353 = arith.addf %349, %352 : vector<16x1xf32>
    %354 = math.rsqrt %353 : vector<16x1xf32>
    %355 = vector.broadcast %354 : vector<16x1xf32> to vector<16x128xf32>
    %356 = arith.mulf %351, %355 : vector<16x128xf32>
    %357 = vector.broadcast %336 : vector<1x128xf32> to vector<16x128xf32>
    %358 = arith.mulf %356, %357 : vector<16x128xf32>
    %359 = vector.broadcast %338 : vector<1x128xf32> to vector<16x128xf32>
    %360 = arith.addf %358, %359 : vector<16x128xf32>
    %361 = vector.shape_cast %360 : vector<16x128xf32> to vector<2x8x128xf32>
    %362 = vector.extract_strided_slice %361 {offsets = [0, 0, 0], sizes = [2, 1, 128], strides = [1, 1, 1]} : vector<2x8x128xf32> to vector<2x1x128xf32>
    %363 = vector.shape_cast %362 : vector<2x1x128xf32> to vector<2x128xf32>
    %364 = arith.truncf %363 : vector<2x128xf32> to vector<2x128xbf16>
    %c0_151 = arith.constant 0 : index
    %c0_152 = arith.constant 0 : index
    %365 = vector.load %arg19[%c0_151, %c0_152] : memref<128x128xbf16, #tpu.memory_space<vmem>>, vector<128x128xbf16>
    %cst_153 = arith.constant dense<0.000000e+00> : vector<2x128xf32>
    %366 = tpu.matmul %364, %365, %cst_153 {dimension_numbers = #tpu.dot_dimension_numbers<[1], [0], [0], [1], [0, 0, 1, 1], [], []>} : vector<2x128xbf16>, vector<128x128xbf16>, vector<2x128xf32> -> vector<2x128xf32>
    %c0_154 = arith.constant 0 : index
    %c0_155 = arith.constant 0 : index
    %367 = vector.load %arg20[%c0_154, %c0_155] : memref<1x128xf32, #tpu.memory_space<vmem>>, vector<1x128xf32>
    %368 = vector.broadcast %367 : vector<1x128xf32> to vector<2x128xf32>
    %369 = arith.addf %366, %368 : vector<2x128xf32>
    %370 = math.tanh %369 : vector<2x128xf32>
    %c0_156 = arith.constant 0 : index
    %c0_157 = arith.constant 0 : index
    %371 = vector.load %arg21[%c0_156, %c0_157] : memref<2x128xf32, #tpu.memory_space<vmem>>, vector<2x128xf32>
    tpu.vector_store %arg21[%c0_156, %c0_157], %370 {strides = array<i32>} : memref<2x128xf32, #tpu.memory_space<vmem>>, vector<2x128xf32>,
    return
  }
}

</mosaic_0001>

<bundles_post_ra>
// kernel: bert_forward.1
= control target key start
LH: loop header
LB: loop body
LE: loop exit
PB: predicated region body
PF: predicated region fallthrough
CT: control target
= control target key end

     0   :  { %s5855_s0 = inlined_call_operand.vmem [shape: s32[16,1], index: 0, kind: input, shape index: {}]   ;;  %s5856_s1 = inlined_call_operand.vmem [shape: f32[2,8], index: 1, kind: input, shape index: {}]   ;;  %s5857_s2 = inlined_call_operand.hbm [shape: bf16[128,128], index: 2, kind: input, shape index: {}]   ;;  %s5858_s3 = inlined_call_operand.vmem [shape: f32[8,128], index: 3, kind: input, shape index: {}]   ;;  %s5859_s4 = inlined_call_operand.vmem [shape: f32[1,128], index: 4, kind: input, shape index: {}]   ;;  %s5860_s5 = inlined_call_operand.hbm [shape: f32[1,128], index: 5, kind: input, shape index: {}]   ;;  %s5861_s6 = inlined_call_operand.hbm [shape: f32[1,128], index: 6, kind: input, shape index: {}]   ;;  %s5862_s7 = inlined_call_operand.hbm [shape: bf16[2,128,384], index: 7, kind: input, shape index: {}]   ;;  %s5863_s8 = inlined_call_operand.vmem [shape: f32[2,1,384], index: 8, kind: input, shape index: {}]   ;;  %s5864_s9 = inlined_call_operand.hbm [shape: bf16[4,64,128], index: 9, kind: input, shape index: {}]   ;;  %s5865_s10 = inlined_call_operand.hbm [shape: f32[2,1,128], index: 10, kind: input, shape index: {}]   ;;  %s5866_s11 = inlined_call_operand.vmem [shape: f32[2,1,128], index: 11, kind: input, shape index: {}]   ;;  %s5867_s12 = inlined_call_operand.vmem [shape: f32[2,1,128], index: 12, kind: input, shape index: {}]   ;;  %s5868_s13 = inlined_call_operand.hbm [shape: bf16[2,128,512], index: 13, kind: input, shape index: {}]   ;;  %s5869_s14 = inlined_call_operand.vmem [shape: f32[2,1,512], index: 14, kind: input, shape index: {}]   ;;  %s5870_s15 = inlined_call_operand.hbm [shape: bf16[2,512,128], index: 15, kind: input, shape index: {}]   ;;  %s5871_s16 = inlined_call_operand.hbm [shape: f32[2,1,128], index: 16, kind: input, shape index: {}]   ;;  %s5872_s17 = inlined_call_operand.vmem [shape: f32[2,1,128], index: 17, kind: input, shape index: {}]   ;;  %s5873_s18 = inlined_call_operand.vmem [shape: f32[2,1,128], index: 18, kind: input, shape index: {}]   ;;  %s5874_s19 = inlined_call_operand.hbm [shape: bf16[128,128], index: 19, kind: input, shape index: {}]   ;;  %s5875_s20 = inlined_call_operand.vmem [shape: f32[1,128], index: 20, kind: input, shape index: {}]   ;;  %s5876_s21 = inlined_call_operand.hbm [shape: f32[2,128], index: 21, kind: output, shape index: {}]  }
   0x1   :  { %5878 = sst [smem:[#allocation27_spill]] %s5855_s0 }
   0x2   :  { %5879 = sst [smem:[#allocation28_spill]] %s5856_s1 }
   0x3   :  { %5880 = sst [smem:[#allocation29_spill]] %s5857_s2 }
   0x4   :  { %5881 = sst [smem:[#allocation30_spill]] %s5858_s3 }
   0x5   :  { %5882 = sst [smem:[#allocation31_spill]] %s5859_s4 }
   0x6   :  { %5883 = sst [smem:[#allocation32_spill]] %s5860_s5 }
   0x7   :  { %26 = vsyncpa [#allocation3], 0 }
   0x8   :  { %27 = vsyncpa [#allocation6], 0 }
   0x9   :  { %28 = vsyncpa [#allocation9], 0 }
   0xa   :  { %29 = vsyncpa [#allocation12], 0 }
   0xb   :  { %30 = vsyncpa [#allocation15], 0 }
   0xc   :  { %31 = vsyncpa [#allocation18], 0 }
   0xd   :  { %32 = vsyncpa [#allocation4], 0  ;;  %s5170_s2 = smov [#allocation5]   ;;  %s5171_s26 = smov [#allocation8]  }
   0xe   :  { %s59_s25 = sshll.u32 %s5170_s2, 4  ;;  %s78_s27 = sshll.u32 %s5171_s26, 4  ;;  %s60_s25 = int_to_ptr.vmem [resolvable:$true] %s59_s25  ;;  %s79_s27 = int_to_ptr.vmem [resolvable:$true] %s78_s27 }
   0xf   :  { %s4944_s3 = scalar_lea.vmem %s60_s25, 16  ;;  %s4948_s28 = scalar_lea.vmem %s60_s25, 32 }
  0x10   :  { %p4945_p0 = scmp.ne.s32.totalorder %s60_s25, %s4944_s3  ;;  %p4949_p1 = scmp.lt.s32.totalorder %s60_s25, %s60_s25 }
  0x11   :  { %p4950_p2 = scmp.lt.s32.totalorder %s4948_s28, %s4944_s3 }
  0x13   :  { %p4951_p3 = por %p4950_p2, %p4949_p1 }
  0x15   :  { %p4952_p4 = pnand %p4951_p3, %p4945_p0 }
  0x17   :  { %4955 = shalt.err (!%p4952_p4)
}
  0x18   :  { %s5884_s4 = sld [smem:[#allocation32_spill]]  ;;  %s4964_s30 = scalar_lea.vmem %s79_s27, 6144 }
  0x19   :  { %p4965_p5 = scmp.ne.s32.totalorder %s79_s27, %s4964_s30  ;;  %p4969_p6 = scmp.lt.s32.totalorder %s79_s27, %s79_s27 }
  0x1a   :  { %p4970_p7 = scmp.lt.s32.totalorder %s4964_s30, %s4964_s30 }
  0x1c   :  { %p4971_p8 = por %p4970_p7, %p4969_p6 }
  0x1e   :  { %62 = dma.hbm_to_vmem [thread:$0]  %s5884_s4, 16, %s60_s25, [#allocation6]  }
  0x1f   :  { %p4972_p9 = pnand %p4971_p8, %p4965_p5 }
  0x21   :  { %4975 = shalt.err (!%p4972_p9)
}
  0x22   :  { %s5172_s5 = smov 192   ;;  %s5173_s22 = smov 12  }
  0x23   :  { %84 = dma.hbm_to_vmem [thread:$0]  %s5862_s7, 6144, %s79_s27, [#allocation9], %s5172_s5, %s5172_s5, %s5173_s22  }
  0x24   :  { %s5174_s24 = smov [#allocation11]  }
  0x25   :  { %s104_s2 = sshll.u32 %s5174_s24, 4  ;;  %s105_s2 = int_to_ptr.vmem [resolvable:$true] %s104_s2 }
  0x26   :  { %s4984_s26 = scalar_lea.vmem %s105_s2, 32  ;;  %p4989_p11 = scmp.lt.s32.totalorder %s105_s2, %s105_s2 }
  0x27   :  { %p4985_p10 = scmp.ne.s32.totalorder %s105_s2, %s4984_s26  ;;  %p4990_p12 = scmp.lt.s32.totalorder %s4984_s26, %s4984_s26 }
  0x29   :  { %p4991_p13 = por %p4990_p12, %p4989_p11 }
  0x2b   :  { %p4992_p0 = pnand %p4991_p13, %p4985_p10 }
  0x2d   :  { %4995 = shalt.err (!%p4992_p0)
}
  0x2e   :  { %s5175_s25 = smov 16   ;;  %s5176_s3 = smov 1  }
  0x2f   :  { %110 = dma.hbm_to_vmem [thread:$0]  %s5865_s10, 32, %s105_s2, [#allocation12], %s5175_s25, %s5175_s25, %s5176_s3  }
  0x30   :  { %s5177_s7 = smov [#allocation14]   ;;  %s5178_s0 = smov [#allocation2]  }
  0x31   :  { %s134_s27 = sshll.u32 %s5177_s7, 4  ;;  %s42_s4 = sshll.u32 %s5178_s0, 4  ;;  %s135_s27 = int_to_ptr.vmem [resolvable:$true] %s134_s27  ;;  %s43_s4 = int_to_ptr.vmem [resolvable:$true] %s42_s4 }
  0x32   :  { %s5004_s30 = scalar_lea.vmem %s135_s27, 8192  ;;  %p5009_p2 = scmp.lt.s32.totalorder %s135_s27, %s135_s27 }
  0x33   :  { %p5005_p1 = scmp.ne.s32.totalorder %s135_s27, %s5004_s30  ;;  %p5010_p3 = scmp.lt.s32.totalorder %s5004_s30, %s5004_s30 }
  0x35   :  { %p5011_p4 = por %p5010_p3, %p5009_p2 }
  0x37   :  { %p5012_p5 = pnand %p5011_p4, %p5005_p1 }
  0x39   :  { %5015 = shalt.err (!%p5012_p5)
}
  0x3a   :  { %s5179_s5 = smov 64   ;;  %s5180_s22 = smov 4  }
  0x3b   :  { %140 = dma.hbm_to_vmem [thread:$0]  %s5870_s15, 8192, %s135_s27, [#allocation15], %s5179_s5, %s5179_s5, %s5180_s22  }
  0x3c   :  { %s5024_s10 = scalar_lea.vmem %s43_s4, 1024  ;;  %p5029_p7 = scmp.lt.s32.totalorder %s43_s4, %s43_s4 }
  0x3d   :  { %p5025_p6 = scmp.ne.s32.totalorder %s43_s4, %s5024_s10  ;;  %p5030_p8 = scmp.lt.s32.totalorder %s5024_s10, %s5024_s10 }
  0x3f   :  { %p5031_p9 = por %p5030_p8, %p5029_p7 }
  0x41   :  { %p5032_p10 = pnand %p5031_p9, %p5025_p6 }
  0x43   :  { %5035 = shalt.err (!%p5032_p10)
}
  0x44   :  { %s5885_s26 = sld [smem:[#allocation29_spill]]  ;;  %s5181_s28 = smov [#allocation7]  }
  0x45   :  { %s69_s29 = sshll.u32 %s5181_s28, 4  ;;  %s5182_s7 = smov [#allocation10]   ;;  %s70_s29 = int_to_ptr.vmem [resolvable:$true] %s69_s29 }
  0x46   :  { %s92_s15 = sshll.u32 %s5182_s7, 4  ;;  %s5044_s27 = scalar_lea.vmem %s70_s29, 16  ;;  %s93_s15 = int_to_ptr.vmem [resolvable:$true] %s92_s15 }
  0x47   :  { %p5045_p11 = scmp.ne.s32.totalorder %s70_s29, %s5044_s27  ;;  %s5048_s0 = scalar_lea.vmem %s70_s29, 32 }
  0x48   :  { %p5049_p12 = scmp.lt.s32.totalorder %s70_s29, %s70_s29  ;;  %p5050_p13 = scmp.lt.s32.totalorder %s5048_s0, %s5044_s27 }
  0x4a   :  { %48 = dma.hbm_to_vmem [thread:$0]  %s5885_s26, 1024, %s43_s4, [#allocation3], %s5179_s5, %s5179_s5, %s5180_s22  }
  0x4b   :  { %p5051_p0 = por %p5050_p13, %p5049_p12 }
  0x4d   :  { %p5052_p1 = pnand %p5051_p0, %p5045_p11 }
  0x4f   :  { %5055 = shalt.err (!%p5052_p1)
}
  0x50   :  { %72 = dma.hbm_to_vmem [thread:$0]  %s5861_s6, 16, %s70_s29, [#allocation6]  }
  0x51   :  { %s5064_s1 = scalar_lea.vmem %s93_s15, 2048  ;;  %p5069_p3 = scmp.lt.s32.totalorder %s93_s15, %s93_s15 }
  0x52   :  { %p5065_p2 = scmp.ne.s32.totalorder %s93_s15, %s5064_s1  ;;  %p5070_p4 = scmp.lt.s32.totalorder %s5064_s1, %s5064_s1 }
  0x54   :  { %p5071_p5 = por %p5070_p4, %p5069_p3 }
  0x56   :  { %p5072_p6 = pnand %p5071_p5, %p5065_p2 }
  0x58   :  { %5075 = shalt.err (!%p5072_p6)
}
  0x59   :  { %98 = dma.hbm_to_vmem [thread:$0]  %s5864_s9, 2048, %s93_s15, [#allocation9], %s5179_s5, %s5179_s5, %s5180_s22  }
  0x5a   :  { %s5183_s24 = smov [#allocation13]  }
  0x5b   :  { %s120_s2 = sshll.u32 %s5183_s24, 4  ;;  %s121_s2 = int_to_ptr.vmem [resolvable:$true] %s120_s2 }
  0x5c   :  { %s5084_s26 = scalar_lea.vmem %s121_s2, 8192  ;;  %p5089_p8 = scmp.lt.s32.totalorder %s121_s2, %s121_s2 }
  0x5d   :  { %p5085_p7 = scmp.ne.s32.totalorder %s121_s2, %s5084_s26  ;;  %p5090_p9 = scmp.lt.s32.totalorder %s5084_s26, %s5084_s26 }
  0x5f   :  { %p5091_p10 = por %p5090_p9, %p5089_p8 }
  0x61   :  { %p5092_p11 = pnand %p5091_p10, %p5085_p7 }
  0x63   :  { %5095 = shalt.err (!%p5092_p11)
}
  0x64   :  { %s5184_s6 = smov 256   ;;  %s5185_s7 = smov [#allocation16]  }
  0x65   :  { %126 = dma.hbm_to_vmem [thread:$0]  %s5868_s13, 8192, %s121_s2, [#allocation12], %s5184_s6, %s5184_s6, %s5175_s25  }
  0x66   :  { %s146_s27 = sshll.u32 %s5185_s7, 4  ;;  %s5186_s9 = smov [#allocation17]   ;;  %s147_s27 = int_to_ptr.vmem [resolvable:$true] %s146_s27 }
  0x67   :  { %s162_s15 = sshll.u32 %s5186_s9, 4  ;;  %s5104_s0 = scalar_lea.vmem %s147_s27, 32  ;;  %s163_s15 = int_to_ptr.vmem [resolvable:$true] %s162_s15 }
  0x68   :  { %p5105_p12 = scmp.ne.s32.totalorder %s147_s27, %s5104_s0  ;;  %p5109_p13 = scmp.lt.s32.totalorder %s147_s27, %s147_s27 }
  0x69   :  { %p5110_p0 = scmp.lt.s32.totalorder %s5104_s0, %s5104_s0 }
  0x6b   :  { %p5111_p1 = por %p5110_p0, %p5109_p13 }
  0x6d   :  { %p5112_p2 = pnand %p5111_p1, %p5105_p12 }
  0x6f   :  { %5115 = shalt.err (!%p5112_p2)
}
  0x70   :  { %152 = dma.hbm_to_vmem [thread:$0]  %s5871_s16, 32, %s147_s27, [#allocation15], %s5175_s25, %s5175_s25, %s5176_s3  }
  0x71   :  { %s5124_s13 = scalar_lea.vmem %s163_s15, 1024  ;;  %p5129_p4 = scmp.lt.s32.totalorder %s163_s15, %s163_s15 }
  0x72   :  { %p5125_p3 = scmp.ne.s32.totalorder %s163_s15, %s5124_s13  ;;  %p5130_p5 = scmp.lt.s32.totalorder %s5124_s13, %s5124_s13 }
  0x74   :  { %p5131_p6 = por %p5130_p5, %p5129_p4 }
  0x76   :  { %p5132_p7 = pnand %p5131_p6, %p5125_p3 }
  0x78   :  { %5135 = shalt.err (!%p5132_p7)
}
  0x79   :  { %168 = dma.hbm_to_vmem [thread:$0]  %s5874_s19, 1024, %s163_s15, [#allocation18], %s5179_s5, %s5179_s5, %s5180_s22  }
  0x7a   :  { %5156 = dma.done.wait [#allocation3], 1024  }
  0x7b   :  { %5157 = vsyncadd [#allocation3], 4294966272 }
  0x7c   :  { %5158 = dma.done.wait [#allocation6], 32  }
  0x7d   :  { %5159 = vsyncadd [#allocation6], 4294967264 }
  0x7e   :  { %5160 = dma.done.wait [#allocation9], 8192  }
  0x7f   :  { %5161 = vsyncadd [#allocation9], 4294959104 }
  0x80   :  { %5162 = dma.done.wait [#allocation12], 8224  }
  0x81   :  { %5163 = vsyncadd [#allocation12], 4294959072 }
  0x82   :  { %5164 = dma.done.wait [#allocation15], 8224  }
  0x83   :  { %5165 = vsyncadd [#allocation15], 4294959072 }
  0x84   :  { %5166 = dma.done.wait [#allocation18], 1024  }
  0x85   :  { %5167 = vsyncadd [#allocation18], 4294966272  ;;  %v5187_v0 = vmov 0   ;;  %v5188_v1 = vmov 0.0   ;;  %s5886_s25 = sld [smem:[#allocation27_spill]]  ;;  %v4594_v3 = vld [vmem:[#allocation2 + $0x38] sm:$0xff]   ;;  %v205_v12 = vlaneseq }
  0x86   :  { %4593 = vset.pattern.permute.xlu0 %v5187_v0  ;;  %4346 = vmatprep.subr.bf16.mxu0 %v5188_v1  ;;  %vm5189_vm0 = vmmov 0   ;;  %v4595_v5 = vld [vmem:[#allocation2 + $0x30] sm:$0xff]   ;;  %v4596_v6 = vld [vmem:[#allocation2 + $0x28] sm:$0xff]   ;;  %v4597_v7 = vld [vmem:[#allocation2 + $0x20] sm:$0xff]   ;;  %v5190_v16 = vmov 1.0|1.0  }
  0x87   :  { %623 = vmatprep.mubr.bf16.mxu1 %v5187_v0  ;;  %4362 = vmatprep.mubr.msk.bf16.mxu0 %vm5189_vm0, %v5188_v1  ;;  %v4598_v8 = vld [vmem:[#allocation2 + $0x18] sm:$0xff]   ;;  %v4599_v9 = vld [vmem:[#allocation2 + $0x10] sm:$0xff]   ;;  %v4600_v10 = vld [vmem:[#allocation2 + $0x8] sm:$0xff]   ;;  %v206_v14 = vand.u32 127, %v205_v12  ;;  %s5887_s2 = sld [smem:[#allocation30_spill]]  ;;  %vm681_vm4 = vcmask 523264  }
  0x88   :  { %4347 = vmatpush3.bf16.msra.mxu0 %v4594_v3  ;;  %v4601_v11 = vld [vmem:[#allocation2] sm:$0xff]   ;;  %s5888_s28 = sld [smem:[#allocation31_spill]]  ;;  %v4602_v27 = vld [vmem:[#allocation8 + $0xac] ss:$12 sps:$4 sm:$0xff]   ;;  %v4604_v28 = vld [vmem:[#allocation8 + $0xa8] ss:$12 sps:$4 sm:$0xff]  }
  0x89   :  { %4348 = vmatprep.subr.bf16.mxu0 %v5188_v1  ;;  %v4605_v29 = vld [vmem:[#allocation8 + $0xb0] ss:$12 sps:$4 sm:$0xff]   ;;  %591 = vmatprep.subr.bf16.mxu1 %v4602_v27  ;;  %v4606_v38 = vld [vmem:[#allocation8 + $0x94] ss:$12 sps:$4 sm:$0xff]   ;;  %v4609_v40 = vld [vmem:[#allocation8 + $0x98] ss:$12 sps:$4 sm:$0xff]  }
  0x8a   :  { %592 = vmatpush1.bf16.msra.mxu1 %v4604_v28  ;;  %v4608_v39 = vld [vmem:[#allocation8 + $0x90] ss:$12 sps:$4 sm:$0xff]   ;;  %v4612_v42 = vld [vmem:[#allocation8 + $0x78] ss:$12 sps:$4 sm:$0xff]   ;;  %v4613_v43 = vld [vmem:[#allocation8 + $0x80] ss:$12 sps:$4 sm:$0xff]  }
  0x8b   :  { %v203_v2 = vld [vmem:[%s5886_s25] sm:$0xff]  ;;  %v204_v4 = vld [vmem:[%s5886_s25 + $0x8] sm:$0xff]  ;;  %593 = vmatprep.subr.bf16.mxu1 %v4606_v38  ;;  %v4618_v47 = vld [vmem:[#allocation8 + $0x4c] ss:$12 sps:$4 sm:$0xff]   ;;  %vm802_vm5 = vcmask 1043456   ;;  %s5889_s15 = sld [smem:[#allocation28_spill]] }
  0x8c   :  { %208 = vperm.xlu0 %4593, %v203_v2   ;;  %4349 = vmatpush3.bf16.msra.mxu0 %v4595_v5  ;;  %v4610_v41 = vld [vmem:[#allocation8 + $0x7c] ss:$12 sps:$4 sm:$0xff]   ;;  %v4614_v44 = vld [vmem:[#allocation8 + $0x64] ss:$12 sps:$4 sm:$0xff]   ;;  %v4616_v45 = vld [vmem:[#allocation8 + $0x60] ss:$12 sps:$4 sm:$0xff]  }
  0x8d   :  { %4350 = vmatprep.subr.bf16.mxu0 %v5188_v1  ;;  %v325_v17 = vld [vmem:[%s5887_s2] sm:$0xff]  ;;  %v4617_v46 = vld [vmem:[#allocation8 + $0x68] ss:$12 sps:$4 sm:$0xff]   ;;  %v4625_v52 = vld [vmem:[#allocation8 + $0x38] ss:$12 sps:$4 sm:$0xff]   ;;  %vm774_vm6 = vcmask 64512  }
  0x8e   :  { %v3928_v19 = vld [vmem:[%s5888_s28] ss:$0 sm:$0xff]  ;;  %594 = vmatpush1.bf16.msra.mxu1 %v4608_v39  ;;  %v4620_v48 = vld [vmem:[#allocation8 + $0x48] ss:$12 sps:$4 sm:$0xff]   ;;  %v4628_v54 = vld [vmem:[#allocation8 + $0x18] ss:$12 sps:$4 sm:$0xff]  }
  0x8f   :  { %595 = vmatprep.subr.bf16.mxu1 %v4610_v41  ;;  %v4621_v49 = vld [vmem:[#allocation8 + $0x50] ss:$12 sps:$4 sm:$0xff]   ;;  %v4622_v50 = vld [vmem:[#allocation8 + $0x34] ss:$12 sps:$4 sm:$0xff]   ;;  %vm3802_vm7 = vcmask 1041409  }
  0x90   :  { %211 = vperm.xlu0 %4593, %v204_v4   ;;  %4351 = vmatpush3.bf16.msra.mxu0 %v4596_v6  ;;  %v4624_v51 = vld [vmem:[#allocation8 + $0x30] ss:$12 sps:$4 sm:$0xff]   ;;  %v4629_v55 = vld [vmem:[#allocation8 + $0x20] ss:$12 sps:$4 sm:$0xff]   ;;  %v4633_v58 = vld [vmem:[#allocation8 + $0x8] ss:$12 sps:$4 sm:$0xff]  }
  0x91   :  { %4352 = vmatprep.subr.bf16.mxu0 %v5188_v1  ;;  %v4626_v53 = vld [vmem:[#allocation8 + $0x1c] ss:$12 sps:$4 sm:$0xff]   ;;  %v4630_v56 = vld [vmem:[#allocation8 + $0x4] ss:$12 sps:$4 sm:$0xff]   ;;  %v4632_v57 = vld [vmem:[#allocation8] ss:$12 sps:$4 sm:$0xff]  }
  0x92   :  { %596 = vmatpush1.bf16.msra.mxu1 %v4612_v42  ;;  %v3929_v5 = vld [vmem:[#allocation5] ss:$0 sm:$0xff] }
  0x93   :  { %597 = vmatprep.subr.bf16.mxu1 %v4614_v44  ;;  %v5191_v44 = vmov 1966171168  }
  0x94   :  { %4353 = vmatpush3.bf16.msra.mxu0 %v4597_v7 }
  0x95   :  { %4354 = vmatprep.subr.bf16.mxu0 %v5188_v1 }
  0x96   :  { %598 = vmatpush1.bf16.msra.mxu1 %v4616_v45  ;;  %v341_v45 = vunpack.c.l.s4 %v5191_v44 }
  0x97   :  { %599 = vmatprep.subr.bf16.mxu1 %v4618_v47 }
  0x98   :  { %4355 = vmatpush3.bf16.msra.mxu0 %v4598_v8 }
  0x99   :  { %4356 = vmatprep.subr.bf16.mxu0 %v5188_v1 }
  0x9a   :  { %600 = vmatpush1.bf16.msra.mxu1 %v4620_v48  ;;  %v342_v48 = vunpack.c.0.s8 %v341_v45 }
  0x9b   :  { %601 = vmatprep.subr.bf16.mxu1 %v4622_v50 }
  0x9c   :  { %4357 = vmatpush3.bf16.msra.mxu0 %v4599_v9  ;;  %v3930_v9 = vld [vmem:[#allocation7] ss:$0 sm:$0xff] }
  0x9d   :  { %4358 = vmatprep.subr.bf16.mxu0 %v5188_v1 }
  0x9e   :  { %602 = vmatpush1.bf16.msra.mxu1 %v4624_v51 }
  0x9f   :  { %603 = vmatprep.subr.bf16.mxu1 %v4626_v53 }
  0xa0   :  { %4359 = vmatpush3.bf16.msra.mxu0 %v4600_v10 }
  0xa1   :  { %4360 = vmatprep.subr.bf16.mxu0 %v5188_v1 }
  0xa2   :  { %604 = vmatpush1.bf16.msra.mxu1 %v4628_v54 }
  0xa3   :  { %605 = vmatprep.subr.bf16.mxu1 %v4630_v56 }
  0xa4   :  { %4361 = vmatpush3.bf16.msra.mxu0 %v4601_v11 }
  0xa5   :  { %4366 = vmatprep.subr.bf16.mxu0 %v5188_v1 }
  0xa6   :  { %606 = vmatpush1.bf16.msra.mxu1 %v4632_v57 }
  0xa7   :  { %4386 = vmatprep.subr.bf16.mxu1 %v5188_v1 }
 0x107   :  { %v209_v13 = vpop.permute.xlu0 %208 }
 0x108   :  { %vm213_vm1 = vcmp.eq.s32.totalorder %v209_v13, %v206_v14 }
 0x10b   :  { %v212_v15 = vpop.permute.xlu0 %211 }
 0x10c   :  { %vm214_vm2 = vcmp.eq.s32.totalorder %v212_v15, %v206_v14  ;;  %v5410_v15 = vshrl.u32 %v205_v12, 7 }
 0x10d   :  { %vm3926_vm3 = vmpackc.low %vm214_vm2, %vm213_vm1 }
 0x10e   :  { %4363 = vmatmul.mubr.msk.bf16.vlgmr.msra.gmra.mxu0 %vm3926_vm3, %v5190_v16  ;;  %v5413_v16 = vsub.s32 1, %v5410_v15  ;;  %v345_v50 = vsub.s32 %v342_v48, %v5410_v15 }
 0x10f   :  { %4382 = vmatprep.mubr.msk.bf16.mxu0 %vm5189_vm0, %v5188_v1  ;;  %4367 = vmatpush3.bf16.msra.mxu0 %v4605_v29 }
 0x110   :  { %4368 = vmatprep.subr.bf16.mxu0 %v5188_v1 }
 0x113   :  { %4369 = vmatpush3.bf16.msra.mxu0 %v4609_v40 }
 0x114   :  { %4370 = vmatprep.subr.bf16.mxu0 %v5188_v1 }
 0x117   :  { %4371 = vmatpush3.bf16.msra.mxu0 %v4613_v43 }
 0x118   :  { %4372 = vmatprep.subr.bf16.mxu0 %v5188_v1 }
 0x11b   :  { %4373 = vmatpush3.bf16.msra.mxu0 %v4617_v46  ;;  %v202_v46 = vld [vmem:[%s5889_s15] sm:$0x3] }
 0x11c   :  { %4374 = vmatprep.subr.bf16.mxu0 %v5188_v1  ;;  %v337_v47 = vsub.f32 1.0, %v202_v46 }
 0x11f   :  { %4375 = vmatpush3.bf16.msra.mxu0 %v4621_v49  ;;  %v338_v49 = vmul.f32 -10000.0, %v337_v47 }
 0x120   :  { %4376 = vmatprep.subr.bf16.mxu0 %v5188_v1 }
 0x121   :  { %v346_v51 = vrot.slane %v338_v49, %v345_v50 }
 0x123   :  { %4377 = vmatpush3.bf16.msra.mxu0 %v4625_v52  ;;  %v354_v52 = vrot.slane %v346_v51, %v345_v50  ;;  %v347_v54 = vcombine.high %v346_v51, %v346_v51 }
 0x124   :  { %4378 = vmatprep.subr.bf16.mxu0 %v5188_v1 }
 0x125   :  { %v361_v57 = vrot.slane %v347_v54, %v345_v50 }
 0x127   :  { %4379 = vmatpush3.bf16.msra.mxu0 %v4629_v55 }
 0x128   :  { %4380 = vmatprep.subr.bf16.mxu0 %v5188_v1 }
 0x12b   :  { %4381 = vmatpush3.bf16.msra.mxu0 %v4633_v58 }
 0x12c   :  { %4410 = vmatprep.subr.bf16.mxu0 %v5188_v1 }
 0x1ce   :  { %v318_v18 = vpop.f32.mrf.mxu0 }
 0x1cf   :  { %v326_v20 = vadd.f32 %v325_v17, %v318_v18  ;;  %v5419_v18 = vsub.s32 2, %v5410_v15 }
 0x1d0   :  { %v4364_v21 = vpop.f32.mrf.mxu0 }
 0x1d1   :  { %v335_v22 = vadd.f32 %v3928_v19, %v326_v20 }
 0x1d2   :  { %v321_v23 = vpop.f32.mrf.mxu0 }
 0x1d3   :  { %v327_v24 = vadd.f32 %v325_v17, %v321_v23  ;;  %374 = vadd.xlane.f32.xlu1 %v335_v22  ;;  %v446_v17 = vld [vmem:[%s5863_s8] sm:$0x7] }
 0x1d4   :  { %v4365_v25 = vpop.f32.mrf.mxu0 }
 0x1d5   :  { %v336_v26 = vadd.f32 %v3928_v19, %v327_v24  ;;  %v455_v19 = vrot.slane %v446_v17, %v5413_v16  ;;  %v459_v24 = vrot.slane %v446_v17, %v5419_v18 }
 0x1d7   :  { %376 = vadd.xlane.f32.xlu1 %v336_v26 }
 0x25c   :  { %v375_v30 = vpop.xlane.xlu1 %374 }
 0x25d   :  { %v379_v31 = vmul.f32 0.0078125, %v375_v30 }
 0x25f   :  { %v5381_v32 = vsub.f32 %v335_v22, %v379_v31  ;;  %v5423_v22 = vsub.s32 0, %v5410_v15 }
 0x260   :  { %v377_v33 = vpop.xlane.xlu1 %376 }
 0x261   :  { %v380_v34 = vmul.f32 0.0078125, %v377_v33  ;;  %v383_v35 = vmul.f32 %v5381_v32, %v5381_v32  ;;  %v451_v28 = vrot.slane %v446_v17, %v5423_v22  ;;  %v5450_v53 = vrot.slane %v354_v52, %v5423_v22 }
 0x263   :  { %v5385_v36 = vsub.f32 %v336_v26, %v380_v34  ;;  %385 = vadd.xlane.f32.xlu0 %v383_v35 }
 0x265   :  { %v384_v37 = vmul.f32 %v5385_v36, %v5385_v36 }
 0x267   :  { %387 = vadd.xlane.f32.xlu1 %v384_v37 }
 0x2ec   :  { %v386_v59 = vpop.xlane.xlu0 %385 }
 0x2ed   :  { %v389_v60 = vmul.f32 0.0078125, %v386_v59 }
 0x2ef   :  { %v391_v61 = vadd.f32 1e-12, %v389_v60 }
 0x2f0   :  { %v388_v62 = vpop.xlane.xlu1 %387 }
 0x2f1   :  { %4850 = vrsqrt.f32 %v391_v61  ;;  %v390_v63 = vmul.f32 0.0078125, %v388_v62  ;;  %v5455_v61 = vrot.slane %v361_v57, %v5423_v22 }
 0x2f3   :  { %v392_v2 = vadd.f32 1e-12, %v390_v63 }
 0x2f5   :  { %4852 = vrsqrt.f32 %v392_v2 }
 0x2fe   :  { %v4851_v3 = vpop.eup %4850 }
 0x2ff   :  { %v395_v4 = vmul.f32 %v4851_v3, %v5381_v32 }
 0x301   :  { %v403_v8 = vmul.f32 %v3929_v5, %v395_v4 }
 0x302   :  { %v4853_v6 = vpop.eup %4852 }
 0x303   :  { %v396_v7 = vmul.f32 %v4853_v6, %v5385_v36  ;;  %v5399_v11 = vadd.f32 %v3930_v9, %v403_v8 }
 0x305   :  { %v404_v10 = vmul.f32 %v3929_v5, %v396_v7 }
 0x307   :  { %v5401_v13 = vadd.f32 %v3930_v9, %v404_v10 }
 0x309   :  { %v413_v14 = vpack.c.bf16 %v5401_v13, %v5399_v11 }
 0x30b   :  { %624 = vmatmul.mubr.bf16.vlgmr.msra.gmra.mxu1 %v413_v14  ;;  %4383 = vmatmul.mubr.bf16.vlgmr.msra.gmra.mxu0 %v413_v14 }
 0x30c   :  { %4388 = vmatprep.mubr.msk.bf16.mxu1 %vm5189_vm0, %v5188_v1  ;;  %4412 = vmatprep.mubr.msk.bf16.mxu0 %vm5189_vm0, %v5188_v1 }
 0x3cb   :  { %v625_v20 = vpop.f32.mrf.mxu1  ;;  %v668_v21 = vpop.f32.mrf.mxu0 }
 0x3cc   :  { %v626_v35 = vadd.f32 %v625_v20, %v451_v28  ;;  %v669_v38 = vadd.f32 %v668_v21, %v459_v24 }
 0x3cd   :  { %v627_v23 = vpop.f32.mrf.mxu1  ;;  %v4384_v12 = vpop.f32.mrf.mxu0 }
 0x3ce   :  { %v628_v25 = vadd.f32 %v627_v23, %v455_v19  ;;  %v675_v37 = vpack.c.bf16 %v626_v35, %v626_v35  ;;  %v5437_v41 = vpack.c.bf16 %v669_v38, %v669_v38 }
 0x3cf   :  { %v629_v26 = vpop.f32.mrf.mxu1  ;;  %v671_v27 = vpop.f32.mrf.mxu0 }
 0x3d0   :  { %v677_v29 = vpack.c.bf16 %v628_v25, %v628_v25  ;;  %v5427_v30 = vadd.f32 %v671_v27, %v459_v24  ;;  %v630_v40 = vadd.f32 %v629_v26, %v451_v28  ;;  %v804_v43 = vsel %vm802_vm5, %v5437_v41, 0 }
 0x3d1   :  { %v631_v31 = vpop.f32.mrf.mxu1  ;;  %v4385_v32 = vpop.f32.mrf.mxu0 }
 0x3d2   :  { %v686_v33 = vsel %vm681_vm4, %v677_v29, 0  ;;  %v632_v34 = vadd.f32 %v631_v31, %v455_v19  ;;  %v676_v42 = vpack.c.bf16 %v630_v40, %v630_v40  ;;  %v680_v27 = vpack.c.bf16 %v5427_v30, %v5427_v30 }
 0x3d3   :  { %4387 = vmatpush3.bf16.xpose.msra.mxu1 %v686_v33 }
 0x3d4   :  { %v678_v36 = vpack.c.bf16 %v632_v34, %v632_v34  ;;  %4392 = vmatprep.subr.bf16.mxu1 %v5188_v1  ;;  %v850_v31 = vsel %vm802_vm5, %v680_v27, 0 }
 0x3d6   :  { %957 = vrot.lane.b32.xlu0 %v678_v36, %s5179_s5  ;;  %v732_v39 = vsel %vm681_vm4, %v678_v36, 0 }
 0x3da   :  { %4389 = vmatmul.mubr.msk.bf16.vlgmr.msra.gmra.mxu1 %vm681_vm4, %v675_v37 }
 0x3db   :  { %4393 = vmatpush3.bf16.xpose.msra.mxu1 %v732_v39  ;;  %4394 = vmatprep.mubr.msk.bf16.mxu1 %vm5189_vm0, %v5188_v1 }
 0x3dc   :  { %4398 = vmatprep.subr.bf16.mxu1 %v5188_v1 }
 0x3e2   :  { %4395 = vmatmul.mubr.msk.bf16.vlgmr.msra.gmra.mxu1 %vm681_vm4, %v676_v42 }
 0x3e3   :  { %4399 = vmatpush3.bf16.msra.mxu1 %v804_v43  ;;  %4400 = vmatprep.mubr.msk.bf16.mxu1 %vm5189_vm0, %v5188_v1 }
 0x3e4   :  { %4404 = vmatprep.subr.bf16.mxu1 %v5188_v1 }
 0x448   :  { %v958_v35 = vpop.permute.xlu0 %957 }
 0x49a   :  { %v722_v55 = vpop.f32.mrf.mxu1 }
 0x49b   :  { %v723_v56 = vadd.f32 %v722_v55, %v5450_v53 }
 0x49c   :  { %v4390_v58 = vpop.f32.mrf.mxu1 }
 0x49d   :  { %v775_v59 = vsel %vm774_vm6, %v723_v56, -inf }
 0x49e   :  { %v725_v60 = vpop.f32.mrf.mxu1  ;;  %776 = vmax.xlane.f32.xlu1 %v775_v59 }
 0x4a0   :  { %v4391_v62 = vpop.f32.mrf.mxu1 }
 0x4a2   :  { %v768_v63 = vpop.f32.mrf.mxu1 }
 0x4a3   :  { %v769_v2 = vadd.f32 %v768_v63, %v5455_v61 }
 0x4a4   :  { %v4396_v3 = vpop.f32.mrf.mxu1 }
 0x4a5   :  { %v778_v4 = vsel %vm774_vm6, %v769_v2, -inf }
 0x4a6   :  { %v771_v5 = vpop.f32.mrf.mxu1  ;;  %779 = vmax.xlane.f32.xlu1 %v778_v4 }
 0x4a8   :  { %v4397_v6 = vpop.f32.mrf.mxu1 }
 0x527   :  { %v777_v7 = vpop.xlane.xlu1 %776 }
 0x528   :  { %v781_v8 = vsub.f32 %v723_v56, %v777_v7 }
 0x52a   :  { %v783_v9 = vmul.f32 1.442695, %v781_v8 }
 0x52c   :  { %4854 = vpow2.f32 %v783_v9 }
 0x52f   :  { %v780_v17 = vpop.xlane.xlu1 %779 }
 0x530   :  { %v782_v19 = vsub.f32 %v769_v2, %v780_v17 }
 0x532   :  { %v785_v20 = vmul.f32 1.442695, %v782_v19 }
 0x534   :  { %4856 = vpow2.f32 %v785_v20 }
 0x539   :  { %v4855_v10 = vpop.eup %4854 }
 0x53a   :  { %v787_v14 = vsel %vm774_vm6, %v4855_v10, 0.0 }
 0x53b   :  { %788 = vadd.xlane.f32.xlu1 %v787_v14 }
 0x541   :  { %v4857_v21 = vpop.eup %4856 }
 0x542   :  { %v790_v23 = vsel %vm774_vm6, %v4857_v21, 0.0 }
 0x54c   :  { %905 = vrot.lane.b32.xlu1 %v677_v29, %s5179_s5 }
 0x570   :  { %791 = vadd.xlane.f32.xlu1 %v790_v23 }
 0x581   :  { %902 = vrot.lane.b32.xlu1 %v675_v37, %s5179_s5  ;;  %v963_v37 = vsel %vm681_vm4, %v958_v35, 0 }
 0x585   :  { %954 = vrot.lane.b32.xlu1 %v676_v42, %s5179_s5 }
 0x5c4   :  { %v789_v12 = vpop.xlane.xlu1 %788 }
 0x5c5   :  { %4858 = vrcp.f32 %v789_v12 }
 0x5c8   :  { %v906_v24 = vpop.permute.xlu1 %905 }
 0x5c9   :  { %v911_v25 = vsel %vm681_vm4, %v906_v24, 0 }
 0x5ca   :  { %4411 = vmatpush3.bf16.xpose.msra.mxu0 %v911_v25 }
 0x5cb   :  { %4422 = vmatprep.subr.bf16.mxu0 %v5188_v1 }
 0x5d2   :  { %v4859_v26 = vpop.eup %4858 }
 0x5d3   :  { %v795_v28 = vmul.f32 %v4859_v26, %v4855_v10 }
 0x5d5   :  { %v797_v29 = vpack.c.bf16 %v795_v28, %v795_v28  ;;  %v4634_v28 = vld [vmem:[#allocation10 + $0x38] sm:$0xff]  }
 0x5d7   :  { %4401 = vmatmul.mubr.msk.bf16.vlgmr.msra.gmra.mxu1 %vm774_vm6, %v797_v29  ;;  %v4635_v29 = vld [vmem:[#allocation10 + $0x30] sm:$0xff]  }
 0x5d8   :  { %4405 = vmatpush3.bf16.msra.mxu1 %v850_v31  ;;  %4406 = vmatprep.mubr.msk.bf16.mxu1 %vm5189_vm0, %v5188_v1  ;;  %v4636_v31 = vld [vmem:[#allocation10 + $0x28] sm:$0xff]  }
 0x5d9   :  { %4416 = vmatprep.subr.bf16.mxu1 %v5188_v1 }
 0x5f9   :  { %v792_v32 = vpop.xlane.xlu1 %791 }
 0x5fa   :  { %4860 = vrcp.f32 %v792_v32  ;;  %v4637_v32 = vld [vmem:[#allocation10 + $0x20] sm:$0xff]  }
 0x5fd   :  { %v903_v33 = vpop.permute.xlu1 %902 }
 0x5fe   :  { %4413 = vmatmul.mubr.msk.bf16.vlgmr.msra.gmra.mxu0 %vm681_vm4, %v903_v33 }
 0x5ff   :  { %4424 = vmatprep.mubr.msk.bf16.mxu0 %vm5189_vm0, %v5188_v1 }
 0x601   :  { %v955_v38 = vpop.permute.xlu1 %954 }
 0x607   :  { %v4861_v30 = vpop.eup %4860 }
 0x608   :  { %v796_v34 = vmul.f32 %v4861_v30, %v4857_v21 }
 0x60a   :  { %v798_v36 = vpack.c.bf16 %v796_v34, %v796_v34 }
 0x60c   :  { %4407 = vmatmul.mubr.msk.bf16.vlgmr.msra.gmra.mxu1 %vm774_vm6, %v798_v36 }
 0x60d   :  { %4417 = vmatpush3.bf16.xpose.msra.mxu1 %v963_v37  ;;  %4418 = vmatprep.mubr.msk.bf16.mxu1 %vm5189_vm0, %v5188_v1  ;;  %v4638_v37 = vld [vmem:[#allocation10 + $0x18] sm:$0xff]  }
 0x60e   :  { %4428 = vmatprep.subr.bf16.mxu1 %v5188_v1 }
 0x614   :  { %4419 = vmatmul.mubr.msk.bf16.vlgmr.msra.gmra.mxu1 %vm681_vm4, %v955_v38 }
 0x615   :  { %4430 = vmatprep.mubr.msk.bf16.mxu1 %vm5189_vm0, %v5188_v1 }
 0x697   :  { %v5484_v39 = vpop.f32.mrf.mxu1 }
 0x699   :  { %v4402_v40 = vpop.f32.mrf.mxu1 }
 0x69b   :  { %v843_v42 = vpop.f32.mrf.mxu1 }
 0x69d   :  { %v4403_v43 = vpop.f32.mrf.mxu1 }
 0x69e   :  { %v4639_v43 = vld [vmem:[#allocation10 + $0x10] sm:$0xff]  }
 0x6be   :  { %v947_v44 = vpop.f32.mrf.mxu0 }
 0x6bf   :  { %v948_v45 = vadd.f32 %v947_v44, %v5450_v53 }
 0x6c0   :  { %v4414_v46 = vpop.f32.mrf.mxu0 }
 0x6c1   :  { %v1005_v47 = vsel %vm774_vm6, %v948_v45, -inf  ;;  %v4641_v46 = vld [vmem:[#allocation10] sm:$0xff]  }
 0x6c2   :  { %1006 = vmax.xlane.f32.xlu1 %v1005_v47  ;;  %v950_v48 = vpop.f32.mrf.mxu0 }
 0x6c4   :  { %v4415_v49 = vpop.f32.mrf.mxu0 }
 0x6cc   :  { %v5488_v50 = vpop.f32.mrf.mxu1 }
 0x6cd   :  { %v892_v51 = vpack.c.bf16 %v5488_v50, %v5484_v39  ;;  %v4642_v50 = vld [vmem:[#allocation13 + $0xe0] ss:$16 sps:$4 sm:$0xff]  }
 0x6ce   :  { %v4408_v52 = vpop.f32.mrf.mxu1 }
 0x6d0   :  { %v889_v54 = vpop.f32.mrf.mxu1 }
 0x6d2   :  { %v4409_v55 = vpop.f32.mrf.mxu1 }
 0x6d3   :  { %v3973_v55 = vld [vmem:[#allocation11] ss:$0 sm:$0xff] }
 0x6d4   :  { %v999_v56 = vpop.f32.mrf.mxu1 }
 0x6d5   :  { %v1000_v57 = vadd.f32 %v999_v56, %v5455_v61 }
 0x6d6   :  { %v4420_v58 = vpop.f32.mrf.mxu1 }
 0x6d7   :  { %v1008_v59 = vsel %vm774_vm6, %v1000_v57, -inf }
 0x6d8   :  { %1009 = vmax.xlane.f32.xlu0 %v1008_v59  ;;  %v1002_v60 = vpop.f32.mrf.mxu1 }
 0x6da   :  { %v4421_v62 = vpop.f32.mrf.mxu1 }
 0x74b   :  { %v1007_v63 = vpop.xlane.xlu1 %1006 }
 0x74c   :  { %v1011_v2 = vsub.f32 %v948_v45, %v1007_v63  ;;  %v4640_v45 = vld [vmem:[#allocation10 + $0x8] sm:$0xff]  }
 0x74e   :  { %v1013_v3 = vmul.f32 1.442695, %v1011_v2 }
 0x750   :  { %4862 = vpow2.f32 %v1013_v3  ;;  %v4645_v3 = vld [vmem:[#allocation13 + $0xe8] ss:$16 sps:$4 sm:$0xff]  }
 0x75d   :  { %v4863_v4 = vpop.eup %4862 }
 0x75e   :  { %v1017_v5 = vsel %vm774_vm6, %v4863_v4, 0.0 }
 0x75f   :  { %1018 = vadd.xlane.f32.xlu1 %v1017_v5 }
 0x761   :  { %v1010_v6 = vpop.xlane.xlu0 %1009 }
 0x762   :  { %v1012_v7 = vsub.f32 %v1000_v57, %v1010_v6 }
 0x764   :  { %v1015_v8 = vmul.f32 1.442695, %v1012_v7 }
 0x766   :  { %4864 = vpow2.f32 %v1015_v8 }
 0x770   :  { %1030 = vrot.lane.b32.xlu1 %v5437_v41, %s5179_s5 }
 0x773   :  { %v4865_v9 = vpop.eup %4864 }
 0x774   :  { %v1020_v10 = vsel %vm774_vm6, %v4865_v9, 0.0 }
 0x775   :  { %1021 = vadd.xlane.f32.xlu0 %v1020_v10 }
 0x78b   :  { %1079 = vrot.lane.b32.xlu0 %v680_v27, %s5179_s5 }
 0x7e8   :  { %v1019_v14 = vpop.xlane.xlu1 %1018 }
 0x7e9   :  { %4866 = vrcp.f32 %v1019_v14  ;;  %v4650_v14 = vld [vmem:[#allocation13 + $0xc4] ss:$16 sps:$4 sm:$0xff]  }
 0x7ec   :  { %v1031_v17 = vpop.permute.xlu1 %1030 }
 0x7ed   :  { %v1036_v19 = vsel %vm802_vm5, %v1031_v17, 0  ;;  %v4653_v17 = vld [vmem:[#allocation13 + $0xcc] ss:$16 sps:$4 sm:$0xff]  }
 0x7ee   :  { %4423 = vmatpush3.bf16.msra.mxu0 %v1036_v19  ;;  %v4648_v19 = vld [vmem:[#allocation13 + $0xc0] ss:$16 sps:$4 sm:$0xff]  }
 0x7f6   :  { %v4867_v20 = vpop.eup %4866 }
 0x7f7   :  { %v1025_v21 = vmul.f32 %v4867_v20, %v4863_v4  ;;  %v4647_v4 = vld [vmem:[#allocation13 + $0xec] ss:$16 sps:$4 sm:$0xff]   ;;  %v4651_v20 = vld [vmem:[#allocation13 + $0xc8] ss:$16 sps:$4 sm:$0xff]  }
 0x7f9   :  { %v1027_v23 = vpack.c.bf16 %v1025_v21, %v1025_v21  ;;  %v4656_v21 = vld [vmem:[#allocation13 + $0xa4] ss:$16 sps:$4 sm:$0xff]  }
 0x7fb   :  { %4425 = vmatmul.mubr.msk.bf16.vlgmr.msra.gmra.mxu0 %vm774_vm6, %v1027_v23  ;;  %v4659_v23 = vld [vmem:[#allocation13 + $0xac] ss:$16 sps:$4 sm:$0xff]  }
 0x7fc   :  { %1571 = vmatprep.mubr.bf16.mxu0 %v5187_v0 }
 0x7fe   :  { %v1022_v41 = vpop.xlane.xlu0 %1021 }
 0x7ff   :  { %4868 = vrcp.f32 %v1022_v41  ;;  %v4654_v41 = vld [vmem:[#allocation13 + $0xa0] ss:$16 sps:$4 sm:$0xff]  }
 0x802   :  { %v1080_v12 = vpop.permute.xlu0 %1079 }
 0x803   :  { %v1085_v24 = vsel %vm802_vm5, %v1080_v12, 0  ;;  %v4657_v12 = vld [vmem:[#allocation13 + $0xa8] ss:$16 sps:$4 sm:$0xff]  }
 0x804   :  { %4429 = vmatpush3.bf16.msra.mxu1 %v1085_v24  ;;  %v4660_v24 = vld [vmem:[#allocation13 + $0x80] ss:$16 sps:$4 sm:$0xff]  }
 0x805   :  { %4434 = vmatprep.subr.bf16.mxu1 %v5188_v1 }
 0x80c   :  { %v4869_v25 = vpop.eup %4868 }
 0x80d   :  { %v1026_v26 = vmul.f32 %v4869_v25, %v4865_v9  ;;  %v4662_v25 = vld [vmem:[#allocation13 + $0x84] ss:$16 sps:$4 sm:$0xff]  }
 0x80f   :  { %v1028_v27 = vpack.c.bf16 %v1026_v26, %v1026_v26  ;;  %v4663_v26 = vld [vmem:[#allocation13 + $0x88] ss:$16 sps:$4 sm:$0xff]  }
 0x811   :  { %4431 = vmatmul.mubr.msk.bf16.vlgmr.msra.gmra.mxu1 %vm774_vm6, %v1028_v27  ;;  %v4665_v27 = vld [vmem:[#allocation13 + $0x8c] ss:$16 sps:$4 sm:$0xff]  }
 0x812   :  { %4442 = vmatprep.mubr.msk.bf16.mxu1 %vm5189_vm0, %v5188_v1  ;;  %4435 = vmatpush3.bf16.msra.mxu1 %v4634_v28  ;;  %v4668_v28 = vld [vmem:[#allocation13 + $0x64] ss:$16 sps:$4 sm:$0xff]  }
 0x813   :  { %4436 = vmatprep.subr.bf16.mxu1 %v5188_v1 }
 0x816   :  { %4437 = vmatpush3.bf16.msra.mxu1 %v4635_v29  ;;  %v4671_v29 = vld [vmem:[#allocation13 + $0x6c] ss:$16 sps:$4 sm:$0xff]  }
 0x817   :  { %4438 = vmatprep.subr.bf16.mxu1 %v5188_v1 }
 0x81a   :  { %4439 = vmatpush3.bf16.msra.mxu1 %v4636_v31  ;;  %v4666_v31 = vld [vmem:[#allocation13 + $0x60] ss:$16 sps:$4 sm:$0xff]  }
 0x81b   :  { %4440 = vmatprep.subr.bf16.mxu1 %v5188_v1 }
 0x81e   :  { %4441 = vmatpush3.bf16.msra.mxu1 %v4637_v32  ;;  %v4669_v32 = vld [vmem:[#allocation13 + $0x68] ss:$16 sps:$4 sm:$0xff]  }
 0x81f   :  { %4446 = vmatprep.subr.bf16.mxu1 %v5188_v1 }
 0x8bb   :  { %v1072_v33 = vpop.f32.mrf.mxu0 }
 0x8bd   :  { %v4426_v30 = vpop.f32.mrf.mxu0 }
 0x8be   :  { %v4677_v30 = vld [vmem:[#allocation13 + $0x4c] ss:$16 sps:$4 sm:$0xff]  }
 0x8bf   :  { %v1075_v34 = vpop.f32.mrf.mxu0 }
 0x8c0   :  { %v4672_v34 = vld [vmem:[#allocation13 + $0x40] ss:$16 sps:$4 sm:$0xff]  }
 0x8c1   :  { %v4427_v35 = vpop.f32.mrf.mxu0 }
 0x8c2   :  { %v4675_v35 = vld [vmem:[#allocation13 + $0x48] ss:$16 sps:$4 sm:$0xff]  }
 0x8d1   :  { %v1121_v36 = vpop.f32.mrf.mxu1 }
 0x8d2   :  { %v1127_v38 = vpack.c.bf16 %v1121_v36, %v1072_v33  ;;  %v4674_v33 = vld [vmem:[#allocation13 + $0x44] ss:$16 sps:$4 sm:$0xff]  }
 0x8d3   :  { %v4432_v40 = vpop.f32.mrf.mxu1  ;;  %v4680_v36 = vld [vmem:[#allocation13 + $0x24] ss:$16 sps:$4 sm:$0xff]  }
 0x8d4   :  { %4443 = vmatmul.mubr.msk.bf16.vlgmr.msra.gmra.mxu1 %vm681_vm4, %v1127_v38  ;;  %v4678_v38 = vld [vmem:[#allocation13 + $0x20] ss:$16 sps:$4 sm:$0xff]   ;;  %v4681_v40 = vld [vmem:[#allocation13 + $0x28] ss:$16 sps:$4 sm:$0xff]  }
 0x8d5   :  { %4447 = vmatpush3.bf16.msra.mxu1 %v4638_v37  ;;  %v1124_v42 = vpop.f32.mrf.mxu1  ;;  %4454 = vmatprep.mubr.msk.bf16.mxu1 %vm5189_vm0, %v5188_v1  ;;  %v4683_v37 = vld [vmem:[#allocation13 + $0x2c] ss:$16 sps:$4 sm:$0xff]  }
 0x8d6   :  { %4448 = vmatprep.subr.bf16.mxu1 %v5188_v1  ;;  %v4686_v42 = vld [vmem:[#allocation13 + $0x4] ss:$16 sps:$4 sm:$0xff]  }
 0x8d7   :  { %v4433_v44 = vpop.f32.mrf.mxu1 }
 0x8d8   :  { %v4684_v44 = vld [vmem:[#allocation13] ss:$16 sps:$4 sm:$0xff]  }
 0x8d9   :  { %4449 = vmatpush3.bf16.msra.mxu1 %v4639_v43  ;;  %v4689_v43 = vld [vmem:[#allocation13 + $0xc] ss:$16 sps:$4 sm:$0xff]  }
 0x8da   :  { %4450 = vmatprep.subr.bf16.mxu1 %v5188_v1 }
 0x8dd   :  { %4451 = vmatpush3.bf16.msra.mxu1 %v4640_v45  ;;  %v4687_v45 = vld [vmem:[#allocation13 + $0x8] ss:$16 sps:$4 sm:$0xff]  }
 0x8de   :  { %4452 = vmatprep.subr.bf16.mxu1 %v5188_v1 }
 0x8e1   :  { %4453 = vmatpush3.bf16.msra.mxu1 %v4641_v46 }
 0x8e2   :  { %1582 = vmatprep.subr.bf16.mxu1 %v4647_v4  ;;  %v4692_v4 = vld [vmem:[#allocation14 + $0x38] sm:$0xff]  }
 0x8e4   :  { %4455 = vmatmul.mubr.msk.bf16.vlgmr.msra.gmra.mxu1 %vm681_vm4, %v892_v51  ;;  %v4644_v51 = vld [vmem:[#allocation13 + $0xe4] ss:$16 sps:$4 sm:$0xff]  }
 0x8e5   :  { %1614 = vmatprep.mubr.bf16.mxu1 %v5187_v0  ;;  %1539 = vmatprep.subr.bf16.mxu0 %v4644_v51  ;;  %v4690_v51 = vld [vmem:[#allocation14 + $0x78] sm:$0xff]  }
 0x8e6   :  { %1540 = vmatpush1.bf16.msra.mxu0 %v4642_v50  ;;  %1583 = vmatpush1.bf16.msra.mxu1 %v4645_v3  ;;  %v4691_v3 = vld [vmem:[#allocation14 + $0xf8] sm:$0xff]  }
 0x8e7   :  { %1541 = vmatprep.subr.bf16.mxu0 %v4650_v14  ;;  %1584 = vmatprep.subr.bf16.mxu1 %v4653_v17  ;;  %v4701_v14 = vld [vmem:[#allocation14 + $0xa8] sm:$0xff]   ;;  %v4702_v17 = vld [vmem:[#allocation14 + $0x60] sm:$0xff]  }
 0x8ea   :  { %1542 = vmatpush1.bf16.msra.mxu0 %v4648_v19  ;;  %1585 = vmatpush1.bf16.msra.mxu1 %v4651_v20  ;;  %v4703_v19 = vld [vmem:[#allocation14 + $0xe0] sm:$0xff]  }
 0x8eb   :  { %1543 = vmatprep.subr.bf16.mxu0 %v4656_v21  ;;  %1586 = vmatprep.subr.bf16.mxu1 %v4659_v23  ;;  %v4704_v20 = vld [vmem:[#allocation14 + $0x20] sm:$0xff]   ;;  %v4706_v23 = vld [vmem:[#allocation14 + $0x58] sm:$0xff]  }
 0x8ec   :  { %v4705_v21 = vld [vmem:[#allocation14 + $0xa0] sm:$0xff]  }
 0x8ee   :  { %1544 = vmatpush1.bf16.msra.mxu0 %v4654_v41  ;;  %1587 = vmatpush1.bf16.msra.mxu1 %v4657_v12  ;;  %v4707_v41 = vld [vmem:[#allocation14 + $0xd8] sm:$0xff]  }
 0x8ef   :  { %1545 = vmatprep.subr.bf16.mxu0 %v4662_v25  ;;  %1588 = vmatprep.subr.bf16.mxu1 %v4665_v27  ;;  %v4708_v12 = vld [vmem:[#allocation14 + $0x18] sm:$0xff]   ;;  %v4710_v25 = vld [vmem:[#allocation14 + $0x50] sm:$0xff]  }
 0x8f0   :  { %v4712_v27 = vld [vmem:[#allocation14 + $0x10] sm:$0xff]  }
 0x8f2   :  { %1546 = vmatpush1.bf16.msra.mxu0 %v4660_v24  ;;  %1589 = vmatpush1.bf16.msra.mxu1 %v4663_v26  ;;  %v4709_v24 = vld [vmem:[#allocation14 + $0x98] sm:$0xff]   ;;  %v4711_v26 = vld [vmem:[#allocation14 + $0xd0] sm:$0xff]  }
 0x8f3   :  { %1547 = vmatprep.subr.bf16.mxu0 %v4668_v28  ;;  %1590 = vmatprep.subr.bf16.mxu1 %v4671_v29  ;;  %v4713_v28 = vld [vmem:[#allocation14 + $0x90] sm:$0xff]   ;;  %v4714_v29 = vld [vmem:[#allocation14 + $0x48] sm:$0xff]  }
 0x8f6   :  { %1548 = vmatpush1.bf16.msra.mxu0 %v4666_v31  ;;  %1591 = vmatpush1.bf16.msra.mxu1 %v4669_v32  ;;  %v4715_v31 = vld [vmem:[#allocation14 + $0xc8] sm:$0xff]  }
 0x8f7   :  { %1549 = vmatprep.subr.bf16.mxu0 %v4674_v33  ;;  %1592 = vmatprep.subr.bf16.mxu1 %v4677_v30  ;;  %v4716_v32 = vld [vmem:[#allocation14 + $0x8] sm:$0xff]   ;;  %v4718_v30 = vld [vmem:[#allocation14 + $0x40] sm:$0xff]  }
 0x8f8   :  { %v4717_v33 = vld [vmem:[#allocation14 + $0x88] sm:$0xff]  }
 0x8fa   :  { %1550 = vmatpush1.bf16.msra.mxu0 %v4672_v34  ;;  %1593 = vmatpush1.bf16.msra.mxu1 %v4675_v35  ;;  %v4719_v34 = vld [vmem:[#allocation14 + $0xc0] sm:$0xff]  }
 0x8fb   :  { %1551 = vmatprep.subr.bf16.mxu0 %v4680_v36  ;;  %1594 = vmatprep.subr.bf16.mxu1 %v4683_v37  ;;  %v4720_v35 = vld [vmem:[#allocation14] sm:$0xff]   ;;  %v1357_v37 = vld [vmem:[%s5869_s14] sm:$0xf] }
 0x8fc   :  { %v4721_v36 = vld [vmem:[#allocation14 + $0x80] sm:$0xff]  }
 0x8fe   :  { %1552 = vmatpush1.bf16.msra.mxu0 %v4678_v38  ;;  %1595 = vmatpush1.bf16.msra.mxu1 %v4681_v40  ;;  %v1373_v38 = vsub.s32 3, %v5410_v15  ;;  %v1362_v40 = vrot.slane %v1357_v37, %v5423_v22 }
 0x8ff   :  { %1553 = vmatprep.subr.bf16.mxu0 %v4686_v42  ;;  %1596 = vmatprep.subr.bf16.mxu1 %v4689_v43  ;;  %v1370_v42 = vrot.slane %v1357_v37, %v5419_v18  ;;  %v1366_v43 = vrot.slane %v1357_v37, %v5413_v16 }
 0x902   :  { %1554 = vmatpush1.bf16.msra.mxu0 %v4684_v44  ;;  %1597 = vmatpush1.bf16.msra.mxu1 %v4687_v45  ;;  %v1374_v44 = vrot.slane %v1357_v37, %v1373_v38 }
 0x903   :  { %4214 = vmatprep.subr.bf16.mxu0 %v4690_v51  ;;  %4236 = vmatprep.subr.bf16.mxu1 %v4691_v3 }
 0x994   :  { %v1198_v47 = vpop.f32.mrf.mxu1 }
 0x996   :  { %v4444_v48 = vpop.f32.mrf.mxu1 }
 0x998   :  { %v1201_v49 = vpop.f32.mrf.mxu1 }
 0x99a   :  { %v4445_v52 = vpop.f32.mrf.mxu1 }
 0x9a4   :  { %v1266_v54 = vpop.f32.mrf.mxu1 }
 0x9a5   :  { %v1267_v56 = vadd.f32 %v1266_v54, %v1198_v47 }
 0x9a6   :  { %v4456_v57 = vpop.f32.mrf.mxu1 }
 0x9a7   :  { %v1280_v58 = vadd.f32 %v3973_v55, %v1267_v56  ;;  %v3974_v57 = vld [vmem:[%s5866_s11] ss:$0 sm:$0xff] }
 0x9a8   :  { %v1269_v59 = vpop.f32.mrf.mxu1 }
 0x9a9   :  { %v1270_v60 = vadd.f32 %v1269_v59, %v1201_v49  ;;  %v1282_v62 = vadd.f32 %v1280_v58, %v5399_v11 }
 0x9aa   :  { %v4457_v63 = vpop.f32.mrf.mxu1 }
 0x9ab   :  { %v1281_v2 = vadd.f32 %v3973_v55, %v1270_v60  ;;  %1286 = vadd.xlane.f32.xlu1 %v1282_v62 }
 0x9ad   :  { %v1283_v39 = vadd.f32 %v1281_v2, %v5401_v13 }
 0x9af   :  { %1288 = vadd.xlane.f32.xlu0 %v1283_v39 }
 0xa34   :  { %v1287_v5 = vpop.xlane.xlu1 %1286 }
 0xa35   :  { %v1290_v6 = vmul.f32 0.0078125, %v1287_v5  ;;  %v4693_v5 = vld [vmem:[#allocation14 + $0xb8] sm:$0xff]  }
 0xa37   :  { %v5524_v7 = vsub.f32 %v1282_v62, %v1290_v6  ;;  %v3975_v62 = vld [vmem:[%s5867_s12] ss:$0 sm:$0xff]  ;;  %v4694_v6 = vld [vmem:[#allocation14 + $0x70] sm:$0xff]  }
 0xa38   :  { %v1289_v8 = vpop.xlane.xlu0 %1288 }
 0xa39   :  { %v1291_v11 = vmul.f32 0.0078125, %v1289_v8  ;;  %v1294_v9 = vmul.f32 %v5524_v7, %v5524_v7  ;;  %v4696_v8 = vld [vmem:[#allocation14 + $0x30] sm:$0xff]  }
 0xa3b   :  { %v5528_v10 = vsub.f32 %v1283_v39, %v1291_v11  ;;  %1296 = vadd.xlane.f32.xlu1 %v1294_v9  ;;  %v4697_v11 = vld [vmem:[#allocation14 + $0xb0] sm:$0xff]   ;;  %v4698_v9 = vld [vmem:[#allocation14 + $0x68] sm:$0xff]  }
 0xa3d   :  { %v1295_v13 = vmul.f32 %v5528_v10, %v5528_v10 }
 0xa3f   :  { %1298 = vadd.xlane.f32.xlu0 %v1295_v13  ;;  %v4700_v13 = vld [vmem:[#allocation14 + $0x28] sm:$0xff]  }
 0xac4   :  { %v1297_v46 = vpop.xlane.xlu1 %1296 }
 0xac5   :  { %v1300_v47 = vmul.f32 0.0078125, %v1297_v46 }
 0xac7   :  { %v1302_v48 = vadd.f32 1e-12, %v1300_v47 }
 0xac8   :  { %v1299_v49 = vpop.xlane.xlu0 %1298 }
 0xac9   :  { %4870 = vrsqrt.f32 %v1302_v48  ;;  %v1301_v52 = vmul.f32 0.0078125, %v1299_v49 }
 0xacb   :  { %v1303_v54 = vadd.f32 1e-12, %v1301_v52 }
 0xacd   :  { %4872 = vrsqrt.f32 %v1303_v54 }
 0xad6   :  { %v4871_v55 = vpop.eup %4870 }
 0xad7   :  { %v1306_v56 = vmul.f32 %v4871_v55, %v5524_v7  ;;  %v4695_v7 = vld [vmem:[#allocation14 + $0xf0] sm:$0xff]  }
 0xad9   :  { %v1314_v60 = vmul.f32 %v3974_v57, %v1306_v56 }
 0xada   :  { %v4873_v58 = vpop.eup %4872 }
 0xadb   :  { %v1307_v59 = vmul.f32 %v4873_v58, %v5528_v10  ;;  %v5540_v2 = vadd.f32 %v3975_v62, %v1314_v60  ;;  %v4699_v10 = vld [vmem:[#allocation14 + $0xe8] sm:$0xff]  }
 0xadd   :  { %v1315_v63 = vmul.f32 %v3974_v57, %v1307_v59 }
 0xadf   :  { %v5542_v39 = vadd.f32 %v3975_v62, %v1315_v63 }
 0xae1   :  { %v1324_v50 = vpack.c.bf16 %v5542_v39, %v5540_v2 }
 0xae3   :  { %1572 = vmatmul.mubr.bf16.vlgmr.msra.gmra.mxu0 %v1324_v50  ;;  %1615 = vmatmul.mubr.bf16.vlgmr.msra.gmra.mxu1 %v1324_v50 }
 0xae4   :  { %4215 = vmatpush3.bf16.msra.mxu0 %v4692_v4  ;;  %4237 = vmatpush3.bf16.msra.mxu1 %v4693_v5 }
 0xae5   :  { %4216 = vmatprep.subr.bf16.mxu0 %v4694_v6  ;;  %4238 = vmatprep.subr.bf16.mxu1 %v4695_v7 }
 0xae8   :  { %4217 = vmatpush3.bf16.msra.mxu0 %v4696_v8  ;;  %4239 = vmatpush3.bf16.msra.mxu1 %v4697_v11 }
 0xae9   :  { %4218 = vmatprep.subr.bf16.mxu0 %v4698_v9  ;;  %4240 = vmatprep.subr.bf16.mxu1 %v4699_v10 }
 0xaec   :  { %4219 = vmatpush3.bf16.msra.mxu0 %v4700_v13  ;;  %4241 = vmatpush3.bf16.msra.mxu1 %v4701_v14 }
 0xaed   :  { %4220 = vmatprep.subr.bf16.mxu0 %v4702_v17  ;;  %4242 = vmatprep.subr.bf16.mxu1 %v4703_v19 }
 0xaf0   :  { %4221 = vmatpush3.bf16.msra.mxu0 %v4704_v20  ;;  %4243 = vmatpush3.bf16.msra.mxu1 %v4705_v21 }
 0xaf1   :  { %4222 = vmatprep.subr.bf16.mxu0 %v4706_v23  ;;  %4244 = vmatprep.subr.bf16.mxu1 %v4707_v41 }
 0xaf4   :  { %4223 = vmatpush3.bf16.msra.mxu0 %v4708_v12  ;;  %4245 = vmatpush3.bf16.msra.mxu1 %v4709_v24 }
 0xaf5   :  { %4224 = vmatprep.subr.bf16.mxu0 %v4710_v25  ;;  %4246 = vmatprep.subr.bf16.mxu1 %v4711_v26 }
 0xaf8   :  { %4225 = vmatpush3.bf16.msra.mxu0 %v4712_v27  ;;  %4247 = vmatpush3.bf16.msra.mxu1 %v4713_v28 }
 0xaf9   :  { %4226 = vmatprep.subr.bf16.mxu0 %v4714_v29  ;;  %4248 = vmatprep.subr.bf16.mxu1 %v4715_v31 }
 0xafc   :  { %4227 = vmatpush3.bf16.msra.mxu0 %v4716_v32  ;;  %4249 = vmatpush3.bf16.msra.mxu1 %v4717_v33 }
 0xafd   :  { %4228 = vmatprep.subr.bf16.mxu0 %v4718_v30  ;;  %4250 = vmatprep.subr.bf16.mxu1 %v4719_v34 }
 0xb00   :  { %4229 = vmatpush3.bf16.msra.mxu0 %v4720_v35  ;;  %4251 = vmatpush3.bf16.msra.mxu1 %v4721_v36 }
 0xb01   :  { %4458 = vmatprep.subr.bf16.mxu1 %v5188_v1 }
 0xba3   :  { %v1573_v45 = vpop.f32.mrf.mxu0  ;;  %v1616_v46 = vpop.f32.mrf.mxu1 }
 0xba4   :  { %v5556_v47 = vadd.f32 %v1573_v45, %v1362_v40  ;;  %v5558_v48 = vadd.f32 %v1616_v46, %v1370_v42 }
 0xba5   :  { %v1575_v49 = vpop.f32.mrf.mxu0  ;;  %v1618_v52 = vpop.f32.mrf.mxu1 }
 0xba6   :  { %v1625_v54 = vmul.f32 %v5556_v47, %v5556_v47  ;;  %v1627_v55 = vmul.f32 %v5558_v48, %v5558_v48  ;;  %v5564_v56 = vadd.f32 %v1575_v49, %v1366_v43  ;;  %v5566_v57 = vadd.f32 %v1618_v52, %v1374_v44 }
 0xba7   :  { %v1577_v58 = vpop.f32.mrf.mxu0  ;;  %v1620_v59 = vpop.f32.mrf.mxu1 }
 0xba8   :  { %v1633_v60 = vmul.f32 %v1625_v54, %v5556_v47  ;;  %v1635_v62 = vmul.f32 %v1627_v55, %v5558_v48  ;;  %v1626_v63 = vmul.f32 %v5564_v56, %v5564_v56  ;;  %v1628_v50 = vmul.f32 %v5566_v57, %v5566_v57 }
 0xba9   :  { %v5574_v51 = vadd.f32 %v1577_v58, %v1362_v40  ;;  %v5576_v3 = vadd.f32 %v1620_v59, %v1370_v42  ;;  %v1579_v4 = vpop.f32.mrf.mxu0  ;;  %v1622_v5 = vpop.f32.mrf.mxu1 }
 0xbaa   :  { %v1641_v6 = vmul.f32 0.044715, %v1633_v60  ;;  %v1643_v7 = vmul.f32 0.044715, %v1635_v62  ;;  %v1634_v8 = vmul.f32 %v1626_v63, %v5564_v56  ;;  %v1636_v11 = vmul.f32 %v1628_v50, %v5566_v57 }
 0xbab   :  { %v1629_v9 = vmul.f32 %v5574_v51, %v5574_v51  ;;  %v1631_v10 = vmul.f32 %v5576_v3, %v5576_v3  ;;  %v5584_v13 = vadd.f32 %v1579_v4, %v1366_v43  ;;  %v5586_v14 = vadd.f32 %v1622_v5, %v1374_v44 }
 0xbac   :  { %v1649_v17 = vadd.f32 %v1641_v6, %v5556_v47  ;;  %v1651_v19 = vadd.f32 %v1643_v7, %v5558_v48  ;;  %v1642_v20 = vmul.f32 0.044715, %v1634_v8  ;;  %v1644_v21 = vmul.f32 0.044715, %v1636_v11 }
 0xbad   :  { %v1637_v23 = vmul.f32 %v1629_v9, %v5574_v51  ;;  %v1639_v41 = vmul.f32 %v1631_v10, %v5576_v3  ;;  %v1630_v12 = vmul.f32 %v5584_v13, %v5584_v13  ;;  %v1632_v24 = vmul.f32 %v5586_v14, %v5586_v14 }
 0xbae   :  { %v1657_v25 = vmul.f32 0.7978846, %v1649_v17  ;;  %v1659_v26 = vmul.f32 0.7978846, %v1651_v19  ;;  %v1650_v27 = vadd.f32 %v1642_v20, %v5564_v56  ;;  %v1652_v28 = vadd.f32 %v1644_v21, %v5566_v57 }
 0xbaf   :  { %v1645_v29 = vmul.f32 0.044715, %v1637_v23  ;;  %v1647_v31 = vmul.f32 0.044715, %v1639_v41  ;;  %v1638_v32 = vmul.f32 %v1630_v12, %v5584_v13  ;;  %v1640_v33 = vmul.f32 %v1632_v24, %v5586_v14 }
 0xbb0   :  { %4874 = vtanh.f32 %v1657_v25  ;;  %v1658_v30 = vmul.f32 0.7978846, %v1650_v27  ;;  %v1660_v34 = vmul.f32 0.7978846, %v1652_v28 }
 0xbb1   :  { %4876 = vtanh.f32 %v1659_v26  ;;  %v1653_v35 = vadd.f32 %v1645_v29, %v5574_v51  ;;  %v1655_v36 = vadd.f32 %v1647_v31, %v5576_v3  ;;  %v1646_v37 = vmul.f32 0.044715, %v1638_v32 }
 0xbb2   :  { %4878 = vtanh.f32 %v1658_v30  ;;  %v1648_v40 = vmul.f32 0.044715, %v1640_v33 }
 0xbb3   :  { %4880 = vtanh.f32 %v1660_v34  ;;  %v1661_v42 = vmul.f32 0.7978846, %v1653_v35  ;;  %v1663_v43 = vmul.f32 0.7978846, %v1655_v36  ;;  %v1654_v44 = vadd.f32 %v1646_v37, %v5584_v13 }
 0xbb4   :  { %v1656_v45 = vadd.f32 %v1648_v40, %v5586_v14 }
 0xbb5   :  { %4882 = vtanh.f32 %v1661_v42  ;;  %v1662_v46 = vmul.f32 0.7978846, %v1654_v44 }
 0xbb6   :  { %4884 = vtanh.f32 %v1663_v43  ;;  %v1664_v49 = vmul.f32 0.7978846, %v1656_v45 }
 0xbb7   :  { %4886 = vtanh.f32 %v1662_v46 }
 0xbb8   :  { %4888 = vtanh.f32 %v1664_v49 }
 0xbbd   :  { %v4875_v52 = vpop.eup %4874 }
 0xbbe   :  { %v4877_v54 = vpop.eup %4876  ;;  %v1673_v62 = vadd.f32 1.0, %v4875_v52 }
 0xbbf   :  { %v4879_v55 = vpop.eup %4878  ;;  %v1675_v4 = vadd.f32 1.0, %v4877_v54 }
 0xbc0   :  { %v4881_v58 = vpop.eup %4880  ;;  %v1674_v59 = vadd.f32 1.0, %v4879_v55  ;;  %v1681_v17 = vmul.f32 0.5, %v1673_v62  ;;  %v4722_v55 = vld [vmem:[#allocation8 + $0x168] ss:$12 sps:$4 sm:$0xff]  }
 0xbc1   :  { %v1676_v63 = vadd.f32 1.0, %v4881_v58  ;;  %v1683_v23 = vmul.f32 0.5, %v1675_v4  ;;  %v4724_v58 = vld [vmem:[#allocation8 + $0x16c] ss:$12 sps:$4 sm:$0xff]  }
 0xbc2   :  { %v4883_v60 = vpop.eup %4882  ;;  %v1682_v10 = vmul.f32 0.5, %v1674_v59  ;;  %v1689_v28 = vmul.f32 %v1681_v17, %v5556_v47  ;;  %v4725_v59 = vld [vmem:[#allocation8 + $0x170] ss:$12 sps:$4 sm:$0xff]   ;;  %2268 = vmatprep.subr.bf16.mxu0 %v4724_v58  ;;  %v4734_v17 = vld [vmem:[#allocation8 + $0x120] ss:$12 sps:$4 sm:$0xff]  }
 0xbc3   :  { %v4885_v50 = vpop.eup %4884  ;;  %v1677_v5 = vadd.f32 1.0, %v4883_v60  ;;  %v1684_v21 = vmul.f32 0.5, %v1676_v63  ;;  %v1691_v32 = vmul.f32 %v1683_v23, %v5558_v48  ;;  %v4738_v23 = vld [vmem:[#allocation8 + $0x108] ss:$12 sps:$4 sm:$0xff]  }
 0xbc4   :  { %v4887_v6 = vpop.eup %4886  ;;  %v1679_v7 = vadd.f32 1.0, %v4885_v50  ;;  %v1690_v26 = vmul.f32 %v1682_v10, %v5564_v56  ;;  %v4733_v10 = vld [vmem:[#allocation8 + $0x140] ss:$12 sps:$4 sm:$0xff]  }
 0xbc5   :  { %v4889_v8 = vpop.eup %4888  ;;  %v1685_v11 = vmul.f32 0.5, %v1677_v5  ;;  %v1678_v9 = vadd.f32 1.0, %v4887_v6  ;;  %v1692_v29 = vmul.f32 %v1684_v21, %v5566_v57  ;;  %v4008_v57 = vld [vmem:[#allocation16] ss:$0 sm:$0xff]  ;;  %v4740_v21 = vld [vmem:[#allocation8 + $0x10c] ss:$12 sps:$4 sm:$0xff]  }
 0xbc6   :  { %v1687_v19 = vmul.f32 0.5, %v1679_v7  ;;  %v1680_v20 = vadd.f32 1.0, %v4889_v8  ;;  %v4728_v6 = vld [vmem:[#allocation8 + $0x154] ss:$12 sps:$4 sm:$0xff]   ;;  %v4726_v7 = vld [vmem:[#allocation8 + $0x150] ss:$12 sps:$4 sm:$0xff]  }
 0xbc7   :  { %v1686_v41 = vmul.f32 0.5, %v1678_v9  ;;  %v1693_v12 = vmul.f32 %v1685_v11, %v5574_v51  ;;  %v4729_v8 = vld [vmem:[#allocation8 + $0x158] ss:$12 sps:$4 sm:$0xff]   ;;  %v4732_v11 = vld [vmem:[#allocation8 + $0x13c] ss:$12 sps:$4 sm:$0xff]  }
 0xbc8   :  { %v1688_v24 = vmul.f32 0.5, %v1680_v20  ;;  %v1695_v25 = vmul.f32 %v1687_v19, %v5576_v3  ;;  %v4730_v9 = vld [vmem:[#allocation8 + $0x138] ss:$12 sps:$4 sm:$0xff]   ;;  %v4737_v20 = vld [vmem:[#allocation8 + $0x128] ss:$12 sps:$4 sm:$0xff]  }
 0xbc9   :  { %v1694_v27 = vmul.f32 %v1686_v41, %v5584_v13  ;;  %v1697_v34 = vpack.c.bf16 %v1693_v12, %v1689_v28  ;;  %v4736_v19 = vld [vmem:[#allocation8 + $0x124] ss:$12 sps:$4 sm:$0xff]   ;;  %v4744_v12 = vld [vmem:[#allocation8 + $0xf4] ss:$12 sps:$4 sm:$0xff]  }
 0xbca   :  { %v1696_v31 = vmul.f32 %v1688_v24, %v5586_v14  ;;  %v1699_v51 = vpack.c.bf16 %v1695_v25, %v1691_v32  ;;  %v4741_v41 = vld [vmem:[#allocation8 + $0x110] ss:$12 sps:$4 sm:$0xff]   ;;  %v4745_v25 = vld [vmem:[#allocation8 + $0xf8] ss:$12 sps:$4 sm:$0xff]   ;;  %v4749_v28 = vld [vmem:[#allocation8 + $0xe0] ss:$12 sps:$4 sm:$0xff]  }
 0xbcb   :  { %v1698_v33 = vpack.c.bf16 %v1694_v27, %v1690_v26  ;;  %v4742_v24 = vld [vmem:[#allocation8 + $0xf0] ss:$12 sps:$4 sm:$0xff]   ;;  %v4746_v27 = vld [vmem:[#allocation8 + $0xd8] ss:$12 sps:$4 sm:$0xff]   ;;  %v4753_v32 = vld [vmem:[#allocation8 + $0xc8] ss:$12 sps:$4 sm:$0xff]  }
 0xbcc   :  { %v1700_v30 = vpack.c.bf16 %v1696_v31, %v1692_v29  ;;  %v4748_v26 = vld [vmem:[#allocation8 + $0xdc] ss:$12 sps:$4 sm:$0xff]   ;;  %v4752_v29 = vld [vmem:[#allocation8 + $0xc4] ss:$12 sps:$4 sm:$0xff]   ;;  %v4750_v31 = vld [vmem:[#allocation8 + $0xc0] ss:$12 sps:$4 sm:$0xff]  }
 0xbcd   :  { %1996 = vmatprep.mubr.bf16.mxu0 %v1698_v33 }
 0xbce   :  { %2037 = vmatprep.mubr.bf16.mxu1 %v1700_v30  ;;  %1997 = vmatmul.mubr.bf16.vlgmr.msra.gmra.mxu0 %v1697_v34 }
 0xbcf   :  { %2038 = vmatmul.mubr.bf16.vlgmr.msra.gmra.mxu1 %v1699_v51  ;;  %2300 = vmatprep.mubr.bf16.mxu0 %v5187_v0 }
 0xbd0   :  { %4474 = vmatprep.mubr.msk.bf16.mxu1 %vm5189_vm0, %v5188_v1  ;;  %4459 = vmatpush3.bf16.msra.mxu1 %v4725_v59 }
 0xbd1   :  { %2269 = vmatpush1.bf16.msra.mxu0 %v4722_v55  ;;  %4460 = vmatprep.subr.bf16.mxu1 %v5188_v1 }
 0xbd2   :  { %2270 = vmatprep.subr.bf16.mxu0 %v4728_v6 }
 0xbd4   :  { %4461 = vmatpush3.bf16.msra.mxu1 %v4729_v8 }
 0xbd5   :  { %2271 = vmatpush1.bf16.msra.mxu0 %v4726_v7  ;;  %4462 = vmatprep.subr.bf16.mxu1 %v5188_v1 }
 0xbd6   :  { %2272 = vmatprep.subr.bf16.mxu0 %v4732_v11 }
 0xbd8   :  { %4463 = vmatpush3.bf16.msra.mxu1 %v4733_v10 }
 0xbd9   :  { %2273 = vmatpush1.bf16.msra.mxu0 %v4730_v9  ;;  %4464 = vmatprep.subr.bf16.mxu1 %v5188_v1 }
 0xbda   :  { %2274 = vmatprep.subr.bf16.mxu0 %v4736_v19 }
 0xbdc   :  { %4465 = vmatpush3.bf16.msra.mxu1 %v4737_v20 }
 0xbdd   :  { %2275 = vmatpush1.bf16.msra.mxu0 %v4734_v17  ;;  %4466 = vmatprep.subr.bf16.mxu1 %v5188_v1 }
 0xbde   :  { %2276 = vmatprep.subr.bf16.mxu0 %v4740_v21 }
 0xbe0   :  { %4467 = vmatpush3.bf16.msra.mxu1 %v4741_v41 }
 0xbe1   :  { %2277 = vmatpush1.bf16.msra.mxu0 %v4738_v23  ;;  %4468 = vmatprep.subr.bf16.mxu1 %v5188_v1 }
 0xbe2   :  { %2278 = vmatprep.subr.bf16.mxu0 %v4744_v12 }
 0xbe4   :  { %4469 = vmatpush3.bf16.msra.mxu1 %v4745_v25 }
 0xbe5   :  { %2279 = vmatpush1.bf16.msra.mxu0 %v4742_v24  ;;  %4470 = vmatprep.subr.bf16.mxu1 %v5188_v1 }
 0xbe6   :  { %2280 = vmatprep.subr.bf16.mxu0 %v4748_v26 }
 0xbe8   :  { %4471 = vmatpush3.bf16.msra.mxu1 %v4749_v28 }
 0xbe9   :  { %2281 = vmatpush1.bf16.msra.mxu0 %v4746_v27  ;;  %4472 = vmatprep.subr.bf16.mxu1 %v5188_v1 }
 0xbea   :  { %2282 = vmatprep.subr.bf16.mxu0 %v4752_v29 }
 0xbec   :  { %4473 = vmatpush3.bf16.msra.mxu1 %v4753_v32 }
 0xbed   :  { %2283 = vmatpush1.bf16.msra.mxu0 %v4750_v31  ;;  %4484 = vmatprep.subr.bf16.mxu1 %v5188_v1 }
 0xbee   :  { %4478 = vmatprep.subr.bf16.mxu0 %v5188_v1 }
 0xc8e   :  { %v4230_v47 = vpop.f32.mrf.mxu0 }
 0xc8f   :  { %v4252_v56 = vpop.f32.mrf.mxu1 }
 0xc90   :  { %v4231_v3 = vpop.f32.mrf.mxu0 }
 0xc91   :  { %v4232_v13 = vadd.f32 %v4231_v3, %v4230_v47  ;;  %v4253_v14 = vpop.f32.mrf.mxu1 }
 0xc92   :  { %v4233_v48 = vpop.f32.mrf.mxu0  ;;  %v4254_v36 = vadd.f32 %v4253_v14, %v4252_v56 }
 0xc93   :  { %v1999_v35 = vadd.f32 %v4232_v13, %v4008_v57  ;;  %v4255_v37 = vpop.f32.mrf.mxu1  ;;  %v4041_v13 = vld [vmem:[%s5872_s17] ss:$0 sm:$0xff] }
 0xc94   :  { %v4234_v40 = vpop.f32.mrf.mxu0 }
 0xc95   :  { %v2040_v42 = vadd.f32 %v4254_v36, %v1999_v35  ;;  %v4235_v43 = vadd.f32 %v4234_v40, %v4233_v48  ;;  %v4256_v44 = vpop.f32.mrf.mxu1  ;;  %v4042_v36 = vld [vmem:[%s5873_s18] ss:$0 sm:$0xff] }
 0xc96   :  { %v4257_v46 = vadd.f32 %v4256_v44, %v4255_v37  ;;  %v4043_v44 = vld [vmem:[%s5863_s8 + $0x3] sm:$0x7] }
 0xc97   :  { %v2002_v45 = vadd.f32 %v4235_v43, %v4008_v57  ;;  %v2046_v49 = vadd.f32 %v2040_v42, %v5540_v2  ;;  %v2136_v55 = vrot.slane %v4043_v44, %v5419_v18 }
 0xc99   :  { %v2043_v52 = vadd.f32 %v4257_v46, %v2002_v45  ;;  %2050 = vadd.xlane.f32.xlu1 %v2046_v49  ;;  %v2132_v45 = vrot.slane %v4043_v44, %v5413_v16 }
 0xc9b   :  { %v2047_v54 = vadd.f32 %v2043_v52, %v5542_v39 }
 0xc9d   :  { %2052 = vadd.xlane.f32.xlu0 %v2047_v54 }
 0xd22   :  { %v2051_v60 = vpop.xlane.xlu1 %2050 }
 0xd23   :  { %v2054_v62 = vmul.f32 0.0078125, %v2051_v60 }
 0xd25   :  { %v5618_v63 = vsub.f32 %v2046_v49, %v2054_v62  ;;  %v2128_v62 = vrot.slane %v4043_v44, %v5423_v22 }
 0xd26   :  { %v2053_v50 = vpop.xlane.xlu0 %2052 }
 0xd27   :  { %v2055_v4 = vmul.f32 0.0078125, %v2053_v50  ;;  %v2058_v2 = vmul.f32 %v5618_v63, %v5618_v63 }
 0xd29   :  { %v5622_v5 = vsub.f32 %v2047_v54, %v2055_v4  ;;  %2060 = vadd.xlane.f32.xlu1 %v2058_v2 }
 0xd2b   :  { %v2059_v39 = vmul.f32 %v5622_v5, %v5622_v5 }
 0xd2d   :  { %2062 = vadd.xlane.f32.xlu0 %v2059_v39 }
 0xdb2   :  { %v2061_v33 = vpop.xlane.xlu1 %2060 }
 0xdb3   :  { %v2064_v30 = vmul.f32 0.0078125, %v2061_v33 }
 0xdb5   :  { %v2066_v34 = vadd.f32 1e-12, %v2064_v30 }
 0xdb6   :  { %v2063_v51 = vpop.xlane.xlu0 %2062 }
 0xdb7   :  { %4890 = vrsqrt.f32 %v2066_v34  ;;  %v2065_v47 = vmul.f32 0.0078125, %v2063_v51 }
 0xdb9   :  { %v2067_v56 = vadd.f32 1e-12, %v2065_v47 }
 0xdbb   :  { %4892 = vrsqrt.f32 %v2067_v56 }
 0xdc4   :  { %v4891_v57 = vpop.eup %4890 }
 0xdc5   :  { %v2070_v3 = vmul.f32 %v4891_v57, %v5618_v63 }
 0xdc7   :  { %v2078_v35 = vmul.f32 %v4041_v13, %v2070_v3 }
 0xdc8   :  { %v4893_v14 = vpop.eup %4892 }
 0xdc9   :  { %v2071_v48 = vmul.f32 %v4893_v14, %v5622_v5  ;;  %v5642_v40 = vadd.f32 %v4042_v36, %v2078_v35 }
 0xdcb   :  { %v2079_v37 = vmul.f32 %v4041_v13, %v2071_v48 }
 0xdcd   :  { %v5644_v42 = vadd.f32 %v4042_v36, %v2079_v37 }
 0xdcf   :  { %v2088_v43 = vpack.c.bf16 %v5644_v42, %v5642_v40 }
 0xdd1   :  { %2301 = vmatmul.mubr.bf16.vlgmr.msra.gmra.mxu0 %v2088_v43  ;;  %4475 = vmatmul.mubr.bf16.vlgmr.msra.gmra.mxu1 %v2088_v43 }
 0xdd2   :  { %4480 = vmatprep.mubr.msk.bf16.mxu0 %vm5189_vm0, %v5188_v1  ;;  %4486 = vmatprep.mubr.msk.bf16.mxu1 %vm5189_vm0, %v5188_v1 }
 0xe91   :  { %v2302_v46 = vpop.f32.mrf.mxu0  ;;  %v2345_v49 = vpop.f32.mrf.mxu1 }
 0xe92   :  { %v2346_v2 = vadd.f32 %v2345_v49, %v2136_v55  ;;  %v2303_v6 = vadd.f32 %v2302_v46, %v2128_v62 }
 0xe93   :  { %v2304_v52 = vpop.f32.mrf.mxu0  ;;  %v4476_v54 = vpop.f32.mrf.mxu1 }
 0xe94   :  { %v2305_v58 = vadd.f32 %v2304_v52, %v2132_v45  ;;  %v5660_v8 = vpack.c.bf16 %v2346_v2, %v2346_v2  ;;  %v2352_v10 = vpack.c.bf16 %v2303_v6, %v2303_v6 }
 0xe95   :  { %v2306_v59 = vpop.f32.mrf.mxu0  ;;  %v2348_v60 = vpop.f32.mrf.mxu1 }
 0xe96   :  { %v2354_v63 = vpack.c.bf16 %v2305_v58, %v2305_v58  ;;  %v2349_v11 = vadd.f32 %v2348_v60, %v2136_v55  ;;  %v2307_v17 = vadd.f32 %v2306_v59, %v2128_v62  ;;  %v2478_v19 = vsel %vm802_vm5, %v5660_v8, 0 }
 0xe97   :  { %v2308_v50 = vpop.f32.mrf.mxu0  ;;  %v4477_v4 = vpop.f32.mrf.mxu1 }
 0xe98   :  { %v2362_v5 = vsel %vm681_vm4, %v2354_v63, 0  ;;  %v2309_v39 = vadd.f32 %v2308_v50, %v2132_v45  ;;  %v5666_v20 = vpack.c.bf16 %v2349_v11, %v2349_v11  ;;  %v2353_v21 = vpack.c.bf16 %v2307_v17, %v2307_v17 }
 0xe99   :  { %4479 = vmatpush3.bf16.xpose.msra.mxu0 %v2362_v5 }
 0xe9a   :  { %v2355_v7 = vpack.c.bf16 %v2309_v39, %v2309_v39  ;;  %4490 = vmatprep.subr.bf16.mxu0 %v5188_v1  ;;  %v2524_v23 = vsel %vm802_vm5, %v5666_v20, 0 }
 0xe9c   :  { %v2408_v9 = vsel %vm681_vm4, %v2355_v7, 0 }
 0xe9d   :  { %4485 = vmatpush3.bf16.xpose.msra.mxu1 %v2408_v9 }
 0xe9e   :  { %4496 = vmatprep.subr.bf16.mxu1 %v5188_v1 }
 0xea0   :  { %4481 = vmatmul.mubr.msk.bf16.vlgmr.msra.gmra.mxu0 %vm681_vm4, %v2352_v10 }
 0xea1   :  { %4491 = vmatpush3.bf16.msra.mxu0 %v2478_v19  ;;  %4492 = vmatprep.mubr.msk.bf16.mxu0 %vm5189_vm0, %v5188_v1 }
 0xea2   :  { %4502 = vmatprep.subr.bf16.mxu0 %v5188_v1 }
 0xea4   :  { %4487 = vmatmul.mubr.msk.bf16.vlgmr.msra.gmra.mxu1 %vm681_vm4, %v2353_v21 }
 0xea5   :  { %4497 = vmatpush3.bf16.msra.mxu1 %v2524_v23  ;;  %4498 = vmatprep.mubr.msk.bf16.mxu1 %vm5189_vm0, %v5188_v1 }
 0xea6   :  { %4508 = vmatprep.subr.bf16.mxu1 %v5188_v1 }
 0xf60   :  { %v2398_v41 = vpop.f32.mrf.mxu0 }
 0xf61   :  { %v2399_v12 = vadd.f32 %v2398_v41, %v5450_v53 }
 0xf62   :  { %v4482_v24 = vpop.f32.mrf.mxu0 }
 0xf63   :  { %v2450_v25 = vsel %vm774_vm6, %v2399_v12, -inf }
 0xf64   :  { %v2444_v26 = vpop.f32.mrf.mxu1  ;;  %2451 = vmax.xlane.f32.xlu1 %v2450_v25  ;;  %v2401_v27 = vpop.f32.mrf.mxu0 }
 0xf65   :  { %v2445_v28 = vadd.f32 %v2444_v26, %v5455_v61 }
 0xf66   :  { %v4483_v29 = vpop.f32.mrf.mxu0  ;;  %v4488_v31 = vpop.f32.mrf.mxu1 }
 0xf67   :  { %v2453_v32 = vsel %vm774_vm6, %v2445_v28, -inf }
 0xf68   :  { %2454 = vmax.xlane.f32.xlu0 %v2453_v32  ;;  %v2447_v33 = vpop.f32.mrf.mxu1 }
 0xf6a   :  { %v4489_v30 = vpop.f32.mrf.mxu1 }
 0xf75   :  { %2580 = vrot.lane.b32.xlu1 %v2354_v63, %s5179_s5 }
 0xfed   :  { %v2452_v34 = vpop.xlane.xlu1 %2451 }
 0xfee   :  { %v2456_v51 = vsub.f32 %v2399_v12, %v2452_v34 }
 0xff0   :  { %v2458_v47 = vmul.f32 1.442695, %v2456_v51 }
 0xff1   :  { %v2455_v56 = vpop.xlane.xlu0 %2454  ;;  %v2581_v36 = vpop.permute.xlu1 %2580 }
 0xff2   :  { %4894 = vpow2.f32 %v2458_v47  ;;  %v2457_v57 = vsub.f32 %v2445_v28, %v2455_v56  ;;  %v2586_v52 = vsel %vm681_vm4, %v2581_v36, 0 }
 0xff4   :  { %v2460_v3 = vmul.f32 1.442695, %v2457_v57 }
 0xff6   :  { %4896 = vpow2.f32 %v2460_v3 }
 0xfff   :  { %v4895_v13 = vpop.eup %4894 }
0x1000   :  { %v2462_v14 = vsel %vm774_vm6, %v4895_v13, 0.0 }
0x1001   :  { %2463 = vadd.xlane.f32.xlu1 %v2462_v14 }
0x1003   :  { %v4897_v48 = vpop.eup %4896 }
0x1004   :  { %v2465_v35 = vsel %vm774_vm6, %v4897_v48, 0.0 }
0x1005   :  { %2466 = vadd.xlane.f32.xlu0 %v2465_v35  ;;  %v4758_v35 = vld [vmem:[#allocation10 + $0x78] sm:$0xff]  }
0x1012   :  { %2577 = vrot.lane.b32.xlu1 %v2352_v10, %s5179_s5 }
0x1016   :  { %2629 = vrot.lane.b32.xlu1 %v2353_v21, %s5179_s5 }
0x101b   :  { %2632 = vrot.lane.b32.xlu0 %v2355_v7, %s5179_s5 }
0x108a   :  { %v2464_v37 = vpop.xlane.xlu1 %2463 }
0x108b   :  { %4898 = vrcp.f32 %v2464_v37 }
0x108e   :  { %v2467_v43 = vpop.xlane.xlu0 %2466  ;;  %v2578_v60 = vpop.permute.xlu1 %2577 }
0x108f   :  { %4900 = vrcp.f32 %v2467_v43 }
0x1092   :  { %v2633_v55 = vpop.permute.xlu0 %2632  ;;  %v2630_v62 = vpop.permute.xlu1 %2629 }
0x1093   :  { %v2638_v59 = vsel %vm681_vm4, %v2633_v55, 0  ;;  %v4761_v55 = vld [vmem:[#allocation10 + $0x60] sm:$0xff]  }
0x1098   :  { %v4899_v44 = vpop.eup %4898 }
0x1099   :  { %v2470_v45 = vmul.f32 %v4899_v44, %v4895_v13  ;;  %v4754_v44 = vld [vmem:[#allocation10 + $0x58] sm:$0xff]  }
0x109b   :  { %v2472_v46 = vpack.c.bf16 %v2470_v45, %v2470_v45  ;;  %v4759_v45 = vld [vmem:[#allocation10 + $0x70] sm:$0xff]  }
0x109c   :  { %v4901_v49 = vpop.eup %4900 }
0x109d   :  { %4493 = vmatmul.mubr.msk.bf16.vlgmr.msra.gmra.mxu0 %vm774_vm6, %v2472_v46  ;;  %v2471_v54 = vmul.f32 %v4901_v49, %v4897_v48  ;;  %v4755_v46 = vld [vmem:[#allocation10 + $0x50] sm:$0xff]   ;;  %v4756_v49 = vld [vmem:[#allocation10 + $0x48] sm:$0xff]  }
0x109e   :  { %4503 = vmatpush3.bf16.xpose.msra.mxu0 %v2586_v52  ;;  %4504 = vmatprep.mubr.msk.bf16.mxu0 %vm5189_vm0, %v5188_v1  ;;  %v4757_v52 = vld [vmem:[#allocation10 + $0x40] sm:$0xff]  }
0x109f   :  { %v2473_v58 = vpack.c.bf16 %v2471_v54, %v2471_v54  ;;  %4514 = vmatprep.subr.bf16.mxu0 %v5188_v1  ;;  %v4760_v54 = vld [vmem:[#allocation10 + $0x68] sm:$0xff]  }
0x10a1   :  { %4499 = vmatmul.mubr.msk.bf16.vlgmr.msra.gmra.mxu1 %vm774_vm6, %v2473_v58 }
0x10a2   :  { %4509 = vmatpush3.bf16.xpose.msra.mxu1 %v2638_v59  ;;  %4510 = vmatprep.mubr.msk.bf16.mxu1 %vm5189_vm0, %v5188_v1 }
0x10a3   :  { %4520 = vmatprep.subr.bf16.mxu1 %v5188_v1 }
0x10a5   :  { %4505 = vmatmul.mubr.msk.bf16.vlgmr.msra.gmra.mxu0 %vm681_vm4, %v2578_v60 }
0x10a6   :  { %4516 = vmatprep.mubr.msk.bf16.mxu0 %vm5189_vm0, %v5188_v1 }
0x10a9   :  { %4511 = vmatmul.mubr.msk.bf16.vlgmr.msra.gmra.mxu1 %vm681_vm4, %v2630_v62 }
0x10aa   :  { %4522 = vmatprep.mubr.msk.bf16.mxu1 %vm5189_vm0, %v5188_v1 }
0x115d   :  { %v5704_v63 = vpop.f32.mrf.mxu0 }
0x115f   :  { %v4494_v50 = vpop.f32.mrf.mxu0 }
0x1161   :  { %v2517_v4 = vpop.f32.mrf.mxu0  ;;  %v5706_v2 = vpop.f32.mrf.mxu1 }
0x1162   :  { %v2566_v5 = vpack.c.bf16 %v5706_v2, %v5704_v63 }
0x1163   :  { %v4495_v39 = vpop.f32.mrf.mxu0  ;;  %v4500_v6 = vpop.f32.mrf.mxu1 }
0x1165   :  { %v2563_v7 = vpop.f32.mrf.mxu1  ;;  %v2622_v11 = vpop.f32.mrf.mxu0 }
0x1166   :  { %v2623_v9 = vadd.f32 %v2622_v11, %v5450_v53 }
0x1167   :  { %v4501_v10 = vpop.f32.mrf.mxu1  ;;  %v4506_v17 = vpop.f32.mrf.mxu0 }
0x1168   :  { %v2680_v19 = vsel %vm774_vm6, %v2623_v9, -inf  ;;  %v4086_v10 = vld [vmem:[#allocation11 + $0x1] ss:$0 sm:$0xff] }
0x1169   :  { %v2674_v21 = vpop.f32.mrf.mxu1  ;;  %2681 = vmax.xlane.f32.xlu0 %v2680_v19  ;;  %v2625_v23 = vpop.f32.mrf.mxu0 }
0x116a   :  { %v2675_v41 = vadd.f32 %v2674_v21, %v5455_v61 }
0x116b   :  { %v4507_v12 = vpop.f32.mrf.mxu0  ;;  %v4512_v24 = vpop.f32.mrf.mxu1 }
0x116c   :  { %v2683_v25 = vsel %vm774_vm6, %v2675_v41, -inf }
0x116d   :  { %2684 = vmax.xlane.f32.xlu1 %v2683_v25  ;;  %v2677_v26 = vpop.f32.mrf.mxu1 }
0x116f   :  { %v4513_v27 = vpop.f32.mrf.mxu1 }
0x1170   :  { %v4764_v27 = vld [vmem:[#allocation13 + $0x1e4] ss:$16 sps:$4 sm:$0xff]  }
0x117e   :  { %2705 = vrot.lane.b32.xlu1 %v5660_v8, %s5179_s5 }
0x11f2   :  { %v2682_v53 = vpop.xlane.xlu0 %2681 }
0x11f3   :  { %v2686_v28 = vsub.f32 %v2623_v9, %v2682_v53  ;;  %v4765_v53 = vld [vmem:[#allocation13 + $0x1e8] ss:$16 sps:$4 sm:$0xff]  }
0x11f5   :  { %v2688_v29 = vmul.f32 1.442695, %v2686_v28  ;;  %v4767_v28 = vld [vmem:[#allocation13 + $0x1ec] ss:$16 sps:$4 sm:$0xff]  }
0x11f6   :  { %v2685_v31 = vpop.xlane.xlu1 %2684 }
0x11f7   :  { %4902 = vpow2.f32 %v2688_v29  ;;  %v2687_v32 = vsub.f32 %v2675_v41, %v2685_v31 }
0x11f9   :  { %v2690_v33 = vmul.f32 1.442695, %v2687_v32 }
0x11fa   :  { %v2706_v30 = vpop.permute.xlu1 %2705 }
0x11fb   :  { %4904 = vpow2.f32 %v2690_v33  ;;  %v2711_v61 = vsel %vm802_vm5, %v2706_v30, 0 }
0x11fc   :  { %4515 = vmatpush3.bf16.msra.mxu0 %v2711_v61 }
0x11fd   :  { %4526 = vmatprep.subr.bf16.mxu0 %v5188_v1 }
0x1204   :  { %v4903_v34 = vpop.eup %4902 }
0x1205   :  { %v2692_v51 = vsel %vm774_vm6, %v4903_v34, 0.0 }
0x1206   :  { %2693 = vadd.xlane.f32.xlu0 %v2692_v51  ;;  %v4773_v51 = vld [vmem:[#allocation13 + $0x1cc] ss:$16 sps:$4 sm:$0xff]  }
0x1208   :  { %v4905_v47 = vpop.eup %4904 }
0x1209   :  { %v2695_v8 = vsel %vm774_vm6, %v4905_v47, 0.0 }
0x120a   :  { %2696 = vadd.xlane.f32.xlu0 %v2695_v8  ;;  %v4771_v8 = vld [vmem:[#allocation13 + $0x1c8] ss:$16 sps:$4 sm:$0xff]  }
0x1220   :  { %2754 = vrot.lane.b32.xlu0 %v5666_v20, %s5179_s5 }
0x128f   :  { %v2694_v56 = vpop.xlane.xlu0 %2693 }
0x1290   :  { %4906 = vrcp.f32 %v2694_v56  ;;  %v4776_v56 = vld [vmem:[#allocation13 + $0x1a4] ss:$16 sps:$4 sm:$0xff]  }
0x1293   :  { %v2697_v57 = vpop.xlane.xlu0 %2696 }
0x1294   :  { %4908 = vrcp.f32 %v2697_v57  ;;  %v4779_v57 = vld [vmem:[#allocation13 + $0x1ac] ss:$16 sps:$4 sm:$0xff]  }
0x1297   :  { %v2755_v3 = vpop.permute.xlu0 %2754 }
0x1298   :  { %v2760_v13 = vsel %vm802_vm5, %v2755_v3, 0  ;;  %v4774_v3 = vld [vmem:[#allocation13 + $0x1a0] ss:$16 sps:$4 sm:$0xff]  }
0x1299   :  { %4521 = vmatpush3.bf16.msra.mxu1 %v2760_v13  ;;  %v4777_v13 = vld [vmem:[#allocation13 + $0x1a8] ss:$16 sps:$4 sm:$0xff]  }
0x129a   :  { %4538 = vmatprep.subr.bf16.mxu1 %v5188_v1 }
0x129d   :  { %v4907_v14 = vpop.eup %4906 }
0x129e   :  { %v2700_v48 = vmul.f32 %v4907_v14, %v4903_v34  ;;  %v4770_v34 = vld [vmem:[#allocation13 + $0x1c4] ss:$16 sps:$4 sm:$0xff]   ;;  %v4780_v14 = vld [vmem:[#allocation13 + $0x180] ss:$16 sps:$4 sm:$0xff]  }
0x12a0   :  { %v2702_v36 = vpack.c.bf16 %v2700_v48, %v2700_v48  ;;  %v4782_v48 = vld [vmem:[#allocation13 + $0x184] ss:$16 sps:$4 sm:$0xff]  }
0x12a1   :  { %v4909_v37 = vpop.eup %4908 }
0x12a2   :  { %4517 = vmatmul.mubr.msk.bf16.vlgmr.msra.gmra.mxu0 %vm774_vm6, %v2702_v36  ;;  %v2701_v43 = vmul.f32 %v4909_v37, %v4905_v47  ;;  %v4768_v47 = vld [vmem:[#allocation13 + $0x1c0] ss:$16 sps:$4 sm:$0xff]   ;;  %v4785_v36 = vld [vmem:[#allocation13 + $0x18c] ss:$16 sps:$4 sm:$0xff]   ;;  %v4788_v37 = vld [vmem:[#allocation13 + $0x164] ss:$16 sps:$4 sm:$0xff]  }
0x12a3   :  { %4527 = vmatpush3.bf16.msra.mxu0 %v4758_v35  ;;  %4534 = vmatprep.mubr.msk.bf16.mxu0 %vm5189_vm0, %v5188_v1  ;;  %v4783_v35 = vld [vmem:[#allocation13 + $0x188] ss:$16 sps:$4 sm:$0xff]  }
0x12a4   :  { %v2703_v20 = vpack.c.bf16 %v2701_v43, %v2701_v43  ;;  %4528 = vmatprep.subr.bf16.mxu0 %v5188_v1  ;;  %v4791_v43 = vld [vmem:[#allocation13 + $0x16c] ss:$16 sps:$4 sm:$0xff]  }
0x12a6   :  { %4523 = vmatmul.mubr.msk.bf16.vlgmr.msra.gmra.mxu1 %vm774_vm6, %v2703_v20  ;;  %v4789_v20 = vld [vmem:[#allocation13 + $0x168] ss:$16 sps:$4 sm:$0xff]  }
0x12a7   :  { %4539 = vmatpush3.bf16.msra.mxu1 %v4754_v44  ;;  %4546 = vmatprep.mubr.msk.bf16.mxu1 %vm5189_vm0, %v5188_v1  ;;  %v4786_v44 = vld [vmem:[#allocation13 + $0x160] ss:$16 sps:$4 sm:$0xff]  }
0x12a8   :  { %4540 = vmatprep.subr.bf16.mxu1 %v5188_v1  ;;  %4529 = vmatpush3.bf16.msra.mxu0 %v4759_v45  ;;  %v4794_v45 = vld [vmem:[#allocation13 + $0x144] ss:$16 sps:$4 sm:$0xff]  }
0x12a9   :  { %4530 = vmatprep.subr.bf16.mxu0 %v5188_v1 }
0x12ab   :  { %4541 = vmatpush3.bf16.msra.mxu1 %v4755_v46  ;;  %v4797_v46 = vld [vmem:[#allocation13 + $0x14c] ss:$16 sps:$4 sm:$0xff]  }
0x12ac   :  { %4542 = vmatprep.subr.bf16.mxu1 %v5188_v1  ;;  %4531 = vmatpush3.bf16.msra.mxu0 %v4760_v54  ;;  %v4800_v54 = vld [vmem:[#allocation13 + $0x124] ss:$16 sps:$4 sm:$0xff]  }
0x12ad   :  { %4532 = vmatprep.subr.bf16.mxu0 %v5188_v1 }
0x12af   :  { %4543 = vmatpush3.bf16.msra.mxu1 %v4756_v49  ;;  %v4792_v49 = vld [vmem:[#allocation13 + $0x140] ss:$16 sps:$4 sm:$0xff]  }
0x12b0   :  { %4544 = vmatprep.subr.bf16.mxu1 %v5188_v1  ;;  %4533 = vmatpush3.bf16.msra.mxu0 %v4761_v55  ;;  %v4803_v55 = vld [vmem:[#allocation13 + $0x12c] ss:$16 sps:$4 sm:$0xff]  }
0x12b1   :  { %3219 = vmatprep.subr.bf16.mxu0 %v4764_v27  ;;  %v4812_v27 = vld [vmem:[#allocation14 + $0x138] sm:$0xff]  }
0x12b3   :  { %4545 = vmatpush3.bf16.msra.mxu1 %v4757_v52  ;;  %v4795_v52 = vld [vmem:[#allocation13 + $0x148] ss:$16 sps:$4 sm:$0xff]  }
0x12b4   :  { %3262 = vmatprep.subr.bf16.mxu1 %v4767_v28  ;;  %v4814_v28 = vld [vmem:[#allocation14 + $0x170] sm:$0xff]  }
0x12b6   :  { %4547 = vmatmul.mubr.msk.bf16.vlgmr.msra.gmra.mxu1 %vm681_vm4, %v2566_v5 }
0x12b7   :  { %3294 = vmatprep.mubr.bf16.mxu1 %v5187_v0  ;;  %3263 = vmatpush1.bf16.msra.mxu1 %v4765_v53  ;;  %v4813_v53 = vld [vmem:[#allocation14 + $0x1b8] sm:$0xff]  }
0x12b8   :  { %3264 = vmatprep.subr.bf16.mxu1 %v4773_v51  ;;  %v4824_v51 = vld [vmem:[#allocation14 + $0x120] sm:$0xff]  }
0x12bb   :  { %3265 = vmatpush1.bf16.msra.mxu1 %v4771_v8  ;;  %v4826_v8 = vld [vmem:[#allocation14 + $0x158] sm:$0xff]  }
0x12bc   :  { %3266 = vmatprep.subr.bf16.mxu1 %v4779_v57  ;;  %v4828_v57 = vld [vmem:[#allocation14 + $0x118] sm:$0xff]  }
0x12bf   :  { %3267 = vmatpush1.bf16.msra.mxu1 %v4777_v13  ;;  %v4830_v13 = vld [vmem:[#allocation14 + $0x150] sm:$0xff]  }
0x12c0   :  { %3268 = vmatprep.subr.bf16.mxu1 %v4785_v36  ;;  %v4834_v36 = vld [vmem:[#allocation14 + $0x148] sm:$0xff]  }
0x12c3   :  { %3269 = vmatpush1.bf16.msra.mxu1 %v4783_v35  ;;  %v4833_v35 = vld [vmem:[#allocation14 + $0x190] sm:$0xff]  }
0x12c4   :  { %3270 = vmatprep.subr.bf16.mxu1 %v4791_v43  ;;  %v4836_v43 = vld [vmem:[#allocation14 + $0x108] sm:$0xff]  }
0x12c7   :  { %3271 = vmatpush1.bf16.msra.mxu1 %v4789_v20  ;;  %v4838_v20 = vld [vmem:[#allocation14 + $0x140] sm:$0xff]  }
0x12c8   :  { %3272 = vmatprep.subr.bf16.mxu1 %v4797_v46  ;;  %v4840_v46 = vld [vmem:[#allocation14 + $0x100] sm:$0xff]  }
0x12cb   :  { %3273 = vmatpush1.bf16.msra.mxu1 %v4795_v52  ;;  %v4091_v52 = vld [vmem:[%s5869_s14 + $0x4] sm:$0xf] }
0x12cc   :  { %3274 = vmatprep.subr.bf16.mxu1 %v4803_v55  ;;  %v3050_v55 = vrot.slane %v4091_v52, %v5419_v18 }
0x1362   :  { %v2747_v58 = vpop.f32.mrf.mxu0 }
0x1364   :  { %v4518_v59 = vpop.f32.mrf.mxu0 }
0x1365   :  { %v4801_v59 = vld [vmem:[#allocation13 + $0x128] ss:$16 sps:$4 sm:$0xff]  }
0x1366   :  { %v2750_v60 = vpop.f32.mrf.mxu0  ;;  %v2796_v62 = vpop.f32.mrf.mxu1  ;;  %3275 = vmatpush1.bf16.msra.mxu1 %v4801_v59  ;;  %v3054_v59 = vrot.slane %v4091_v52, %v1373_v38 }
0x1367   :  { %v2802_v50 = vpack.c.bf16 %v2796_v62, %v2747_v58  ;;  %v4798_v58 = vld [vmem:[#allocation13 + $0x120] ss:$16 sps:$4 sm:$0xff]   ;;  %v4806_v60 = vld [vmem:[#allocation13 + $0x104] ss:$16 sps:$4 sm:$0xff]   ;;  %v4809_v62 = vld [vmem:[#allocation13 + $0x10c] ss:$16 sps:$4 sm:$0xff]  }
0x1368   :  { %v4519_v4 = vpop.f32.mrf.mxu0  ;;  %v4524_v39 = vpop.f32.mrf.mxu1  ;;  %3276 = vmatprep.subr.bf16.mxu1 %v4809_v62 }
0x1369   :  { %4535 = vmatmul.mubr.msk.bf16.vlgmr.msra.gmra.mxu0 %vm681_vm4, %v2802_v50  ;;  %v4804_v50 = vld [vmem:[#allocation13 + $0x100] ss:$16 sps:$4 sm:$0xff]   ;;  %v4807_v4 = vld [vmem:[#allocation13 + $0x108] ss:$16 sps:$4 sm:$0xff]  }
0x136a   :  { %v2799_v63 = vpop.f32.mrf.mxu1  ;;  %3251 = vmatprep.mubr.bf16.mxu0 %v5187_v0  ;;  %v4762_v0 = vld [vmem:[#allocation13 + $0x1e0] ss:$16 sps:$4 sm:$0xff]   ;;  %3277 = vmatpush1.bf16.msra.mxu1 %v4807_v4 }
0x136b   :  { %3220 = vmatpush1.bf16.msra.mxu0 %v4762_v0  ;;  %v4811_v0 = vld [vmem:[#allocation14 + $0x1f8] sm:$0xff]  }
0x136c   :  { %v4525_v2 = vpop.f32.mrf.mxu1  ;;  %3221 = vmatprep.subr.bf16.mxu0 %v4770_v34  ;;  %4315 = vmatprep.subr.bf16.mxu1 %v4811_v0  ;;  %v4823_v34 = vld [vmem:[#allocation14 + $0x1e0] sm:$0xff]  }
0x136f   :  { %3222 = vmatpush1.bf16.msra.mxu0 %v4768_v47  ;;  %v4825_v47 = vld [vmem:[#allocation14 + $0x1a0] sm:$0xff]  }
0x1370   :  { %3223 = vmatprep.subr.bf16.mxu0 %v4776_v56  ;;  %v4827_v56 = vld [vmem:[#allocation14 + $0x1d8] sm:$0xff]  }
0x1373   :  { %3224 = vmatpush1.bf16.msra.mxu0 %v4774_v3  ;;  %v4829_v3 = vld [vmem:[#allocation14 + $0x198] sm:$0xff]  }
0x1374   :  { %3225 = vmatprep.subr.bf16.mxu0 %v4782_v48  ;;  %v4832_v48 = vld [vmem:[#allocation14 + $0x110] sm:$0xff]  }
0x1376   :  { %v2941_v5 = vpop.f32.mrf.mxu1 }
0x1377   :  { %3226 = vmatpush1.bf16.msra.mxu0 %v4780_v14  ;;  %v4831_v14 = vld [vmem:[#allocation14 + $0x1d0] sm:$0xff]  }
0x1378   :  { %v4548_v6 = vpop.f32.mrf.mxu1  ;;  %3227 = vmatprep.subr.bf16.mxu0 %v4788_v37  ;;  %v4835_v37 = vld [vmem:[#allocation14 + $0x1c8] sm:$0xff]  }
0x137a   :  { %v2944_v7 = vpop.f32.mrf.mxu1 }
0x137b   :  { %3228 = vmatpush1.bf16.msra.mxu0 %v4786_v44  ;;  %v4837_v44 = vld [vmem:[#allocation14 + $0x188] sm:$0xff]  }
0x137c   :  { %v4549_v11 = vpop.f32.mrf.mxu1  ;;  %3229 = vmatprep.subr.bf16.mxu0 %v4794_v45  ;;  %v4839_v45 = vld [vmem:[#allocation14 + $0x1c0] sm:$0xff]  }
0x137f   :  { %3230 = vmatpush1.bf16.msra.mxu0 %v4792_v49  ;;  %v4841_v49 = vld [vmem:[#allocation14 + $0x180] sm:$0xff]  }
0x1380   :  { %3231 = vmatprep.subr.bf16.mxu0 %v4800_v54  ;;  %v3042_v54 = vrot.slane %v4091_v52, %v5423_v22 }
0x1383   :  { %3232 = vmatpush1.bf16.msra.mxu0 %v4798_v58  ;;  %v3046_v58 = vrot.slane %v4091_v52, %v5413_v16 }
0x1384   :  { %3233 = vmatprep.subr.bf16.mxu0 %v4806_v60 }
0x1387   :  { %3234 = vmatpush1.bf16.msra.mxu0 %v4804_v50 }
0x1429   :  { %v2873_v9 = vpop.f32.mrf.mxu0 }
0x142a   :  { %v2942_v17 = vadd.f32 %v2941_v5, %v2873_v9 }
0x142b   :  { %v4536_v19 = vpop.f32.mrf.mxu0 }
0x142c   :  { %v2956_v21 = vadd.f32 %v4086_v10, %v2942_v17 }
0x142d   :  { %v2876_v23 = vpop.f32.mrf.mxu0 }
0x142e   :  { %v2945_v41 = vadd.f32 %v2944_v7, %v2876_v23  ;;  %v2958_v12 = vadd.f32 %v2956_v21, %v5642_v40  ;;  %v4090_v23 = vld [vmem:[%s5867_s12 + $0x1] ss:$0 sm:$0xff] }
0x142f   :  { %v4537_v24 = vpop.f32.mrf.mxu0 }
0x1430   :  { %v2957_v25 = vadd.f32 %v4086_v10, %v2945_v41  ;;  %2964 = vadd.xlane.f32.xlu1 %v2958_v12  ;;  %v4089_v10 = vld [vmem:[%s5866_s11 + $0x1] ss:$0 sm:$0xff] }
0x1432   :  { %v2959_v26 = vadd.f32 %v2957_v25, %v5644_v42 }
0x1434   :  { %2966 = vadd.xlane.f32.xlu0 %v2959_v26 }
0x14b9   :  { %v2965_v29 = vpop.xlane.xlu1 %2964 }
0x14ba   :  { %v2968_v31 = vmul.f32 0.0078125, %v2965_v29  ;;  %v4815_v29 = vld [vmem:[#allocation14 + $0x1f0] sm:$0xff]  }
0x14bc   :  { %v5745_v32 = vsub.f32 %v2958_v12, %v2968_v31  ;;  %v4816_v31 = vld [vmem:[#allocation14 + $0x130] sm:$0xff]  }
0x14bd   :  { %v2967_v33 = vpop.xlane.xlu0 %2966 }
0x14be   :  { %v2969_v40 = vmul.f32 0.0078125, %v2967_v33  ;;  %v2972_v30 = vmul.f32 %v5745_v32, %v5745_v32  ;;  %v4818_v33 = vld [vmem:[#allocation14 + $0x168] sm:$0xff]  }
0x14c0   :  { %v5749_v61 = vsub.f32 %v2959_v26, %v2969_v40  ;;  %2974 = vadd.xlane.f32.xlu1 %v2972_v30  ;;  %v4810_v26 = vld [vmem:[#allocation14 + $0x178] sm:$0xff]   ;;  %v4819_v40 = vld [vmem:[#allocation14 + $0x1e8] sm:$0xff]  }
0x14c1   :  { %4293 = vmatprep.subr.bf16.mxu0 %v4810_v26  ;;  %v4820_v30 = vld [vmem:[#allocation14 + $0x128] sm:$0xff]  }
0x14c2   :  { %v2973_v42 = vmul.f32 %v5749_v61, %v5749_v61 }
0x14c4   :  { %2976 = vadd.xlane.f32.xlu0 %v2973_v42  ;;  %v4822_v42 = vld [vmem:[#allocation14 + $0x160] sm:$0xff]  }
0x1549   :  { %v2975_v39 = vpop.xlane.xlu1 %2974 }
0x154a   :  { %v2978_v63 = vmul.f32 0.0078125, %v2975_v39 }
0x154c   :  { %v2980_v2 = vadd.f32 1e-12, %v2978_v63 }
0x154d   :  { %v2977_v5 = vpop.xlane.xlu0 %2976 }
0x154e   :  { %4910 = vrsqrt.f32 %v2980_v2  ;;  %v2979_v6 = vmul.f32 0.0078125, %v2977_v5 }
0x1550   :  { %v2981_v7 = vadd.f32 1e-12, %v2979_v6 }
0x1552   :  { %4912 = vrsqrt.f32 %v2981_v7 }
0x155b   :  { %v4911_v11 = vpop.eup %4910 }
0x155c   :  { %v2984_v9 = vmul.f32 %v4911_v11, %v5745_v32  ;;  %v4817_v32 = vld [vmem:[#allocation14 + $0x1b0] sm:$0xff]  }
0x155e   :  { %v2992_v21 = vmul.f32 %v4089_v10, %v2984_v9 }
0x155f   :  { %v4913_v17 = vpop.eup %4912 }
0x1560   :  { %v2985_v19 = vmul.f32 %v4913_v17, %v5749_v61  ;;  %v5761_v12 = vadd.f32 %v4090_v23, %v2992_v21  ;;  %v4821_v61 = vld [vmem:[#allocation14 + $0x1a8] sm:$0xff]  }
0x1562   :  { %v2993_v41 = vmul.f32 %v4089_v10, %v2985_v19 }
0x1564   :  { %v5763_v24 = vadd.f32 %v4090_v23, %v2993_v41 }
0x1566   :  { %v3002_v25 = vpack.c.bf16 %v5763_v24, %v5761_v12 }
0x1568   :  { %3252 = vmatmul.mubr.bf16.vlgmr.msra.gmra.mxu0 %v3002_v25  ;;  %3295 = vmatmul.mubr.bf16.vlgmr.msra.gmra.mxu1 %v3002_v25 }
0x1569   :  { %4294 = vmatpush3.bf16.msra.mxu0 %v4812_v27  ;;  %4316 = vmatpush3.bf16.msra.mxu1 %v4813_v53 }
0x156a   :  { %4295 = vmatprep.subr.bf16.mxu0 %v4814_v28  ;;  %4317 = vmatprep.subr.bf16.mxu1 %v4815_v29 }
0x156d   :  { %4296 = vmatpush3.bf16.msra.mxu0 %v4816_v31  ;;  %4318 = vmatpush3.bf16.msra.mxu1 %v4817_v32 }
0x156e   :  { %4297 = vmatprep.subr.bf16.mxu0 %v4818_v33  ;;  %4319 = vmatprep.subr.bf16.mxu1 %v4819_v40 }
0x1571   :  { %4298 = vmatpush3.bf16.msra.mxu0 %v4820_v30  ;;  %4320 = vmatpush3.bf16.msra.mxu1 %v4821_v61 }
0x1572   :  { %4299 = vmatprep.subr.bf16.mxu0 %v4822_v42  ;;  %4321 = vmatprep.subr.bf16.mxu1 %v4823_v34 }
0x1575   :  { %4300 = vmatpush3.bf16.msra.mxu0 %v4824_v51  ;;  %4322 = vmatpush3.bf16.msra.mxu1 %v4825_v47 }
0x1576   :  { %4301 = vmatprep.subr.bf16.mxu0 %v4826_v8  ;;  %4323 = vmatprep.subr.bf16.mxu1 %v4827_v56 }
0x1579   :  { %4302 = vmatpush3.bf16.msra.mxu0 %v4828_v57  ;;  %4324 = vmatpush3.bf16.msra.mxu1 %v4829_v3 }
0x157a   :  { %4303 = vmatprep.subr.bf16.mxu0 %v4830_v13  ;;  %4325 = vmatprep.subr.bf16.mxu1 %v4831_v14 }
0x157d   :  { %4304 = vmatpush3.bf16.msra.mxu0 %v4832_v48  ;;  %4326 = vmatpush3.bf16.msra.mxu1 %v4833_v35 }
0x157e   :  { %4305 = vmatprep.subr.bf16.mxu0 %v4834_v36  ;;  %4327 = vmatprep.subr.bf16.mxu1 %v4835_v37 }
0x1581   :  { %4306 = vmatpush3.bf16.msra.mxu0 %v4836_v43  ;;  %4328 = vmatpush3.bf16.msra.mxu1 %v4837_v44 }
0x1582   :  { %4307 = vmatprep.subr.bf16.mxu0 %v4838_v20  ;;  %4329 = vmatprep.subr.bf16.mxu1 %v4839_v45 }
0x1585   :  { %4308 = vmatpush3.bf16.msra.mxu0 %v4840_v46  ;;  %4330 = vmatpush3.bf16.msra.mxu1 %v4841_v49 }
0x1586   :  { %4550 = vmatprep.subr.bf16.mxu0 %v5188_v1 }
0x1628   :  { %v3253_v60 = vpop.f32.mrf.mxu0  ;;  %v3296_v62 = vpop.f32.mrf.mxu1 }
0x1629   :  { %v5776_v50 = vadd.f32 %v3253_v60, %v3042_v54  ;;  %v5778_v4 = vadd.f32 %v3296_v62, %v3050_v55 }
0x162a   :  { %v3255_v39 = vpop.f32.mrf.mxu0  ;;  %v3298_v63 = vpop.f32.mrf.mxu1 }
0x162b   :  { %v3305_v2 = vmul.f32 %v5776_v50, %v5776_v50  ;;  %v3307_v22 = vmul.f32 %v5778_v4, %v5778_v4  ;;  %v5784_v18 = vadd.f32 %v3255_v39, %v3046_v58  ;;  %v5786_v16 = vadd.f32 %v3298_v63, %v3054_v59 }
0x162c   :  { %v3257_v15 = vpop.f32.mrf.mxu0  ;;  %v3300_v38 = vpop.f32.mrf.mxu1 }
0x162d   :  { %v3313_v5 = vmul.f32 %v3305_v2, %v5776_v50  ;;  %v3315_v6 = vmul.f32 %v3307_v22, %v5778_v4  ;;  %v3306_v7 = vmul.f32 %v5784_v18, %v5784_v18  ;;  %v3308_v11 = vmul.f32 %v5786_v16, %v5786_v16 }
0x162e   :  { %v5794_v9 = vadd.f32 %v3257_v15, %v3042_v54  ;;  %v5796_v10 = vadd.f32 %v3300_v38, %v3050_v55  ;;  %v3259_v17 = vpop.f32.mrf.mxu0  ;;  %v3302_v19 = vpop.f32.mrf.mxu1 }
0x162f   :  { %v3321_v21 = vmul.f32 0.044715, %v3313_v5  ;;  %v3323_v23 = vmul.f32 0.044715, %v3315_v6  ;;  %v3314_v41 = vmul.f32 %v3306_v7, %v5784_v18  ;;  %v3316_v25 = vmul.f32 %v3308_v11, %v5786_v16 }
0x1630   :  { %v3309_v26 = vmul.f32 %v5794_v9, %v5794_v9  ;;  %v3311_v0 = vmul.f32 %v5796_v10, %v5796_v10  ;;  %v5804_v27 = vadd.f32 %v3259_v17, %v3046_v58  ;;  %v5806_v53 = vadd.f32 %v3302_v19, %v3054_v59 }
0x1631   :  { %v3329_v28 = vadd.f32 %v3321_v21, %v5776_v50  ;;  %v3331_v29 = vadd.f32 %v3323_v23, %v5778_v4  ;;  %v3322_v31 = vmul.f32 0.044715, %v3314_v41  ;;  %v3324_v32 = vmul.f32 0.044715, %v3316_v25 }
0x1632   :  { %v3317_v33 = vmul.f32 %v3309_v26, %v5794_v9  ;;  %v3319_v40 = vmul.f32 %v3311_v0, %v5796_v10  ;;  %v3310_v30 = vmul.f32 %v5804_v27, %v5804_v27  ;;  %v3312_v61 = vmul.f32 %v5806_v53, %v5806_v53 }
0x1633   :  { %v3337_v42 = vmul.f32 0.7978846, %v3329_v28  ;;  %v3339_v34 = vmul.f32 0.7978846, %v3331_v29  ;;  %v3330_v51 = vadd.f32 %v3322_v31, %v5784_v18  ;;  %v3332_v47 = vadd.f32 %v3324_v32, %v5786_v16 }
0x1634   :  { %v3325_v8 = vmul.f32 0.044715, %v3317_v33  ;;  %v3327_v56 = vmul.f32 0.044715, %v3319_v40  ;;  %v3318_v57 = vmul.f32 %v3310_v30, %v5804_v27  ;;  %v3320_v3 = vmul.f32 %v3312_v61, %v5806_v53 }
0x1635   :  { %4914 = vtanh.f32 %v3337_v42  ;;  %v3338_v13 = vmul.f32 0.7978846, %v3330_v51  ;;  %v3340_v14 = vmul.f32 0.7978846, %v3332_v47 }
0x1636   :  { %4916 = vtanh.f32 %v3339_v34  ;;  %v3333_v48 = vadd.f32 %v3325_v8, %v5794_v9  ;;  %v3335_v35 = vadd.f32 %v3327_v56, %v5796_v10  ;;  %v3326_v36 = vmul.f32 0.044715, %v3318_v57 }
0x1637   :  { %4918 = vtanh.f32 %v3338_v13  ;;  %v3328_v37 = vmul.f32 0.044715, %v3320_v3 }
0x1638   :  { %4920 = vtanh.f32 %v3340_v14  ;;  %v3341_v43 = vmul.f32 0.7978846, %v3333_v48  ;;  %v3343_v44 = vmul.f32 0.7978846, %v3335_v35  ;;  %v3334_v20 = vadd.f32 %v3326_v36, %v5804_v27 }
0x1639   :  { %v3336_v45 = vadd.f32 %v3328_v37, %v5806_v53 }
0x163a   :  { %4922 = vtanh.f32 %v3341_v43  ;;  %v3342_v46 = vmul.f32 0.7978846, %v3334_v20 }
0x163b   :  { %4924 = vtanh.f32 %v3343_v44  ;;  %v3344_v49 = vmul.f32 0.7978846, %v3336_v45 }
0x163c   :  { %4926 = vtanh.f32 %v3342_v46 }
0x163d   :  { %4928 = vtanh.f32 %v3344_v49 }
0x1642   :  { %v4915_v52 = vpop.eup %4914 }
0x1643   :  { %v4917_v54 = vpop.eup %4916  ;;  %v3353_v62 = vadd.f32 1.0, %v4915_v52 }
0x1644   :  { %v4919_v55 = vpop.eup %4918  ;;  %v3355_v2 = vadd.f32 1.0, %v4917_v54 }
0x1645   :  { %v4921_v58 = vpop.eup %4920  ;;  %v3354_v59 = vadd.f32 1.0, %v4919_v55  ;;  %v3361_v17 = vmul.f32 0.5, %v3353_v62  ;;  %v4842_v55 = vld [vmem:[#allocation17 + $0x38] sm:$0xff]   ;;  %v4848_v62 = vld [vmem:[#allocation17 + $0x8] sm:$0xff]  }
0x1646   :  { %v3356_v39 = vadd.f32 1.0, %v4921_v58  ;;  %v3363_v41 = vmul.f32 0.5, %v3355_v2  ;;  %v4845_v58 = vld [vmem:[#allocation17 + $0x20] sm:$0xff]  }
0x1647   :  { %v4923_v60 = vpop.eup %4922  ;;  %v3362_v11 = vmul.f32 0.5, %v3354_v59  ;;  %v3369_v32 = vmul.f32 %v3361_v17, %v5776_v50  ;;  %v4124_v50 = vld [vmem:[#allocation16 + $0x1] ss:$0 sm:$0xff] }
0x1648   :  { %v4925_v63 = vpop.eup %4924  ;;  %v3357_v22 = vadd.f32 1.0, %v4923_v60  ;;  %v3364_v23 = vmul.f32 0.5, %v3356_v39  ;;  %v3371_v30 = vmul.f32 %v3363_v41, %v5778_v4  ;;  %v4846_v59 = vld [vmem:[#allocation17 + $0x18] sm:$0xff]   ;;  %v4847_v60 = vld [vmem:[#allocation17 + $0x10] sm:$0xff]   ;;  %v4849_v39 = vld [vmem:[#allocation17] sm:$0xff]  }
0x1649   :  { %v4927_v15 = vpop.eup %4926  ;;  %v3359_v38 = vadd.f32 1.0, %v4925_v63  ;;  %v3370_v29 = vmul.f32 %v3362_v11, %v5784_v18 }
0x164a   :  { %v4929_v5 = vpop.eup %4928  ;;  %v3365_v6 = vmul.f32 0.5, %v3357_v22  ;;  %v3358_v7 = vadd.f32 1.0, %v4927_v15  ;;  %v3372_v33 = vmul.f32 %v3364_v23, %v5786_v16 }
0x164b   :  { %v3367_v19 = vmul.f32 0.5, %v3359_v38  ;;  %v3360_v21 = vadd.f32 1.0, %v4929_v5 }
0x164c   :  { %v3366_v25 = vmul.f32 0.5, %v3358_v7  ;;  %v3373_v26 = vmul.f32 %v3365_v6, %v5794_v9  ;;  %v4159_v7 = vld [vmem:[%s5872_s17 + $0x1] ss:$0 sm:$0xff] }
0x164d   :  { %v3368_v0 = vmul.f32 0.5, %v3360_v21  ;;  %v3375_v28 = vmul.f32 %v3367_v19, %v5796_v10 }
0x164e   :  { %v3374_v31 = vmul.f32 %v3366_v25, %v5804_v27  ;;  %v3377_v34 = vpack.c.bf16 %v3373_v26, %v3369_v32 }
0x164f   :  { %v3376_v40 = vmul.f32 %v3368_v0, %v5806_v53  ;;  %v3379_v9 = vpack.c.bf16 %v3375_v28, %v3371_v30 }
0x1650   :  { %v3378_v61 = vpack.c.bf16 %v3374_v31, %v3370_v29 }
0x1651   :  { %v3380_v42 = vpack.c.bf16 %v3376_v40, %v3372_v33  ;;  %v4161_v40 = vld [vmem:[%s5875_s20] ss:$0 sm:$0xff] }
0x1652   :  { %3678 = vmatprep.mubr.bf16.mxu0 %v3378_v61 }
0x1653   :  { %3719 = vmatprep.mubr.bf16.mxu1 %v3380_v42  ;;  %3679 = vmatmul.mubr.bf16.vlgmr.msra.gmra.mxu0 %v3377_v34 }
0x1654   :  { %3720 = vmatmul.mubr.bf16.vlgmr.msra.gmra.mxu1 %v3379_v9  ;;  %4566 = vmatprep.mubr.msk.bf16.mxu0 %vm5189_vm0, %v5188_v1 }
0x1655   :  { %4551 = vmatpush3.bf16.msra.mxu0 %v4842_v55 }
0x1656   :  { %4552 = vmatprep.subr.bf16.mxu0 %v5188_v1 }
0x1713   :  { %v4309_v18 = vpop.f32.mrf.mxu0 }
0x1714   :  { %v4331_v10 = vpop.f32.mrf.mxu1 }
0x1715   :  { %v4310_v27 = vpop.f32.mrf.mxu0 }
0x1716   :  { %v4311_v16 = vadd.f32 %v4310_v27, %v4309_v18  ;;  %v4332_v51 = vpop.f32.mrf.mxu1 }
0x1717   :  { %v4312_v53 = vpop.f32.mrf.mxu0  ;;  %v4333_v4 = vadd.f32 %v4332_v51, %v4331_v10 }
0x1718   :  { %v3681_v47 = vadd.f32 %v4311_v16, %v4124_v50  ;;  %v4334_v8 = vpop.f32.mrf.mxu1 }
0x1719   :  { %v4313_v56 = vpop.f32.mrf.mxu0 }
0x171a   :  { %v3722_v57 = vadd.f32 %v4333_v4, %v3681_v47  ;;  %v4314_v3 = vadd.f32 %v4313_v56, %v4312_v53  ;;  %v4335_v13 = vpop.f32.mrf.mxu1 }
0x171b   :  { %v4336_v48 = vadd.f32 %v4335_v13, %v4334_v8 }
0x171c   :  { %v3684_v14 = vadd.f32 %v4314_v3, %v4124_v50  ;;  %v3728_v35 = vadd.f32 %v3722_v57, %v5761_v12  ;;  %v4843_v12 = vld [vmem:[#allocation17 + $0x30] sm:$0xff]  }
0x171d   :  { %4553 = vmatpush3.bf16.msra.mxu0 %v4843_v12 }
0x171e   :  { %v3725_v36 = vadd.f32 %v4336_v48, %v3684_v14  ;;  %3734 = vadd.xlane.f32.xlu0 %v3728_v35  ;;  %4554 = vmatprep.subr.bf16.mxu0 %v5188_v1 }
0x1720   :  { %v3729_v37 = vadd.f32 %v3725_v36, %v5763_v24  ;;  %v4844_v24 = vld [vmem:[#allocation17 + $0x28] sm:$0xff]  }
0x1721   :  { %4555 = vmatpush3.bf16.msra.mxu0 %v4844_v24 }
0x1722   :  { %3736 = vadd.xlane.f32.xlu1 %v3729_v37  ;;  %4556 = vmatprep.subr.bf16.mxu0 %v5188_v1 }
0x1725   :  { %4557 = vmatpush3.bf16.msra.mxu0 %v4845_v58 }
0x1726   :  { %4558 = vmatprep.subr.bf16.mxu0 %v5188_v1 }
0x1729   :  { %4559 = vmatpush3.bf16.msra.mxu0 %v4846_v59 }
0x172a   :  { %4560 = vmatprep.subr.bf16.mxu0 %v5188_v1 }
0x172d   :  { %4561 = vmatpush3.bf16.msra.mxu0 %v4847_v60 }
0x172e   :  { %4562 = vmatprep.subr.bf16.mxu0 %v5188_v1 }
0x1731   :  { %4563 = vmatpush3.bf16.msra.mxu0 %v4848_v62 }
0x1732   :  { %4564 = vmatprep.subr.bf16.mxu0 %v5188_v1  ;;  %v4160_v1 = vld [vmem:[%s5873_s18 + $0x1] ss:$0 sm:$0xff]  ;;  %s5192_s18 = smov [#allocation19]  }
0x1733   :  { %s3902_s7 = sshll.u32 %s5192_s18, 4  ;;  %s3903_s7 = int_to_ptr.vmem [resolvable:$true] %s3902_s7 }
0x1734   :  { %s5136_s27 = scalar_lea.vmem %s3903_s7, 32  ;;  %p5141_p9 = scmp.lt.s32.totalorder %s3903_s7, %s3903_s7 }
0x1735   :  { %4565 = vmatpush3.bf16.msra.mxu0 %v4849_v39  ;;  %p5137_p8 = scmp.ne.s32.totalorder %s3903_s7, %s5136_s27  ;;  %p5142_p10 = scmp.lt.s32.totalorder %s5136_s27, %s5136_s27 }
0x1737   :  { %p5143_p11 = por %p5142_p10, %p5141_p9 }
0x1739   :  { %p5144_p12 = pnand %p5143_p11, %p5137_p8 }
0x17a7   :  { %v3735_v43 = vpop.xlane.xlu0 %3734 }
0x17a8   :  { %v3738_v44 = vmul.f32 0.0078125, %v3735_v43 }
0x17aa   :  { %v3740_v20 = vsub.f32 %v3728_v35, %v3738_v44 }
0x17ab   :  { %v3737_v45 = vpop.xlane.xlu1 %3736 }
0x17ac   :  { %v3739_v46 = vmul.f32 0.0078125, %v3737_v45  ;;  %v3742_v49 = vmul.f32 %v3740_v20, %v3740_v20 }
0x17ae   :  { %v3741_v52 = vsub.f32 %v3729_v37, %v3739_v46  ;;  %3744 = vadd.xlane.f32.xlu0 %v3742_v49 }
0x17b0   :  { %v3743_v54 = vmul.f32 %v3741_v52, %v3741_v52 }
0x17b2   :  { %3746 = vadd.xlane.f32.xlu1 %v3743_v54 }
0x1837   :  { %v3745_v63 = vpop.xlane.xlu0 %3744 }
0x1838   :  { %v3748_v2 = vmul.f32 0.0078125, %v3745_v63 }
0x183a   :  { %v3750_v22 = vadd.f32 1e-12, %v3748_v2 }
0x183b   :  { %v3747_v15 = vpop.xlane.xlu1 %3746 }
0x183c   :  { %4930 = vrsqrt.f32 %v3750_v22  ;;  %v3749_v38 = vmul.f32 0.0078125, %v3747_v15 }
0x183e   :  { %v3751_v5 = vadd.f32 1e-12, %v3749_v38 }
0x1840   :  { %4932 = vrsqrt.f32 %v3751_v5 }
0x1849   :  { %v4931_v6 = vpop.eup %4930 }
0x184a   :  { %v3754_v11 = vmul.f32 %v4931_v6, %v3740_v20 }
0x184c   :  { %v3762_v17 = vmul.f32 %v4159_v7, %v3754_v11 }
0x184d   :  { %v4933_v19 = vpop.eup %4932 }
0x184e   :  { %v3755_v21 = vmul.f32 %v4933_v19, %v3741_v52  ;;  %v3770_v41 = vadd.f32 %v4160_v1, %v3762_v17 }
0x1850   :  { %v3763_v23 = vmul.f32 %v4159_v7, %v3755_v21  ;;  %v3772_v26 = vpack.c.bf16 %v3770_v41, %v3770_v41 }
0x1852   :  { %v3771_v25 = vadd.f32 %v4160_v1, %v3763_v23  ;;  %v3799_v29 = vunpack.c.l.b16 %v3772_v26 }
0x1854   :  { %v3773_v0 = vpack.c.bf16 %v3771_v25, %v3771_v25 }
0x1856   :  { %v3800_v28 = vunpack.c.l.b16 %v3773_v0 }
0x1858   :  { %v3801_v31 = vrot.slane %v3800_v28, 7 }
0x185a   :  { %v3803_v32 = vsel %vm3802_vm7, %v3801_v31, %v3799_v29 }
0x185b   :  { %v3804_v33 = vpack.c.b16 %v3803_v32, %v3803_v32 }
0x185d   :  { %4567 = vmatmul.mubr.bf16.vlgmr.msra.gmra.mxu0 %v3804_v33 }
0x191d   :  { %v3888_v30 = vpop.f32.mrf.mxu0 }
0x191e   :  { %v3889_v61 = vadd.f32 %v4161_v40, %v3888_v30 }
0x191f   :  { %v4568_v42 = vpop.f32.mrf.mxu0 }
0x1920   :  { %4934 = vtanh.f32 %v3889_v61 }
0x1921   :  { %v3891_v34 = vpop.f32.mrf.mxu0 }
0x1923   :  { %v4569_v9 = vpop.f32.mrf.mxu0 }
0x192d   :  { %v4935_v18 = vpop.eup %4934 }
0x192e   :  { %3895 = vst [vmem:[#allocation19] sm:$0x3] %v4935_v18 }
0x192f   :  { %5147 = shalt.err (!%p5144_p12)
}
0x1930   :  { %3905 = dma.vmem_to_hbm [thread:$0]  %s3903_s7, 32, %s5876_s21, [#allocation4]  }
0x1931   :  { %5168 = dma.done.wait [#allocation4], 32  }
0x1932   :  { %5169 = vsyncadd [#allocation4], 4294967264 }
0x1933   :  { %3909 = vsyncpa [#allocation3], 1 }
0x1934   :  { %3910 = vsyncpa [#allocation6], 1 }
0x1935   :  { %3911 = vsyncpa [#allocation9], 1 }
0x1936   :  { %3912 = vsyncpa [#allocation12], 1 }
0x1937   :  { %3913 = vsyncpa [#allocation15], 1 }
0x1938   :  { %3914 = vsyncpa [#allocation18], 1 }
0x1939   :  { %3915 = vsyncpa [#allocation4], 1 }

</bundles_post_ra>
